<compile_context>
chip_gen: v7x
topology: tpu7x:2x2x1
jax: 0.10.0
libtpu: 0.0.40
codegen_flags: <defaults>
</compile_context>

<pallas_src>
import functools
import math

import jax
import jax.numpy as jnp
from jax.experimental import pallas as pl
from jax.experimental.pallas import tpu as pltpu

BN_EPS = 1e-5
VMEM_LIMIT = 48 * 1024 * 1024   # explicit, with headroom under v7x's 64 MiB


def _chan_tile(c):
    if c % 256 == 0:
        return 256
    if c % 128 == 0:
        return 128
    return c          # < 128: full dim (allowed by the (8,128) rule)


def _pick_tile_m(m, cap=1024):
    """Largest divisor of m that is a multiple of 8 and <= cap, else m."""
    best = None
    for d in range(1, min(m, cap) + 1):
        if m % d == 0 and d % 8 == 0:
            best = d
    return best if best is not None else m


def _pick_row_tile(ho, wo, target_rows):
    """Largest divisor of ho with d*wo <= target_rows and (d*wo) % 8 == 0."""
    best = None
    for d in range(1, ho + 1):
        if ho % d == 0 and d * wo <= target_rows and (d * wo) % 8 == 0:
            best = d
    return best if best is not None else ho


# --------------------------------------------------------------------------
# Kernel 1: implicit-GEMM conv (3x3 or 1x1) with fused BN partial statistics
# --------------------------------------------------------------------------

def _conv_bn_partial_kernel(x_ref, w_ref, o_ref, sum_ref, sq_ref,
                            *, taps, hq, ho, wo, th, cin):
    """One grid step = one image x one output-channel tile.

    x_ref:   (1, Hs, Wq, Cin)   bf16 spatially-padded (phase-decomposed) image
    w_ref:   (T*Cin, TN)        bf16 K-folded weight slab
    o_ref:   (1, Ho*Wo, TN)     bf16 conv output
    sum_ref: (1, 1, TN)         f32 per-image per-channel sum   (BN partial)
    sq_ref:  (1, 1, TN)         f32 per-image per-channel sum^2 (BN partial)
    """
    tn = o_ref.shape[-1]
    tm = th * wo
    n_tiles = ho // th
    w = w_ref[...]                              # load weight slab once

    def tile(r0, m0, s_acc, q_acc):
        # Build the K-folded (tm, T*Cin) bf16 operand for this row tile and
        # run a single MXU dot (no per-tap f32 accumulate adds).
        cols = []
        for (p, roff, coff) in taps:
            win = x_ref[0, pl.ds(p * hq + roff + r0, th), coff:coff + wo, :]
            cols.append(win.reshape(tm, cin))
        lhs = cols[0] if len(cols) == 1 else jnp.concatenate(cols, axis=-1)
        acc = jnp.dot(lhs, w, preferred_element_type=jnp.float32)
        o_ref[0, pl.ds(m0, tm), :] = acc.astype(o_ref.dtype)
        # BN partials from the f32 accumulator (precision kept).
        s_acc = s_acc + jnp.sum(acc, axis=0, keepdims=True)
        q_acc = q_acc + jnp.sum(acc * acc, axis=0, keepdims=True)
        return s_acc, q_acc

    zeros = jnp.zeros((1, tn), jnp.float32)
    if n_tiles == 1:
        s_tot, q_tot = tile(0, 0, zeros, zeros)
    else:
        def body(i, carry):
            m0 = i * tm
            if tm % 8 == 0:
                m0 = pl.multiple_of(m0, 8)
            return tile(i * th, m0, *carry)
        s_tot, q_tot = jax.lax.fori_loop(0, n_tiles, body, (zeros, zeros))

    sum_ref[0] = s_tot
    sq_ref[0] = q_tot


def conv_bn_partial(x_nhwc, w_slab, *, ksize, stride):
    """x_nhwc: (N, H, W, Cin);  w_slab: (ksize*ksize*Cin, Cout) bf16.

    Returns (conv (N, Ho*Wo, Cout) bf16, psum (N,1,Cout) f32,
             psumsq (N,1,Cout) f32, (N, Ho, Wo)).
    """
    N, H, W, Cin = x_nhwc.shape
    KC, Cout = w_slab.shape
    T = ksize * ksize
    assert KC == T * Cin, (KC, T, Cin)

    if ksize == 3:
        Ho = (H - 1) // stride + 1
        Wo = (W - 1) // stride + 1
        xpad = jnp.pad(x_nhwc, ((0, 0), (1, 1), (1, 1), (0, 0)))
        s = stride
        if s == 1:
            xin = xpad
            Hq, Wq = H + 2, W + 2
            taps = tuple((0, dy, dx) for dy in range(3) for dx in range(3))
        else:
            # Phase decomposition: tap (dy,dx) of a stride-s conv reads a
            # contiguous window of phase (dy%s, dx%s) at offset (dy//s, dx//s).
            # Halo per axis after decomposition is (k-1)//s == (2 // s).
            Hq = Ho + (2 // s)
            Wq = Wo + (2 // s)
            phases = []
            for py in range(s):
                for px in range(s):
                    ph = xpad[:, py::s, px::s, :][:, :Hq, :Wq, :]
                    ph = jnp.pad(ph, ((0, 0), (0, Hq - ph.shape[1]),
                                      (0, Wq - ph.shape[2]), (0, 0)))
                    phases.append(ph)
            xin = jnp.concatenate(phases, axis=1)     # (N, s*s*Hq, Wq, Cin)
            taps = tuple(((dy % s) * s + (dx % s), dy // s, dx // s)
                         for dy in range(3) for dx in range(3))
    else:                                             # 1x1 conv, padding=0
        assert ksize == 1
        xin = x_nhwc[:, ::stride, ::stride, :]
        _, Ho, Wo, _ = xin.shape
        Hq, Wq = Ho, Wo
        taps = ((0, 0, 0),)

    xin = xin.astype(jnp.bfloat16)                    # bf16 DMA into the kernel
    Hs = xin.shape[1]
    M = Ho * Wo
    TN = _chan_tile(Cout)
    n_ct = Cout // TN

    # Row-tile size so the folded (tm, T*Cin) bf16 slab stays ~<= 2 MB.
    target_rows = max(128, min(2048, (2 << 20) // max(1, T * Cin * 2)))
    th = _pick_row_tile(Ho, Wo, target_rows)

    kern = functools.partial(_conv_bn_partial_kernel, taps=taps, hq=Hq,
                             ho=Ho, wo=Wo, th=th, cin=Cin)

    # Grid order by operand size: keep the larger operand resident.
    img_bytes = Hs * Wq * Cin * 2
    wgt_bytes = KC * TN * 2
    if img_bytes >= wgt_bytes:
        grid = (N, n_ct)                              # image resident across j
        x_map = lambda n, j: (n, 0, 0, 0)
        w_map = lambda n, j: (0, j)
        o_map = lambda n, j: (n, 0, j)
    else:
        grid = (n_ct, N)                              # weight resident across n
        x_map = lambda j, n: (n, 0, 0, 0)
        w_map = lambda j, n: (0, j)
        o_map = lambda j, n: (n, 0, j)

    conv, psum, psq = pl.pallas_call(
        kern,
        out_shape=(jax.ShapeDtypeStruct((N, M, Cout), jnp.bfloat16),
                   jax.ShapeDtypeStruct((N, 1, Cout), jnp.float32),
                   jax.ShapeDtypeStruct((N, 1, Cout), jnp.float32)),
        grid_spec=pltpu.PrefetchScalarGridSpec(
            num_scalar_prefetch=0,
            grid=grid,
            in_specs=[pl.BlockSpec((1, Hs, Wq, Cin), x_map),
                      pl.BlockSpec((KC, TN), w_map)],
            out_specs=(pl.BlockSpec((1, M, TN), o_map),
                       pl.BlockSpec((1, 1, TN), o_map),
                       pl.BlockSpec((1, 1, TN), o_map))),
        compiler_params=pltpu.CompilerParams(
            dimension_semantics=("parallel", "parallel"),
            vmem_limit_bytes=VMEM_LIMIT),
    )(xin, w_slab)
    return conv, psum, psq, (N, Ho, Wo)


# --------------------------------------------------------------------------
# BN scale/shift reduction (tiny, plain JAX) and fused apply kernel
# --------------------------------------------------------------------------

def _bn_scale_shift(psum, psq, gamma, beta, count):
    s = jnp.sum(psum, axis=(0, 1))
    q = jnp.sum(psq, axis=(0, 1))
    mean = s / count
    var = jnp.maximum(q / count - mean * mean, 0.0)    # clamp >= 0
    scale = gamma.astype(jnp.float32) * jax.lax.rsqrt(var + BN_EPS)
    shift = beta.astype(jnp.float32) - mean * scale
    return scale.reshape(1, -1), shift.reshape(1, -1)


def _bn_act_kernel(*refs, relu, has_res):
    if has_res:
        x_ref, sc_ref, sh_ref, res_ref, o_ref = refs
    else:
        x_ref, sc_ref, sh_ref, o_ref = refs
    y = x_ref[0].astype(jnp.float32) * sc_ref[...] + sh_ref[...]
    if has_res:
        y = y + res_ref[0].astype(jnp.float32)
    if relu:
        y = jnp.maximum(y, 0.0)
    o_ref[0] = y.astype(o_ref.dtype)


def bn_act(conv, scale, shift, *, residual=None, relu=True,
           out_dtype=jnp.float32):
    """conv: (N, M, C) bf16; scale/shift: (1, C) f32; residual: (N, M, C)."""
    N, M, C = conv.shape
    TN = _chan_tile(C)
    TM = _pick_tile_m(M)
    has_res = residual is not None

    kern = functools.partial(_bn_act_kernel, relu=relu, has_res=has_res)
    tile = pl.BlockSpec((1, TM, TN), lambda n, m, j: (n, m, j))
    vec = pl.BlockSpec((1, TN), lambda n, m, j: (0, j))
    in_specs = [tile, vec, vec]
    args = [conv, scale, shift]
    if has_res:
        in_specs.append(tile)
        args.append(residual)

    return pl.pallas_call(
        kern,
        out_shape=jax.ShapeDtypeStruct((N, M, C), out_dtype),
        grid_spec=pltpu.PrefetchScalarGridSpec(
            num_scalar_prefetch=0,
            grid=(N, M // TM, C // TN),
            in_specs=in_specs,
            out_specs=tile),
        compiler_params=pltpu.CompilerParams(
            dimension_semantics=("parallel", "parallel", "parallel"),
            vmem_limit_bytes=VMEM_LIMIT),
    )(*args)


# --------------------------------------------------------------------------
# Parameter handling (mirrors BasicBlock.__init__), no channel padding
# --------------------------------------------------------------------------

def _arrange_conv_w(w):
    """PyTorch (Cout, Cin, kh, kw) -> K-folded (kh*kw*Cin, Cout) bf16."""
    cout, cin, kh, kw = w.shape
    wt = jnp.transpose(w, (2, 3, 1, 0)).reshape(kh * kw * cin, cout)
    return wt.astype(jnp.bfloat16)


def init_basic_block(key, inplanes, planes, stride=1, with_downsample=None):
    if with_downsample is None:
        with_downsample = (stride != 1 or inplanes != planes)
    k1, k2, k3 = jax.random.split(key, 3)
    w1 = jax.random.normal(k1, (planes, inplanes, 3, 3), jnp.float32) * \
        math.sqrt(2.0 / (9 * planes))
    w2 = jax.random.normal(k2, (planes, planes, 3, 3), jnp.float32) * \
        math.sqrt(2.0 / (9 * planes))
    params = {
        'stride': stride, 'planes': planes, 'inplanes': inplanes,
        'w1': _arrange_conv_w(w1),
        'g1': jnp.ones(planes, jnp.float32), 'b1': jnp.zeros(planes, jnp.float32),
        'w2': _arrange_conv_w(w2),
        'g2': jnp.ones(planes, jnp.float32), 'b2': jnp.zeros(planes, jnp.float32),
        'downsample': None,
    }
    if with_downsample:
        wd = jax.random.normal(k3, (planes, inplanes, 1, 1), jnp.float32) * \
            math.sqrt(2.0 / planes)
        params['downsample'] = {
            'w': _arrange_conv_w(wd),
            'g': jnp.ones(planes, jnp.float32),
            'b': jnp.zeros(planes, jnp.float32),
        }
    return params


# --------------------------------------------------------------------------
# BasicBlock forward
# --------------------------------------------------------------------------

def basic_block_forward(params, x_nchw):
    x = jnp.transpose(x_nchw, (0, 2, 3, 1)).astype(jnp.float32)   # NCHW->NHWC
    N, H, W, Cin = x.shape
    stride = params['stride']
    planes = params['planes']

    # conv1 (3x3, stride) with fused BN partial statistics
    conv1, s1, q1, (_, Ho, Wo) = conv_bn_partial(
        x, params['w1'], ksize=3, stride=stride)
    M = Ho * Wo
    count = N * M
    sc1, sh1 = _bn_scale_shift(s1, q1, params['g1'], params['b1'], count)
    # bn1 + relu, emitted in bf16 (it only feeds conv2's MXU operand)
    a1 = bn_act(conv1, sc1, sh1, relu=True, out_dtype=jnp.bfloat16)

    # residual branch
    if params['downsample'] is not None:
        ds = params['downsample']
        convd, sd, qd, _ = conv_bn_partial(x, ds['w'], ksize=1, stride=stride)
        scd, shd = _bn_scale_shift(sd, qd, ds['g'], ds['b'], count)
        residual = bn_act(convd, scd, shd, relu=False, out_dtype=jnp.float32)
    else:
        assert stride == 1 and Cin == planes, \
            "identity residual needs matching shapes"
        residual = x.reshape(N, H * W, Cin)          # unpadded, f32, no copy

    # conv2 (3x3, stride 1) on the bf16 bn1 output (no channel padding)
    a1_img = a1.reshape(N, Ho, Wo, planes)
    conv2, s2, q2, _ = conv_bn_partial(a1_img, params['w2'], ksize=3, stride=1)
    sc2, sh2 = _bn_scale_shift(s2, q2, params['g2'], params['b2'], count)

    # bn2 + residual add + relu, single fused pass
    out = bn_act(conv2, sc2, sh2, residual=residual, relu=True,
                 out_dtype=jnp.float32)

    out = out.reshape(N, Ho, Wo, planes)
    return jnp.transpose(out, (0, 3, 1, 2))          # back to NCHW


# --------------------------------------------------------------------------
# Pure-JAX reference (uses the same bf16-rounded weights) for verification
# --------------------------------------------------------------------------

def _ref_conv(x, w_slab, k, stride, cin):
    w = w_slab.astype(jnp.float32).reshape(k, k, cin, -1)
    pad = ((1, 1), (1, 1)) if k == 3 else ((0, 0), (0, 0))
    return jax.lax.conv_general_dilated(
        x, w, window_strides=(stride, stride), padding=pad,
        dimension_numbers=('NHWC', 'HWIO', 'NHWC'))


def _ref_bn(y, g, b):
    mean = y.mean(axis=(0, 1, 2))
    var = y.var(axis=(0, 1, 2))
    return (y - mean) * jax.lax.rsqrt(var + BN_EPS) * g + b


def reference_block(params, x_nchw):
    x = jnp.transpose(x_nchw, (0, 2, 3, 1)).astype(jnp.float32)
    cin, planes, s = params['inplanes'], params['planes'], params['stride']
    y = _ref_conv(x, params['w1'], 3, s, cin)
    y = jax.nn.relu(_ref_bn(y, params['g1'], params['b1']))
    if params['downsample'] is not None:
        d = params['downsample']
        r = _ref_bn(_ref_conv(x, d['w'], 1, s, cin), d['g'], d['b'])
    else:
        r = x
    y = _ref_conv(y, params['w2'], 3, 1, planes)
    y = jax.nn.relu(_ref_bn(y, params['g2'], params['b2']) + r)
    return jnp.transpose(y, (0, 3, 1, 2))


# --------------------------------------------------------------------------

if __name__ == "__main__":
    key = jax.random.PRNGKey(0)
    kp1, kp2, kx = jax.random.split(key, 3)

    x = jax.random.normal(kx, (2, 32, 16, 16), jnp.float32)   # NCHW

    # 1) BasicBlock(32 -> 32), stride=1, identity residual
    params1 = init_basic_block(kp1, inplanes=32, planes=32, stride=1)
    fwd1 = jax.jit(lambda xi: basic_block_forward(params1, xi))
    out1 = jax.block_until_ready(fwd1(x))
    assert out1.shape == (2, 32, 16, 16), out1.shape
    assert bool(jnp.all(jnp.isfinite(out1)))
    ref1 = reference_block(params1, x)
    err1 = float(jnp.max(jnp.abs(out1 - ref1)) / (jnp.max(jnp.abs(ref1)) + 1e-6))
    assert err1 < 0.08, ("mismatch vs reference", err1)

    # 2) BasicBlock(32 -> 64), stride=2, conv1x1+BN downsample
    params2 = init_basic_block(kp2, inplanes=32, planes=64, stride=2)
    fwd2 = jax.jit(lambda xi: basic_block_forward(params2, xi))
    out2 = jax.block_until_ready(fwd2(x))
    assert out2.shape == (2, 64, 8, 8), out2.shape
    assert bool(jnp.all(jnp.isfinite(out2)))
    ref2 = reference_block(params2, x)
    err2 = float(jnp.max(jnp.abs(out2 - ref2)) / (jnp.max(jnp.abs(ref2)) + 1e-6))
    assert err2 < 0.08, ("mismatch vs reference", err2)

    print("KERNEL_OK")
</pallas_src>

<mosaic_0001>
module attributes {stable_mosaic.version = 11 : i64} {
  func.func @_conv_bn_partial_kernel(%arg0: i32, %arg1: i32, %arg2: memref<1x18x18x32xbf16, #tpu.memory_space<vmem>>, %arg3: memref<288x32xbf16, #tpu.memory_space<vmem>>, %arg4: memref<1x256x32xbf16, #tpu.memory_space<vmem>>, %arg5: memref<1x1x32xf32, #tpu.memory_space<vmem>>, %arg6: memref<1x1x32xf32, #tpu.memory_space<vmem>>) attributes {dimension_semantics = [#tpu.dimension_semantics<parallel>, #tpu.dimension_semantics<parallel>], iteration_bounds = array<i64: 2, 1>, scalar_prefetch = 0 : i64, scratch_operands = 0 : i64, tpu.core_type = #tpu.core_type<tc>, window_params = [{transform_indices = @transform_0, window_bounds = array<i64: 1, 18, 18, 32>}, {transform_indices = @transform_1, window_bounds = array<i64: 288, 32>}, {transform_indices = @transform_2, window_bounds = array<i64: 1, 256, 32>}, {transform_indices = @transform_3, window_bounds = array<i64: 1, 1, 32>}, {transform_indices = @transform_4, window_bounds = array<i64: 1, 1, 32>}]} {
    %c0 = arith.constant 0 : index
    %c0_0 = arith.constant 0 : index
    %0 = vector.load %arg3[%c0, %c0_0] : memref<288x32xbf16, #tpu.memory_space<vmem>>, vector<288x32xbf16>
    %cst = arith.constant 0.000000e+00 : f32
    %1 = vector.broadcast %cst : f32 to vector<1x32xf32>
    %c0_1 = arith.constant 0 : index
    %c0_2 = arith.constant 0 : index
    %c0_3 = arith.constant 0 : index
    %c0_4 = arith.constant 0 : index
    %2 = vector.load %arg2[%c0_1, %c0_2, %c0_3, %c0_4] : memref<1x18x18x32xbf16, #tpu.memory_space<vmem>>, vector<1x16x16x32xbf16>
    %3 = vector.shape_cast %2 : vector<1x16x16x32xbf16> to vector<16x16x32xbf16>
    %4 = vector.shape_cast %3 : vector<16x16x32xbf16> to vector<256x32xbf16>
    %c0_5 = arith.constant 0 : index
    %c0_6 = arith.constant 0 : index
    %c1 = arith.constant 1 : index
    %c0_7 = arith.constant 0 : index
    %5 = vector.load %arg2[%c0_5, %c0_6, %c1, %c0_7] : memref<1x18x18x32xbf16, #tpu.memory_space<vmem>>, vector<1x16x16x32xbf16>
    %6 = vector.shape_cast %5 : vector<1x16x16x32xbf16> to vector<16x16x32xbf16>
    %7 = vector.shape_cast %6 : vector<16x16x32xbf16> to vector<256x32xbf16>
    %c0_8 = arith.constant 0 : index
    %c0_9 = arith.constant 0 : index
    %c2 = arith.constant 2 : index
    %c0_10 = arith.constant 0 : index
    %8 = vector.load %arg2[%c0_8, %c0_9, %c2, %c0_10] : memref<1x18x18x32xbf16, #tpu.memory_space<vmem>>, vector<1x16x16x32xbf16>
    %9 = vector.shape_cast %8 : vector<1x16x16x32xbf16> to vector<16x16x32xbf16>
    %10 = vector.shape_cast %9 : vector<16x16x32xbf16> to vector<256x32xbf16>
    %c0_11 = arith.constant 0 : index
    %c1_12 = arith.constant 1 : index
    %c0_13 = arith.constant 0 : index
    %c0_14 = arith.constant 0 : index
    %11 = vector.load %arg2[%c0_11, %c1_12, %c0_13, %c0_14] : memref<1x18x18x32xbf16, #tpu.memory_space<vmem>>, vector<1x16x16x32xbf16>
    %12 = vector.shape_cast %11 : vector<1x16x16x32xbf16> to vector<16x16x32xbf16>
    %13 = vector.shape_cast %12 : vector<16x16x32xbf16> to vector<256x32xbf16>
    %c0_15 = arith.constant 0 : index
    %c1_16 = arith.constant 1 : index
    %c1_17 = arith.constant 1 : index
    %c0_18 = arith.constant 0 : index
    %14 = vector.load %arg2[%c0_15, %c1_16, %c1_17, %c0_18] : memref<1x18x18x32xbf16, #tpu.memory_space<vmem>>, vector<1x16x16x32xbf16>
    %15 = vector.shape_cast %14 : vector<1x16x16x32xbf16> to vector<16x16x32xbf16>
    %16 = vector.shape_cast %15 : vector<16x16x32xbf16> to vector<256x32xbf16>
    %c0_19 = arith.constant 0 : index
    %c1_20 = arith.constant 1 : index
    %c2_21 = arith.constant 2 : index
    %c0_22 = arith.constant 0 : index
    %17 = vector.load %arg2[%c0_19, %c1_20, %c2_21, %c0_22] : memref<1x18x18x32xbf16, #tpu.memory_space<vmem>>, vector<1x16x16x32xbf16>
    %18 = vector.shape_cast %17 : vector<1x16x16x32xbf16> to vector<16x16x32xbf16>
    %19 = vector.shape_cast %18 : vector<16x16x32xbf16> to vector<256x32xbf16>
    %c0_23 = arith.constant 0 : index
    %c2_24 = arith.constant 2 : index
    %c0_25 = arith.constant 0 : index
    %c0_26 = arith.constant 0 : index
    %20 = vector.load %arg2[%c0_23, %c2_24, %c0_25, %c0_26] : memref<1x18x18x32xbf16, #tpu.memory_space<vmem>>, vector<1x16x16x32xbf16>
    %21 = vector.shape_cast %20 : vector<1x16x16x32xbf16> to vector<16x16x32xbf16>
    %22 = vector.shape_cast %21 : vector<16x16x32xbf16> to vector<256x32xbf16>
    %c0_27 = arith.constant 0 : index
    %c2_28 = arith.constant 2 : index
    %c1_29 = arith.constant 1 : index
    %c0_30 = arith.constant 0 : index
    %23 = vector.load %arg2[%c0_27, %c2_28, %c1_29, %c0_30] : memref<1x18x18x32xbf16, #tpu.memory_space<vmem>>, vector<1x16x16x32xbf16>
    %24 = vector.shape_cast %23 : vector<1x16x16x32xbf16> to vector<16x16x32xbf16>
    %25 = vector.shape_cast %24 : vector<16x16x32xbf16> to vector<256x32xbf16>
    %c0_31 = arith.constant 0 : index
    %c2_32 = arith.constant 2 : index
    %c2_33 = arith.constant 2 : index
    %c0_34 = arith.constant 0 : index
    %26 = vector.load %arg2[%c0_31, %c2_32, %c2_33, %c0_34] : memref<1x18x18x32xbf16, #tpu.memory_space<vmem>>, vector<1x16x16x32xbf16>
    %27 = vector.shape_cast %26 : vector<1x16x16x32xbf16> to vector<16x16x32xbf16>
    %28 = vector.shape_cast %27 : vector<16x16x32xbf16> to vector<256x32xbf16>
    %29 = tpu.concatenate %4, %7, %10, %13, %16, %19, %22, %25, %28 in 1 : vector<256x32xbf16>, vector<256x32xbf16>, vector<256x32xbf16>, vector<256x32xbf16>, vector<256x32xbf16>, vector<256x32xbf16>, vector<256x32xbf16>, vector<256x32xbf16>, vector<256x32xbf16> -> vector<256x288xbf16>
    %cst_35 = arith.constant dense<0.000000e+00> : vector<256x32xf32>
    %30 = tpu.matmul %29, %0, %cst_35 {dimension_numbers = #tpu.dot_dimension_numbers<[1], [0], [0], [1], [0, 0, 1, 1], [], []>} : vector<256x288xbf16>, vector<288x32xbf16>, vector<256x32xf32> -> vector<256x32xf32>
    %31 = arith.truncf %30 : vector<256x32xf32> to vector<256x32xbf16>
    %c0_36 = arith.constant 0 : index
    %c0_37 = arith.constant 0 : index
    %c0_38 = arith.constant 0 : index
    %32 = vector.load %arg4[%c0_36, %c0_37, %c0_38] : memref<1x256x32xbf16, #tpu.memory_space<vmem>>, vector<1x256x32xbf16>
    %33 = vector.shape_cast %32 : vector<1x256x32xbf16> to vector<256x32xbf16>
    %34 = vector.shape_cast %31 : vector<256x32xbf16> to vector<1x256x32xbf16>
    tpu.vector_store %arg4[%c0_36, %c0_37, %c0_38], %34 {strides = array<i32>} : memref<1x256x32xbf16, #tpu.memory_space<vmem>>, vector<1x256x32xbf16>,
    %cst_39 = arith.constant dense<0.000000e+00> : vector<32xf32>
    %35 = vector.multi_reduction <add>, %30, %cst_39 [0] : vector<256x32xf32> to vector<32xf32>
    %36 = vector.shape_cast %35 : vector<32xf32> to vector<1x32xf32>
    %37 = arith.addf %1, %36 : vector<1x32xf32>
    %38 = arith.mulf %30, %30 : vector<256x32xf32>
    %cst_40 = arith.constant dense<0.000000e+00> : vector<32xf32>
    %39 = vector.multi_reduction <add>, %38, %cst_40 [0] : vector<256x32xf32> to vector<32xf32>
    %40 = vector.shape_cast %39 : vector<32xf32> to vector<1x32xf32>
    %41 = arith.addf %1, %40 : vector<1x32xf32>
    %c0_41 = arith.constant 0 : index
    %c0_42 = arith.constant 0 : index
    %c0_43 = arith.constant 0 : index
    %42 = vector.load %arg5[%c0_41, %c0_42, %c0_43] : memref<1x1x32xf32, #tpu.memory_space<vmem>>, vector<1x1x32xf32>
    %43 = vector.shape_cast %42 : vector<1x1x32xf32> to vector<1x32xf32>
    %44 = vector.shape_cast %37 : vector<1x32xf32> to vector<1x1x32xf32>
    tpu.vector_store %arg5[%c0_41, %c0_42, %c0_43], %44 {strides = array<i32>} : memref<1x1x32xf32, #tpu.memory_space<vmem>>, vector<1x1x32xf32>,
    %c0_44 = arith.constant 0 : index
    %c0_45 = arith.constant 0 : index
    %c0_46 = arith.constant 0 : index
    %45 = vector.load %arg6[%c0_44, %c0_45, %c0_46] : memref<1x1x32xf32, #tpu.memory_space<vmem>>, vector<1x1x32xf32>
    %46 = vector.shape_cast %45 : vector<1x1x32xf32> to vector<1x32xf32>
    %47 = vector.shape_cast %41 : vector<1x32xf32> to vector<1x1x32xf32>
    tpu.vector_store %arg6[%c0_44, %c0_45, %c0_46], %47 {strides = array<i32>} : memref<1x1x32xf32, #tpu.memory_space<vmem>>, vector<1x1x32xf32>,
    return
  }
  func.func @transform_0(%arg0: i32, %arg1: i32) -> (i32, i32, i32, i32) {
    %c0_i32 = arith.constant 0 : i32
    %c0_i32_0 = arith.constant 0 : i32
    %c0_i32_1 = arith.constant 0 : i32
    %c0_i32_2 = arith.constant 0 : i32
    return %arg0, %c0_i32, %c0_i32_0, %c0_i32_1 : i32, i32, i32, i32
  }
  func.func @transform_1(%arg0: i32, %arg1: i32) -> (i32, i32) {
    %c0_i32 = arith.constant 0 : i32
    %c0_i32_0 = arith.constant 0 : i32
    return %c0_i32, %arg1 : i32, i32
  }
  func.func @transform_2(%arg0: i32, %arg1: i32) -> (i32, i32, i32) {
    %c0_i32 = arith.constant 0 : i32
    %c0_i32_0 = arith.constant 0 : i32
    return %arg0, %c0_i32, %arg1 : i32, i32, i32
  }
  func.func @transform_3(%arg0: i32, %arg1: i32) -> (i32, i32, i32) {
    %c0_i32 = arith.constant 0 : i32
    %c0_i32_0 = arith.constant 0 : i32
    return %arg0, %c0_i32, %arg1 : i32, i32, i32
  }
  func.func @transform_4(%arg0: i32, %arg1: i32) -> (i32, i32, i32) {
    %c0_i32 = arith.constant 0 : i32
    %c0_i32_0 = arith.constant 0 : i32
    return %arg0, %c0_i32, %arg1 : i32, i32, i32
  }
}

module attributes {stable_mosaic.version = 11 : i64} {
  func.func @_bn_act_kernel(%arg0: i32, %arg1: i32, %arg2: i32, %arg3: memref<1x256x32xbf16, #tpu.memory_space<vmem>>, %arg4: memref<1x32xf32, #tpu.memory_space<vmem>>, %arg5: memref<1x32xf32, #tpu.memory_space<vmem>>, %arg6: memref<1x256x32xbf16, #tpu.memory_space<vmem>>) attributes {dimension_semantics = [#tpu.dimension_semantics<parallel>, #tpu.dimension_semantics<parallel>, #tpu.dimension_semantics<parallel>], iteration_bounds = array<i64: 2, 1, 1>, scalar_prefetch = 0 : i64, scratch_operands = 0 : i64, tpu.core_type = #tpu.core_type<tc>, window_params = [{transform_indices = @transform_0, window_bounds = array<i64: 1, 256, 32>}, {transform_indices = @transform_1, window_bounds = array<i64: 1, 32>}, {transform_indices = @transform_2, window_bounds = array<i64: 1, 32>}, {transform_indices = @transform_3, window_bounds = array<i64: 1, 256, 32>}]} {
    %c0 = arith.constant 0 : index
    %c0_0 = arith.constant 0 : index
    %c0_1 = arith.constant 0 : index
    %0 = vector.load %arg3[%c0, %c0_0, %c0_1] : memref<1x256x32xbf16, #tpu.memory_space<vmem>>, vector<1x256x32xbf16>
    %1 = vector.shape_cast %0 : vector<1x256x32xbf16> to vector<256x32xbf16>
    %2 = arith.extf %1 : vector<256x32xbf16> to vector<256x32xf32>
    %c0_2 = arith.constant 0 : index
    %c0_3 = arith.constant 0 : index
    %3 = vector.load %arg4[%c0_2, %c0_3] : memref<1x32xf32, #tpu.memory_space<vmem>>, vector<1x32xf32>
    %4 = vector.broadcast %3 : vector<1x32xf32> to vector<256x32xf32>
    %5 = arith.mulf %2, %4 : vector<256x32xf32>
    %c0_4 = arith.constant 0 : index
    %c0_5 = arith.constant 0 : index
    %6 = vector.load %arg5[%c0_4, %c0_5] : memref<1x32xf32, #tpu.memory_space<vmem>>, vector<1x32xf32>
    %7 = vector.broadcast %6 : vector<1x32xf32> to vector<256x32xf32>
    %8 = arith.addf %5, %7 : vector<256x32xf32>
    %cst = arith.constant 0.000000e+00 : f32
    %9 = vector.broadcast %cst : f32 to vector<256x32xf32>
    %10 = arith.maximumf %8, %9 : vector<256x32xf32>
    %11 = arith.truncf %10 : vector<256x32xf32> to vector<256x32xbf16>
    %c0_6 = arith.constant 0 : index
    %c0_7 = arith.constant 0 : index
    %c0_8 = arith.constant 0 : index
    %12 = vector.load %arg6[%c0_6, %c0_7, %c0_8] : memref<1x256x32xbf16, #tpu.memory_space<vmem>>, vector<1x256x32xbf16>
    %13 = vector.shape_cast %12 : vector<1x256x32xbf16> to vector<256x32xbf16>
    %14 = vector.shape_cast %11 : vector<256x32xbf16> to vector<1x256x32xbf16>
    tpu.vector_store %arg6[%c0_6, %c0_7, %c0_8], %14 {strides = array<i32>} : memref<1x256x32xbf16, #tpu.memory_space<vmem>>, vector<1x256x32xbf16>,
    return
  }
  func.func @transform_0(%arg0: i32, %arg1: i32, %arg2: i32) -> (i32, i32, i32) {
    %c0_i32 = arith.constant 0 : i32
    return %arg0, %arg1, %arg2 : i32, i32, i32
  }
  func.func @transform_1(%arg0: i32, %arg1: i32, %arg2: i32) -> (i32, i32) {
    %c0_i32 = arith.constant 0 : i32
    %c0_i32_0 = arith.constant 0 : i32
    return %c0_i32, %arg2 : i32, i32
  }
  func.func @transform_2(%arg0: i32, %arg1: i32, %arg2: i32) -> (i32, i32) {
    %c0_i32 = arith.constant 0 : i32
    %c0_i32_0 = arith.constant 0 : i32
    return %c0_i32, %arg2 : i32, i32
  }
  func.func @transform_3(%arg0: i32, %arg1: i32, %arg2: i32) -> (i32, i32, i32) {
    %c0_i32 = arith.constant 0 : i32
    return %arg0, %arg1, %arg2 : i32, i32, i32
  }
}

module attributes {stable_mosaic.version = 11 : i64} {
  func.func @_bn_act_kernel(%arg0: i32, %arg1: i32, %arg2: i32, %arg3: memref<1x256x32xbf16, #tpu.memory_space<vmem>>, %arg4: memref<1x32xf32, #tpu.memory_space<vmem>>, %arg5: memref<1x32xf32, #tpu.memory_space<vmem>>, %arg6: memref<1x256x32xf32, #tpu.memory_space<vmem>>, %arg7: memref<1x256x32xf32, #tpu.memory_space<vmem>>) attributes {dimension_semantics = [#tpu.dimension_semantics<parallel>, #tpu.dimension_semantics<parallel>, #tpu.dimension_semantics<parallel>], iteration_bounds = array<i64: 2, 1, 1>, scalar_prefetch = 0 : i64, scratch_operands = 0 : i64, tpu.core_type = #tpu.core_type<tc>, window_params = [{transform_indices = @transform_0, window_bounds = array<i64: 1, 256, 32>}, {transform_indices = @transform_1, window_bounds = array<i64: 1, 32>}, {transform_indices = @transform_2, window_bounds = array<i64: 1, 32>}, {transform_indices = @transform_3, window_bounds = array<i64: 1, 256, 32>}, {transform_indices = @transform_4, window_bounds = array<i64: 1, 256, 32>}]} {
    %c0 = arith.constant 0 : index
    %c0_0 = arith.constant 0 : index
    %c0_1 = arith.constant 0 : index
    %0 = vector.load %arg3[%c0, %c0_0, %c0_1] : memref<1x256x32xbf16, #tpu.memory_space<vmem>>, vector<1x256x32xbf16>
    %1 = vector.shape_cast %0 : vector<1x256x32xbf16> to vector<256x32xbf16>
    %2 = arith.extf %1 : vector<256x32xbf16> to vector<256x32xf32>
    %c0_2 = arith.constant 0 : index
    %c0_3 = arith.constant 0 : index
    %3 = vector.load %arg4[%c0_2, %c0_3] : memref<1x32xf32, #tpu.memory_space<vmem>>, vector<1x32xf32>
    %4 = vector.broadcast %3 : vector<1x32xf32> to vector<256x32xf32>
    %5 = arith.mulf %2, %4 : vector<256x32xf32>
    %c0_4 = arith.constant 0 : index
    %c0_5 = arith.constant 0 : index
    %6 = vector.load %arg5[%c0_4, %c0_5] : memref<1x32xf32, #tpu.memory_space<vmem>>, vector<1x32xf32>
    %7 = vector.broadcast %6 : vector<1x32xf32> to vector<256x32xf32>
    %8 = arith.addf %5, %7 : vector<256x32xf32>
    %c0_6 = arith.constant 0 : index
    %c0_7 = arith.constant 0 : index
    %c0_8 = arith.constant 0 : index
    %9 = vector.load %arg6[%c0_6, %c0_7, %c0_8] : memref<1x256x32xf32, #tpu.memory_space<vmem>>, vector<1x256x32xf32>
    %10 = vector.shape_cast %9 : vector<1x256x32xf32> to vector<256x32xf32>
    %11 = arith.addf %8, %10 : vector<256x32xf32>
    %cst = arith.constant 0.000000e+00 : f32
    %12 = vector.broadcast %cst : f32 to vector<256x32xf32>
    %13 = arith.maximumf %11, %12 : vector<256x32xf32>
    %c0_9 = arith.constant 0 : index
    %c0_10 = arith.constant 0 : index
    %c0_11 = arith.constant 0 : index
    %14 = vector.load %arg7[%c0_9, %c0_10, %c0_11] : memref<1x256x32xf32, #tpu.memory_space<vmem>>, vector<1x256x32xf32>
    %15 = vector.shape_cast %14 : vector<1x256x32xf32> to vector<256x32xf32>
    %16 = vector.shape_cast %13 : vector<256x32xf32> to vector<1x256x32xf32>
    tpu.vector_store %arg7[%c0_9, %c0_10, %c0_11], %16 {strides = array<i32>} : memref<1x256x32xf32, #tpu.memory_space<vmem>>, vector<1x256x32xf32>,
    return
  }
  func.func @transform_0(%arg0: i32, %arg1: i32, %arg2: i32) -> (i32, i32, i32) {
    %c0_i32 = arith.constant 0 : i32
    return %arg0, %arg1, %arg2 : i32, i32, i32
  }
  func.func @transform_1(%arg0: i32, %arg1: i32, %arg2: i32) -> (i32, i32) {
    %c0_i32 = arith.constant 0 : i32
    %c0_i32_0 = arith.constant 0 : i32
    return %c0_i32, %arg2 : i32, i32
  }
  func.func @transform_2(%arg0: i32, %arg1: i32, %arg2: i32) -> (i32, i32) {
    %c0_i32 = arith.constant 0 : i32
    %c0_i32_0 = arith.constant 0 : i32
    return %c0_i32, %arg2 : i32, i32
  }
  func.func @transform_3(%arg0: i32, %arg1: i32, %arg2: i32) -> (i32, i32, i32) {
    %c0_i32 = arith.constant 0 : i32
    return %arg0, %arg1, %arg2 : i32, i32, i32
  }
  func.func @transform_4(%arg0: i32, %arg1: i32, %arg2: i32) -> (i32, i32, i32) {
    %c0_i32 = arith.constant 0 : i32
    return %arg0, %arg1, %arg2 : i32, i32, i32
  }
}

</mosaic_0001>

<bundles_post_ra>
// kernel: _lambda_.5
= control target key start
LH: loop header
LB: loop body
LE: loop exit
PB: predicated region body
PF: predicated region fallthrough
CT: control target
= control target key end

     0   :  { %s954_s12 = smov 0   ;;  %s956_s13 = smov 0   ;;  %s1152_s0 = inlined_call_operand.vmem [shape: bf16[2,256,32], index: 0, kind: input, shape index: {}]   ;;  %s1153_s1 = inlined_call_operand.vmem [shape: f32[1,32], index: 1, kind: input, shape index: {}]   ;;  %s1154_s2 = inlined_call_operand.vmem [shape: f32[1,32], index: 2, kind: input, shape index: {}]   ;;  %s1155_s3 = inlined_call_operand.vmem [shape: bf16[2,256,32], index: 3, kind: output, shape index: {}]  }
   0x1   :  { %s958_s14 = smov 0  }
   0x2 LB: > { %s32_s15 = sadd.s32 1, %s928_s13  ;;  %p732_p0 = scmp.ge.s32.totalorder %s932_s14, 1  ;;  %s932_s14 = sphi %s958_s14, %s13_s14   ;;  %s928_s13 = sphi %s956_s13, %s1157_s13   ;;  %s924_s12 = sphi %s954_s12, %s1156_s12  }
   0x3   : > { %p34_p1 = scmp.ge.s32.totalorder %s32_s15, 2  ;;  %p188_p2 = scmp.lt.s32.totalorder %s932_s14, 3 }
   0x5   : > { %s1159_s15 = smov (%p34_p1, %s32_s15), 0  ;;  %p189_p3 = pnand %p732_p0, %p188_p2 }
   0x6   : > { %p233_p4 = scmp.lt.s32.totalorder (!%p189_p3), %s924_s12, 1  ;;  %v985_v0 = vld [vmem:[%s1153_s1] ss:$0 sm:$0xff] (!%p189_p3)  ;;  %vm566_vm0 = vcmask (!%p189_p3), 257024  }
   0x7   : > { %192 = sbr.rel (%p189_p3) target bundleno = 62 (0x3e), region = 32  ;;  %v994_v9 = vld [vmem:[%s1154_s2] ss:$0 sm:$0xff] (!%p189_p3) }
   0xe   : > { %s1161_s12 = smov (!%p233_p4, %s924_s12), 1 }
   0xf   : > { %s773_s16 = sshll.u32 %s1161_s12, 7 }
  0x10   : > { %s980_s19 = scalar_lea.vmem %s1152_s0, %s773_s16  ;;  %s1017_s26 = scalar_lea.vmem %s1155_s3, %s773_s16 }
  0x11   : > { %v808_v1 = vld [vmem:[%s980_s19] sm:$0xff]   ;;  %v871_v2 = vld [vmem:[%s980_s19 + $0x8] sm:$0xff]   ;;  %v872_v3 = vld [vmem:[%s980_s19 + $0x10] sm:$0xff]  }
  0x12   : > { %v809_v4 = vunpack.c.l.bf16 %v808_v1  ;;  %v810_v5 = vunpack.c.h.bf16 %v808_v1  ;;  %v813_v6 = vunpack.c.l.bf16 %v871_v2  ;;  %v814_v7 = vunpack.c.h.bf16 %v871_v2  ;;  %v873_v8 = vld [vmem:[%s980_s19 + $0x18] sm:$0xff]   ;;  %v874_v38 = vld [vmem:[%s980_s19 + $0x20] sm:$0xff]   ;;  %v875_v39 = vld [vmem:[%s980_s19 + $0x28] sm:$0xff]  }
  0x13   : > { %v817_v10 = vunpack.c.l.bf16 %v872_v3  ;;  %v818_v11 = vunpack.c.h.bf16 %v872_v3  ;;  %v821_v12 = vunpack.c.l.bf16 %v873_v8  ;;  %v822_v13 = vunpack.c.h.bf16 %v873_v8  ;;  %v876_v44 = vld [vmem:[%s980_s19 + $0x30] sm:$0xff]   ;;  %v877_v45 = vld [vmem:[%s980_s19 + $0x38] sm:$0xff]  }
  0x14   : > { %v335_v14 = vmul.f32 %v809_v4, %v985_v0  ;;  %v336_v15 = vmul.f32 %v810_v5, %v985_v0  ;;  %v337_v16 = vmul.f32 %v813_v6, %v985_v0  ;;  %v338_v17 = vmul.f32 %v814_v7, %v985_v0 }
  0x15   : > { %v339_v18 = vmul.f32 %v817_v10, %v985_v0  ;;  %v340_v19 = vmul.f32 %v818_v11, %v985_v0  ;;  %v341_v20 = vmul.f32 %v821_v12, %v985_v0  ;;  %v342_v21 = vmul.f32 %v822_v13, %v985_v0 }
  0x16   : > { %v374_v22 = vadd.f32 %v994_v9, %v335_v14  ;;  %v375_v23 = vadd.f32 %v994_v9, %v336_v15  ;;  %v376_v24 = vadd.f32 %v994_v9, %v337_v16  ;;  %v377_v25 = vadd.f32 %v994_v9, %v338_v17 }
  0x17   : > { %v378_v26 = vadd.f32 %v994_v9, %v339_v18  ;;  %v379_v27 = vadd.f32 %v994_v9, %v340_v19  ;;  %v380_v28 = vadd.f32 %v994_v9, %v341_v20  ;;  %v381_v29 = vadd.f32 %v994_v9, %v342_v21  ;;  %v878_v20 = vld [vmem:[%s980_s19 + $0x40] sm:$0xff]   ;;  %v879_v21 = vld [vmem:[%s980_s19 + $0x48] sm:$0xff]  }
  0x18   : > { %v406_v30 = vmax.f32 %v374_v22, 0.0  ;;  %v407_v31 = vmax.f32 %v375_v23, 0.0  ;;  %v408_v32 = vmax.f32 %v376_v24, 0.0  ;;  %v409_v33 = vmax.f32 %v377_v25, 0.0 }
  0x19   : > { %v410_v34 = vmax.f32 %v378_v26, 0.0  ;;  %v411_v35 = vmax.f32 %v379_v27, 0.0  ;;  %v412_v36 = vmax.f32 %v380_v28, 0.0  ;;  %v413_v37 = vmax.f32 %v381_v29, 0.0  ;;  %v880_v26 = vld [vmem:[%s980_s19 + $0x50] sm:$0xff]   ;;  %v881_v27 = vld [vmem:[%s980_s19 + $0x58] sm:$0xff]  }
  0x1a   : > { %v775_v40 = vpack.c.bf16 %v406_v30, %v406_v30  ;;  %v776_v41 = vpack.c.bf16 %v407_v31, %v407_v31  ;;  %v777_v42 = vpack.c.bf16 %v408_v32, %v408_v32  ;;  %v778_v43 = vpack.c.bf16 %v409_v33, %v409_v33 }
  0x1b   : > { %v779_v46 = vpack.c.bf16 %v410_v34, %v410_v34  ;;  %v780_v47 = vpack.c.bf16 %v411_v35, %v411_v35  ;;  %v781_v48 = vpack.c.bf16 %v412_v36, %v412_v36  ;;  %v782_v49 = vpack.c.bf16 %v413_v37, %v413_v37 }
  0x1c   : > { %567 = vst.msk [vmem:[%s1017_s26] sm:$0xf] %vm566_vm0, %v775_v40  ;;  %568 = vst.msk [vmem:[%s1017_s26 + $0x4] sm:$0xf] %vm566_vm0, %v776_v41  ;;  %v825_v50 = vunpack.c.l.bf16 %v874_v38  ;;  %v826_v51 = vunpack.c.h.bf16 %v874_v38  ;;  %v829_v52 = vunpack.c.l.bf16 %v875_v39  ;;  %v830_v53 = vunpack.c.h.bf16 %v875_v39 }
  0x1d   : > { %569 = vst.msk [vmem:[%s1017_s26 + $0x8] sm:$0xf] %vm566_vm0, %v777_v42  ;;  %570 = vst.msk [vmem:[%s1017_s26 + $0xc] sm:$0xf] %vm566_vm0, %v778_v43  ;;  %v833_v54 = vunpack.c.l.bf16 %v876_v44  ;;  %v834_v55 = vunpack.c.h.bf16 %v876_v44  ;;  %v837_v56 = vunpack.c.l.bf16 %v877_v45  ;;  %v838_v57 = vunpack.c.h.bf16 %v877_v45 }
  0x1e   : > { %571 = vst.msk [vmem:[%s1017_s26 + $0x10] sm:$0xf] %vm566_vm0, %v779_v46  ;;  %572 = vst.msk [vmem:[%s1017_s26 + $0x14] sm:$0xf] %vm566_vm0, %v780_v47  ;;  %v343_v58 = vmul.f32 %v825_v50, %v985_v0  ;;  %v344_v59 = vmul.f32 %v826_v51, %v985_v0  ;;  %v345_v60 = vmul.f32 %v829_v52, %v985_v0  ;;  %v841_v32 = vunpack.c.l.bf16 %v878_v20 }
  0x1f   : > { %573 = vst.msk [vmem:[%s1017_s26 + $0x18] sm:$0xf] %vm566_vm0, %v781_v48  ;;  %574 = vst.msk [vmem:[%s1017_s26 + $0x1c] sm:$0xf] %vm566_vm0, %v782_v49  ;;  %v346_v61 = vmul.f32 %v830_v53, %v985_v0  ;;  %v347_v62 = vmul.f32 %v833_v54, %v985_v0  ;;  %v348_v63 = vmul.f32 %v834_v55, %v985_v0  ;;  %v842_v33 = vunpack.c.h.bf16 %v878_v20 }
  0x20   : > { %v349_v1 = vmul.f32 %v837_v56, %v985_v0  ;;  %v350_v2 = vmul.f32 %v838_v57, %v985_v0  ;;  %v382_v3 = vadd.f32 %v994_v9, %v343_v58  ;;  %v383_v4 = vadd.f32 %v994_v9, %v344_v59 }
  0x21   : > { %v384_v5 = vadd.f32 %v994_v9, %v345_v60  ;;  %v385_v6 = vadd.f32 %v994_v9, %v346_v61  ;;  %v386_v7 = vadd.f32 %v994_v9, %v347_v62  ;;  %v387_v8 = vadd.f32 %v994_v9, %v348_v63 }
  0x22   : > { %v388_v10 = vadd.f32 %v994_v9, %v349_v1  ;;  %v389_v11 = vadd.f32 %v994_v9, %v350_v2  ;;  %v414_v12 = vmax.f32 %v382_v3, 0.0  ;;  %v415_v13 = vmax.f32 %v383_v4, 0.0  ;;  %v882_v1 = vld [vmem:[%s980_s19 + $0x60] sm:$0xff]   ;;  %v883_v2 = vld [vmem:[%s980_s19 + $0x68] sm:$0xff]  }
  0x23   : > { %v416_v14 = vmax.f32 %v384_v5, 0.0  ;;  %v417_v15 = vmax.f32 %v385_v6, 0.0  ;;  %v418_v16 = vmax.f32 %v386_v7, 0.0  ;;  %v419_v17 = vmax.f32 %v387_v8, 0.0  ;;  %v884_v7 = vld [vmem:[%s980_s19 + $0x70] sm:$0xff]   ;;  %v885_v8 = vld [vmem:[%s980_s19 + $0x78] sm:$0xff]  }
  0x24   : > { %v420_v18 = vmax.f32 %v388_v10, 0.0  ;;  %v421_v19 = vmax.f32 %v389_v11, 0.0  ;;  %v783_v22 = vpack.c.bf16 %v414_v12, %v414_v12  ;;  %v784_v23 = vpack.c.bf16 %v415_v13, %v415_v13 }
  0x25   : > { %v785_v24 = vpack.c.bf16 %v416_v14, %v416_v14  ;;  %v786_v25 = vpack.c.bf16 %v417_v15, %v417_v15  ;;  %v787_v28 = vpack.c.bf16 %v418_v16, %v418_v16  ;;  %v788_v29 = vpack.c.bf16 %v419_v17, %v419_v17 }
  0x26   : > { %v789_v30 = vpack.c.bf16 %v420_v18, %v420_v18  ;;  %v790_v31 = vpack.c.bf16 %v421_v19, %v421_v19  ;;  %575 = vst.msk [vmem:[%s1017_s26 + $0x20] sm:$0xf] %vm566_vm0, %v783_v22  ;;  %576 = vst.msk [vmem:[%s1017_s26 + $0x24] sm:$0xf] %vm566_vm0, %v784_v23  ;;  %v845_v34 = vunpack.c.l.bf16 %v879_v21  ;;  %v846_v35 = vunpack.c.h.bf16 %v879_v21 }
  0x27   : > { %577 = vst.msk [vmem:[%s1017_s26 + $0x28] sm:$0xf] %vm566_vm0, %v785_v24  ;;  %578 = vst.msk [vmem:[%s1017_s26 + $0x2c] sm:$0xf] %vm566_vm0, %v786_v25  ;;  %v849_v36 = vunpack.c.l.bf16 %v880_v26  ;;  %v850_v37 = vunpack.c.h.bf16 %v880_v26  ;;  %v853_v38 = vunpack.c.l.bf16 %v881_v27  ;;  %v854_v39 = vunpack.c.h.bf16 %v881_v27 }
  0x28   : > { %579 = vst.msk [vmem:[%s1017_s26 + $0x30] sm:$0xf] %vm566_vm0, %v787_v28  ;;  %580 = vst.msk [vmem:[%s1017_s26 + $0x34] sm:$0xf] %vm566_vm0, %v788_v29  ;;  %v351_v40 = vmul.f32 %v841_v32, %v985_v0  ;;  %v352_v41 = vmul.f32 %v842_v33, %v985_v0  ;;  %v353_v42 = vmul.f32 %v845_v34, %v985_v0  ;;  %v857_v14 = vunpack.c.l.bf16 %v882_v1 }
  0x29   : > { %581 = vst.msk [vmem:[%s1017_s26 + $0x38] sm:$0xf] %vm566_vm0, %v789_v30  ;;  %582 = vst.msk [vmem:[%s1017_s26 + $0x3c] sm:$0xf] %vm566_vm0, %v790_v31  ;;  %v354_v43 = vmul.f32 %v846_v35, %v985_v0  ;;  %v355_v44 = vmul.f32 %v849_v36, %v985_v0  ;;  %v356_v45 = vmul.f32 %v850_v37, %v985_v0  ;;  %v858_v15 = vunpack.c.h.bf16 %v882_v1 }
  0x2a   : > { %v357_v46 = vmul.f32 %v853_v38, %v985_v0  ;;  %v358_v47 = vmul.f32 %v854_v39, %v985_v0  ;;  %v390_v48 = vadd.f32 %v994_v9, %v351_v40  ;;  %v391_v49 = vadd.f32 %v994_v9, %v352_v41 }
  0x2b   : > { %v392_v50 = vadd.f32 %v994_v9, %v353_v42  ;;  %v393_v51 = vadd.f32 %v994_v9, %v354_v43  ;;  %v394_v52 = vadd.f32 %v994_v9, %v355_v44  ;;  %v395_v53 = vadd.f32 %v994_v9, %v356_v45 }
  0x2c   : > { %v396_v54 = vadd.f32 %v994_v9, %v357_v46  ;;  %v397_v55 = vadd.f32 %v994_v9, %v358_v47  ;;  %v422_v56 = vmax.f32 %v390_v48, 0.0  ;;  %v423_v57 = vmax.f32 %v391_v49, 0.0 }
  0x2d   : > { %v424_v58 = vmax.f32 %v392_v50, 0.0  ;;  %v425_v59 = vmax.f32 %v393_v51, 0.0  ;;  %v426_v60 = vmax.f32 %v394_v52, 0.0  ;;  %v427_v61 = vmax.f32 %v395_v53, 0.0 }
  0x2e   : > { %v428_v62 = vmax.f32 %v396_v54, 0.0  ;;  %v429_v63 = vmax.f32 %v397_v55, 0.0  ;;  %v791_v3 = vpack.c.bf16 %v422_v56, %v422_v56  ;;  %v792_v4 = vpack.c.bf16 %v423_v57, %v423_v57 }
  0x2f   : > { %v793_v5 = vpack.c.bf16 %v424_v58, %v424_v58  ;;  %v794_v6 = vpack.c.bf16 %v425_v59, %v425_v59  ;;  %v795_v10 = vpack.c.bf16 %v426_v60, %v426_v60  ;;  %v796_v11 = vpack.c.bf16 %v427_v61, %v427_v61 }
  0x30   : > { %v797_v12 = vpack.c.bf16 %v428_v62, %v428_v62  ;;  %v798_v13 = vpack.c.bf16 %v429_v63, %v429_v63  ;;  %583 = vst.msk [vmem:[%s1017_s26 + $0x40] sm:$0xf] %vm566_vm0, %v791_v3  ;;  %584 = vst.msk [vmem:[%s1017_s26 + $0x44] sm:$0xf] %vm566_vm0, %v792_v4  ;;  %v861_v16 = vunpack.c.l.bf16 %v883_v2  ;;  %v862_v17 = vunpack.c.h.bf16 %v883_v2 }
  0x31   : > { %585 = vst.msk [vmem:[%s1017_s26 + $0x48] sm:$0xf] %vm566_vm0, %v793_v5  ;;  %586 = vst.msk [vmem:[%s1017_s26 + $0x4c] sm:$0xf] %vm566_vm0, %v794_v6  ;;  %v865_v18 = vunpack.c.l.bf16 %v884_v7  ;;  %v866_v19 = vunpack.c.h.bf16 %v884_v7  ;;  %v869_v20 = vunpack.c.l.bf16 %v885_v8  ;;  %v870_v21 = vunpack.c.h.bf16 %v885_v8 }
  0x32   : > { %587 = vst.msk [vmem:[%s1017_s26 + $0x50] sm:$0xf] %vm566_vm0, %v795_v10  ;;  %588 = vst.msk [vmem:[%s1017_s26 + $0x54] sm:$0xf] %vm566_vm0, %v796_v11  ;;  %v359_v22 = vmul.f32 %v857_v14, %v985_v0  ;;  %v360_v23 = vmul.f32 %v858_v15, %v985_v0  ;;  %v361_v24 = vmul.f32 %v861_v16, %v985_v0 }
  0x33   : > { %589 = vst.msk [vmem:[%s1017_s26 + $0x58] sm:$0xf] %vm566_vm0, %v797_v12  ;;  %590 = vst.msk [vmem:[%s1017_s26 + $0x5c] sm:$0xf] %vm566_vm0, %v798_v13  ;;  %v362_v25 = vmul.f32 %v862_v17, %v985_v0  ;;  %v363_v26 = vmul.f32 %v865_v18, %v985_v0  ;;  %v364_v27 = vmul.f32 %v866_v19, %v985_v0 }
  0x34   : > { %v365_v28 = vmul.f32 %v869_v20, %v985_v0  ;;  %v366_v29 = vmul.f32 %v870_v21, %v985_v0  ;;  %v398_v30 = vadd.f32 %v994_v9, %v359_v22  ;;  %v399_v31 = vadd.f32 %v994_v9, %v360_v23 }
  0x35   : > { %v400_v32 = vadd.f32 %v994_v9, %v361_v24  ;;  %v401_v33 = vadd.f32 %v994_v9, %v362_v25  ;;  %v402_v34 = vadd.f32 %v994_v9, %v363_v26  ;;  %v403_v35 = vadd.f32 %v994_v9, %v364_v27 }
  0x36   : > { %v404_v36 = vadd.f32 %v994_v9, %v365_v28  ;;  %v405_v37 = vadd.f32 %v994_v9, %v366_v29  ;;  %v430_v38 = vmax.f32 %v398_v30, 0.0  ;;  %v431_v39 = vmax.f32 %v399_v31, 0.0 }
  0x37   : > { %v432_v0 = vmax.f32 %v400_v32, 0.0  ;;  %v433_v40 = vmax.f32 %v401_v33, 0.0  ;;  %v434_v41 = vmax.f32 %v402_v34, 0.0  ;;  %v435_v42 = vmax.f32 %v403_v35, 0.0 }
  0x38   : > { %v436_v43 = vmax.f32 %v404_v36, 0.0  ;;  %v437_v44 = vmax.f32 %v405_v37, 0.0  ;;  %v799_v45 = vpack.c.bf16 %v430_v38, %v430_v38  ;;  %v800_v46 = vpack.c.bf16 %v431_v39, %v431_v39 }
  0x39   : > { %v801_v47 = vpack.c.bf16 %v432_v0, %v432_v0  ;;  %v802_v9 = vpack.c.bf16 %v433_v40, %v433_v40  ;;  %v803_v48 = vpack.c.bf16 %v434_v41, %v434_v41  ;;  %v804_v49 = vpack.c.bf16 %v435_v42, %v435_v42 }
  0x3a   : > { %v805_v50 = vpack.c.bf16 %v436_v43, %v436_v43  ;;  %v806_v51 = vpack.c.bf16 %v437_v44, %v437_v44  ;;  %591 = vst.msk [vmem:[%s1017_s26 + $0x60] sm:$0xf] %vm566_vm0, %v799_v45  ;;  %592 = vst.msk [vmem:[%s1017_s26 + $0x64] sm:$0xf] %vm566_vm0, %v800_v46 }
  0x3b   : > { %593 = vst.msk [vmem:[%s1017_s26 + $0x68] sm:$0xf] %vm566_vm0, %v801_v47  ;;  %594 = vst.msk [vmem:[%s1017_s26 + $0x6c] sm:$0xf] %vm566_vm0, %v802_v9 }
  0x3c   : > { %595 = vst.msk [vmem:[%s1017_s26 + $0x70] sm:$0xf] %vm566_vm0, %v803_v48  ;;  %596 = vst.msk [vmem:[%s1017_s26 + $0x74] sm:$0xf] %vm566_vm0, %v804_v49 }
  0x3d   : > { %597 = vst.msk [vmem:[%s1017_s26 + $0x78] sm:$0xf] %vm566_vm0, %v805_v50  ;;  %598 = vst.msk [vmem:[%s1017_s26 + $0x7c] sm:$0xf] %vm566_vm0, %v806_v51 }
  0x3e PF: > { %s13_s14 = sadd.s32 1, %s932_s14   ;;  %s1156_s12 = smov %s928_s13 }
  0x3f   : > { %p10_p5 = scmp.ge.s32.totalorder %s13_s14, 4   ;;  %s1157_s13 = smov %s1159_s15 }
  0x41   :  { %12 = sbr.rel (!%p10_p5) target bundleno = 2 (0x2), region = 68 }

// kernel: _lambda_.7
= control target key start
LH: loop header
LB: loop body
LE: loop exit
PB: predicated region body
PF: predicated region fallthrough
CT: control target
= control target key end

     0   :  { %9 = vsyncpa [#allocation3], 0  ;;  %s1325_s0 = inlined_call_operand.vmem [shape: bf16[2,256,32], index: 0, kind: input, shape index: {}]   ;;  %s1326_s1 = inlined_call_operand.vmem [shape: f32[1,32], index: 1, kind: input, shape index: {}]   ;;  %s1327_s2 = inlined_call_operand.vmem [shape: f32[1,32], index: 2, kind: input, shape index: {}]   ;;  %s1328_s3 = inlined_call_operand.vmem [shape: f32[2,256,32], index: 3, kind: input, shape index: {}]   ;;  %s1329_s4 = inlined_call_operand.hbm [shape: f32[2,256,32], index: 4, kind: output, shape index: {}]  }
   0x1   :  { %11 = vsyncpa [#allocation3 + $0x1], 0  ;;  %s1007_s15 = smov 0   ;;  %s1009_s16 = smov 0  }
   0x2   :  { %s1011_s17 = smov 0   ;;  %s1013_s18 = smov 0  }
   0x3   :  { %s1015_s19 = smov 0   ;;  %s1017_s20 = smov 0  }
   0x4 LB: > { %s741_s21 = sadd.s32 4294967295, %s977_s20   ;;  %s742_s22 = sadd.s32 4294967294, %s977_s20   ;;  %s977_s20 = sphi %s1017_s20, %s17_s20   ;;  %s973_s19 = sphi %s1015_s19, %s1336_s19   ;;  %s969_s18 = sphi %s1013_s18, %s1335_s18   ;;  %s965_s17 = sphi %s1011_s17, %s1334_s17   ;;  %s961_s16 = sphi %s1009_s16, %s1333_s16   ;;  %s957_s15 = sphi %s1007_s15, %s1332_s15  }
   0x5   : > { %s36_s23 = sadd.s32 1, %s973_s19  ;;  %s159_s24 = sadd.s32 1, %s965_s17 }
   0x6   : > { %p38_p0 = scmp.ge.s32.totalorder %s36_s23, 2  ;;  %p169_p1 = scmp.ne.s32.totalorder %s965_s17, %s961_s16 }
   0x7   : > { %p170_p2 = scmp.eq.s32.totalorder %s741_s21, 1  ;;  %p175_p3 = scmp.ne.s32.totalorder %s961_s16, %s957_s15 }
   0x8   : > { %s1338_s23 = smov (%p38_p0, %s36_s23), 0  ;;  %p176_p5 = scmp.eq.s32.totalorder %s742_s22, 1 }
   0x9   : > { %p1047_p4 = por %p170_p2, %p169_p1  ;;  %s152_s26 = ssub.s32 %s973_s19, %s1338_s23 }
   0xa   : > { %p747_p6 = scmp.ge.s32.totalorder %s977_s20, 1  ;;  %p157_p7 = scmp.eq.s32.totalorder %s152_s26, 0 }
   0xb   : > { %p1054_p8 = por %p176_p5, %p175_p3  ;;  %p238_p9 = scmp.lt.s32.totalorder %s977_s20, 3 }
   0xc   : > { %s1060_s28 = scalar_select %p157_p7, %s965_s17, %s159_s24  }
   0xd   : > { %p239_p10 = pnand %p747_p6, %p238_p9 }
   0xe   : > { %p290_p11 = scmp.lt.s32.totalorder (!%p239_p10), %s969_s18, 1  ;;  %v1073_v1 = vld [vmem:[%s1326_s1] ss:$0 sm:$0xff] (!%p239_p10)  ;;  %s286_s14 = sand.u32 (!%p239_p10), 1, %s961_s16   ;;  %vm560_vm0 = vcmask (!%p239_p10), 261120  }
   0xf   : > { %242 = sbr.rel (%p239_p10) target bundleno = 84 (0x54), region = 36  ;;  %v1085_v5 = vld [vmem:[%s1327_s2] ss:$0 sm:$0xff] (!%p239_p10)  ;;  %s1097_s24 = sshll.u32 (!%p239_p10), %s286_s14, 8 }
  0x10   : > { %s1121_s26 = scalar_lea.vmem (!%p239_p10), [#allocation2], %s1097_s24  ;;  %s1279_s7 = scalar_lea.sflag (!%p239_p10), [#allocation3], %s286_s14 }
  0x11   : > { %s979_s9 = smov (!%p239_p10), [#allocation2]  }
  0x12   : > { %s903_s10 = sshll.u32 (!%p239_p10), %s979_s9, 4  ;;  %s904_s10 = int_to_ptr.vmem [resolvable:$false] %s903_s10 }
  0x13   : > { %s905_s11 = scalar_lea.vmem (!%p239_p10), %s904_s10, 8192 }
  0x16   : > { %s291_s29 = scalar_select %p290_p11, %s969_s18, 1 }
  0x18   : > { %s760_s30 = sshll.u32 %s291_s29, 7  ;;  %s761_s5 = sshll.u32 %s291_s29, 8 }
  0x19   : > { %s1067_s8 = scalar_lea.vmem %s1325_s0, %s760_s30  ;;  %s1078_s13 = scalar_lea.vmem %s1328_s3, %s761_s5 }
  0x1a   : > { %v764_v0 = vld [vmem:[%s1067_s8] sm:$0xff]   ;;  %v827_v4 = vld [vmem:[%s1067_s8 + $0x8] sm:$0xff]   ;;  %v828_v8 = vld [vmem:[%s1067_s8 + $0x10] sm:$0xff]   ;;  %s762_s29 = sshll.u32 %s969_s18, 12  ;;  %s610_s30 = sshll.u32 %s1121_s26, 4  ;;  %s1263_s30 = int_to_ptr.vmem [resolvable:$true] %s610_s30 }
  0x1b   : > { %v765_v2 = vunpack.c.l.bf16 %v764_v0  ;;  %v766_v3 = vunpack.c.h.bf16 %v764_v0  ;;  %v769_v6 = vunpack.c.l.bf16 %v827_v4  ;;  %v770_v7 = vunpack.c.h.bf16 %v827_v4  ;;  %v829_v13 = vld [vmem:[%s1067_s8 + $0x18] sm:$0xff]   ;;  %v464_v14 = vld [vmem:[%s1078_s13] sm:$0xff]  ;;  %v465_v15 = vld [vmem:[%s1078_s13 + $0x8] sm:$0xff]  ;;  %s1261_s6 = scalar_lea.hbm %s1329_s4, %s762_s29  ;;  %p906_p1 = scmp.lt.s32.totalorder %s1263_s30, %s904_s10 }
  0x1c   : > { %v773_v11 = vunpack.c.l.bf16 %v828_v8  ;;  %v774_v12 = vunpack.c.h.bf16 %v828_v8  ;;  %v777_v18 = vunpack.c.l.bf16 %v829_v13  ;;  %v778_v19 = vunpack.c.h.bf16 %v829_v13  ;;  %v466_v22 = vld [vmem:[%s1078_s13 + $0x10] sm:$0xff]  ;;  %v467_v23 = vld [vmem:[%s1078_s13 + $0x18] sm:$0xff]  ;;  %v468_v28 = vld [vmem:[%s1078_s13 + $0x20] sm:$0xff] }
  0x1d   : > { %v393_v9 = vmul.f32 %v765_v2, %v1073_v1  ;;  %v394_v10 = vmul.f32 %v766_v3, %v1073_v1  ;;  %v395_v16 = vmul.f32 %v769_v6, %v1073_v1  ;;  %v396_v17 = vmul.f32 %v770_v7, %v1073_v1  ;;  %v469_v29 = vld [vmem:[%s1078_s13 + $0x28] sm:$0xff]  ;;  %v470_v36 = vld [vmem:[%s1078_s13 + $0x30] sm:$0xff]  ;;  %v471_v37 = vld [vmem:[%s1078_s13 + $0x38] sm:$0xff] }
  0x1e   : > { %v397_v24 = vmul.f32 %v773_v11, %v1073_v1  ;;  %v398_v25 = vmul.f32 %v774_v12, %v1073_v1  ;;  %v399_v30 = vmul.f32 %v777_v18, %v1073_v1  ;;  %v400_v31 = vmul.f32 %v778_v19, %v1073_v1  ;;  %v830_v42 = vld [vmem:[%s1067_s8 + $0x20] sm:$0xff]   ;;  %v831_v47 = vld [vmem:[%s1067_s8 + $0x28] sm:$0xff]   ;;  %v832_v52 = vld [vmem:[%s1067_s8 + $0x30] sm:$0xff]  }
  0x1f   : > { %v432_v20 = vadd.f32 %v1085_v5, %v393_v9  ;;  %v433_v21 = vadd.f32 %v1085_v5, %v394_v10  ;;  %v434_v26 = vadd.f32 %v1085_v5, %v395_v16  ;;  %v435_v27 = vadd.f32 %v1085_v5, %v396_v17  ;;  %v833_v57 = vld [vmem:[%s1067_s8 + $0x38] sm:$0xff]   ;;  %v472_v3 = vld [vmem:[%s1078_s13 + $0x40] sm:$0xff]  ;;  %v473_v4 = vld [vmem:[%s1078_s13 + $0x48] sm:$0xff] }
  0x20   : > { %v436_v34 = vadd.f32 %v1085_v5, %v397_v24  ;;  %v437_v35 = vadd.f32 %v1085_v5, %v398_v25  ;;  %v438_v40 = vadd.f32 %v1085_v5, %v399_v30  ;;  %v439_v41 = vadd.f32 %v1085_v5, %v400_v31  ;;  %v474_v12 = vld [vmem:[%s1078_s13 + $0x50] sm:$0xff]  ;;  %v475_v13 = vld [vmem:[%s1078_s13 + $0x58] sm:$0xff]  ;;  %v476_v18 = vld [vmem:[%s1078_s13 + $0x60] sm:$0xff] }
  0x21   : > { %v496_v32 = vadd.f32 %v464_v14, %v432_v20  ;;  %v497_v33 = vadd.f32 %v465_v15, %v433_v21  ;;  %v498_v38 = vadd.f32 %v466_v22, %v434_v26  ;;  %v499_v39 = vadd.f32 %v467_v23, %v435_v27  ;;  %v477_v19 = vld [vmem:[%s1078_s13 + $0x68] sm:$0xff]  ;;  %v478_v26 = vld [vmem:[%s1078_s13 + $0x70] sm:$0xff]  ;;  %v479_v27 = vld [vmem:[%s1078_s13 + $0x78] sm:$0xff] }
  0x22   : > { %v500_v45 = vadd.f32 %v468_v28, %v436_v34  ;;  %v501_v46 = vadd.f32 %v469_v29, %v437_v35  ;;  %v502_v50 = vadd.f32 %v470_v36, %v438_v40  ;;  %v503_v51 = vadd.f32 %v471_v37, %v439_v41  ;;  %v835_v37 = vld [vmem:[%s1067_s8 + $0x48] sm:$0xff]  }
  0x23   : > { %v528_v43 = vmax.f32 %v496_v32, 0.0  ;;  %v529_v44 = vmax.f32 %v497_v33, 0.0  ;;  %v530_v48 = vmax.f32 %v498_v38, 0.0  ;;  %v531_v49 = vmax.f32 %v499_v39, 0.0  ;;  %v834_v32 = vld [vmem:[%s1067_s8 + $0x40] sm:$0xff]  }
  0x24   : > { %v532_v53 = vmax.f32 %v500_v45, 0.0  ;;  %v533_v54 = vmax.f32 %v501_v46, 0.0  ;;  %v781_v55 = vunpack.c.l.bf16 %v830_v42  ;;  %v782_v56 = vunpack.c.h.bf16 %v830_v42  ;;  %v836_v42 = vld [vmem:[%s1067_s8 + $0x50] sm:$0xff]  }
  0x25   : > { %561 = vst.msk [vmem:[%s1121_s26] sm:$0xff] %vm560_vm0, %v528_v43  ;;  %562 = vst.msk [vmem:[%s1121_s26 + $0x8] sm:$0xff] %vm560_vm0, %v529_v44  ;;  %v534_v58 = vmax.f32 %v502_v50, 0.0  ;;  %v535_v59 = vmax.f32 %v503_v51, 0.0  ;;  %v785_v60 = vunpack.c.l.bf16 %v831_v47  ;;  %v786_v61 = vunpack.c.h.bf16 %v831_v47  ;;  %v837_v47 = vld [vmem:[%s1067_s8 + $0x58] sm:$0xff]  }
  0x26   : > { %563 = vst.msk [vmem:[%s1121_s26 + $0x10] sm:$0xff] %vm560_vm0, %v530_v48  ;;  %564 = vst.msk [vmem:[%s1121_s26 + $0x18] sm:$0xff] %vm560_vm0, %v531_v49  ;;  %v401_v62 = vmul.f32 %v781_v55, %v1073_v1  ;;  %v402_v63 = vmul.f32 %v782_v56, %v1073_v1  ;;  %v789_v0 = vunpack.c.l.bf16 %v832_v52  ;;  %v790_v2 = vunpack.c.h.bf16 %v832_v52  ;;  %v480_v56 = vld [vmem:[%s1078_s13 + $0x80] sm:$0xff] }
  0x27   : > { %565 = vst.msk [vmem:[%s1121_s26 + $0x20] sm:$0xff] %vm560_vm0, %v532_v53  ;;  %566 = vst.msk [vmem:[%s1121_s26 + $0x28] sm:$0xff] %vm560_vm0, %v533_v54  ;;  %v403_v6 = vmul.f32 %v785_v60, %v1073_v1  ;;  %v404_v7 = vmul.f32 %v786_v61, %v1073_v1  ;;  %v793_v8 = vunpack.c.l.bf16 %v833_v57  ;;  %v794_v9 = vunpack.c.h.bf16 %v833_v57  ;;  %v481_v57 = vld [vmem:[%s1078_s13 + $0x88] sm:$0xff] }
  0x28   : > { %567 = vst.msk [vmem:[%s1121_s26 + $0x30] sm:$0xff] %vm560_vm0, %v534_v58  ;;  %568 = vst.msk [vmem:[%s1121_s26 + $0x38] sm:$0xff] %vm560_vm0, %v535_v59  ;;  %v440_v10 = vadd.f32 %v1085_v5, %v401_v62  ;;  %v441_v11 = vadd.f32 %v1085_v5, %v402_v63  ;;  %v405_v14 = vmul.f32 %v789_v0, %v1073_v1  ;;  %v797_v45 = vunpack.c.l.bf16 %v834_v32  ;;  %v482_v0 = vld [vmem:[%s1078_s13 + $0x90] sm:$0xff] }
  0x29   : > { %v406_v15 = vmul.f32 %v790_v2, %v1073_v1  ;;  %v442_v16 = vadd.f32 %v1085_v5, %v403_v6  ;;  %v443_v17 = vadd.f32 %v1085_v5, %v404_v7  ;;  %v407_v20 = vmul.f32 %v793_v8, %v1073_v1  ;;  %v483_v2 = vld [vmem:[%s1078_s13 + $0x98] sm:$0xff]  ;;  %v484_v8 = vld [vmem:[%s1078_s13 + $0xa0] sm:$0xff] }
  0x2a   : > { %v408_v21 = vmul.f32 %v794_v9, %v1073_v1  ;;  %v504_v22 = vadd.f32 %v472_v3, %v440_v10  ;;  %v505_v23 = vadd.f32 %v473_v4, %v441_v11  ;;  %v444_v24 = vadd.f32 %v1085_v5, %v405_v14  ;;  %v485_v9 = vld [vmem:[%s1078_s13 + $0xa8] sm:$0xff] }
  0x2b   : > { %v445_v25 = vadd.f32 %v1085_v5, %v406_v15  ;;  %v506_v28 = vadd.f32 %v474_v12, %v442_v16  ;;  %v507_v29 = vadd.f32 %v475_v13, %v443_v17  ;;  %v446_v30 = vadd.f32 %v1085_v5, %v407_v20  ;;  %v486_v16 = vld [vmem:[%s1078_s13 + $0xb0] sm:$0xff]  ;;  %v487_v17 = vld [vmem:[%s1078_s13 + $0xb8] sm:$0xff] }
  0x2c   : > { %v447_v31 = vadd.f32 %v1085_v5, %v408_v21  ;;  %v536_v33 = vmax.f32 %v504_v22, 0.0  ;;  %v537_v34 = vmax.f32 %v505_v23, 0.0  ;;  %v508_v35 = vadd.f32 %v476_v18, %v444_v24  ;;  %v838_v22 = vld [vmem:[%s1067_s8 + $0x60] sm:$0xff]  }
  0x2d   : > { %v509_v36 = vadd.f32 %v477_v19, %v445_v25  ;;  %v538_v38 = vmax.f32 %v506_v28, 0.0  ;;  %v539_v39 = vmax.f32 %v507_v29, 0.0  ;;  %v510_v40 = vadd.f32 %v478_v26, %v446_v30 }
  0x2e   : > { %v511_v41 = vadd.f32 %v479_v27, %v447_v31  ;;  %569 = vst.msk [vmem:[%s1121_s26 + $0x40] sm:$0xff] %vm560_vm0, %v536_v33  ;;  %570 = vst.msk [vmem:[%s1121_s26 + $0x48] sm:$0xff] %vm560_vm0, %v537_v34  ;;  %v540_v43 = vmax.f32 %v508_v35, 0.0  ;;  %v798_v46 = vunpack.c.h.bf16 %v834_v32  ;;  %v801_v50 = vunpack.c.l.bf16 %v835_v37  ;;  %v839_v27 = vld [vmem:[%s1067_s8 + $0x68] sm:$0xff]   ;;  %v840_v32 = vld [vmem:[%s1067_s8 + $0x70] sm:$0xff]  }
  0x2f   : > { %v541_v44 = vmax.f32 %v509_v36, 0.0  ;;  %571 = vst.msk [vmem:[%s1121_s26 + $0x50] sm:$0xff] %vm560_vm0, %v538_v38  ;;  %572 = vst.msk [vmem:[%s1121_s26 + $0x58] sm:$0xff] %vm560_vm0, %v539_v39  ;;  %v542_v48 = vmax.f32 %v510_v40, 0.0  ;;  %v802_v51 = vunpack.c.h.bf16 %v835_v37  ;;  %v409_v52 = vmul.f32 %v797_v45, %v1073_v1  ;;  %v841_v37 = vld [vmem:[%s1067_s8 + $0x78] sm:$0xff]   ;;  %s899_s8 = scalar_lea.vmem %s1263_s30, 4096 }
  0x30   : > { %v543_v49 = vmax.f32 %v511_v41, 0.0  ;;  %573 = vst.msk [vmem:[%s1121_s26 + $0x60] sm:$0xff] %vm560_vm0, %v540_v43  ;;  %v410_v53 = vmul.f32 %v798_v46, %v1073_v1  ;;  %v805_v54 = vunpack.c.l.bf16 %v836_v42  ;;  %v806_v55 = vunpack.c.h.bf16 %v836_v42  ;;  %v488_v46 = vld [vmem:[%s1078_s13 + $0xc0] sm:$0xff]  ;;  %p900_p12 = scmp.ne.s32.totalorder %s1263_s30, %s899_s8  ;;  %p907_p2 = scmp.lt.s32.totalorder %s905_s11, %s899_s8 }
  0x31   : > { %574 = vst.msk [vmem:[%s1121_s26 + $0x68] sm:$0xff] %vm560_vm0, %v541_v44  ;;  %575 = vst.msk [vmem:[%s1121_s26 + $0x70] sm:$0xff] %vm560_vm0, %v542_v48  ;;  %v411_v58 = vmul.f32 %v801_v50, %v1073_v1  ;;  %v412_v59 = vmul.f32 %v802_v51, %v1073_v1  ;;  %v809_v60 = vunpack.c.l.bf16 %v837_v47  ;;  %v810_v61 = vunpack.c.h.bf16 %v837_v47  ;;  %v489_v47 = vld [vmem:[%s1078_s13 + $0xc8] sm:$0xff] }
  0x32   : > { %576 = vst.msk [vmem:[%s1121_s26 + $0x78] sm:$0xff] %vm560_vm0, %v543_v49  ;;  %v448_v62 = vadd.f32 %v1085_v5, %v409_v52  ;;  %v449_v63 = vadd.f32 %v1085_v5, %v410_v53  ;;  %v413_v3 = vmul.f32 %v805_v54, %v1073_v1  ;;  %v414_v4 = vmul.f32 %v806_v55, %v1073_v1  ;;  %v490_v54 = vld [vmem:[%s1078_s13 + $0xd0] sm:$0xff]  ;;  %v491_v55 = vld [vmem:[%s1078_s13 + $0xd8] sm:$0xff]  ;;  %p901_p13 = pnand %p900_p12, %p1047_p4  ;;  %p908_p3 = por %p907_p2, %p906_p1 }
  0x33   : > { %v450_v6 = vadd.f32 %v1085_v5, %v411_v58  ;;  %v451_v7 = vadd.f32 %v1085_v5, %v412_v59  ;;  %v415_v10 = vmul.f32 %v809_v60, %v1073_v1  ;;  %v416_v11 = vmul.f32 %v810_v61, %v1073_v1  ;;  %v492_v60 = vld [vmem:[%s1078_s13 + $0xe0] sm:$0xff]  ;;  %v493_v61 = vld [vmem:[%s1078_s13 + $0xe8] sm:$0xff] }
  0x34   : > { %v512_v12 = vadd.f32 %v480_v56, %v448_v62  ;;  %v513_v13 = vadd.f32 %v481_v57, %v449_v63  ;;  %v452_v14 = vadd.f32 %v1085_v5, %v413_v3  ;;  %v453_v15 = vadd.f32 %v1085_v5, %v414_v4  ;;  %p902_p0 = pneg %p901_p13 }
  0x35   : > { %v514_v18 = vadd.f32 %v482_v0, %v450_v6  ;;  %v515_v19 = vadd.f32 %v483_v2, %v451_v7  ;;  %v454_v20 = vadd.f32 %v1085_v5, %v415_v10  ;;  %v455_v21 = vadd.f32 %v1085_v5, %v416_v11  ;;  %v494_v6 = vld [vmem:[%s1078_s13 + $0xf0] sm:$0xff]  ;;  %v495_v7 = vld [vmem:[%s1078_s13 + $0xf8] sm:$0xff] }
  0x36   : > { %v544_v23 = vmax.f32 %v512_v12, 0.0  ;;  %v545_v24 = vmax.f32 %v513_v13, 0.0  ;;  %v516_v25 = vadd.f32 %v484_v8, %v452_v14  ;;  %v517_v26 = vadd.f32 %v485_v9, %v453_v15  ;;  %p909_p5 = pnand %p908_p3, %p902_p0 }
  0x37   : > { %v546_v28 = vmax.f32 %v514_v18, 0.0  ;;  %v547_v29 = vmax.f32 %v515_v19, 0.0  ;;  %v518_v30 = vadd.f32 %v486_v16, %v454_v20  ;;  %v519_v31 = vadd.f32 %v487_v17, %v455_v21 }
  0x38   : > { %577 = vst.msk [vmem:[%s1121_s26 + $0x80] sm:$0xff] %vm560_vm0, %v544_v23  ;;  %578 = vst.msk [vmem:[%s1121_s26 + $0x88] sm:$0xff] %vm560_vm0, %v545_v24  ;;  %v548_v33 = vmax.f32 %v516_v25, 0.0  ;;  %v549_v34 = vmax.f32 %v517_v26, 0.0  ;;  %v813_v35 = vunpack.c.l.bf16 %v838_v22  ;;  %v814_v36 = vunpack.c.h.bf16 %v838_v22 }
  0x39   : > { %579 = vst.msk [vmem:[%s1121_s26 + $0x90] sm:$0xff] %vm560_vm0, %v546_v28  ;;  %580 = vst.msk [vmem:[%s1121_s26 + $0x98] sm:$0xff] %vm560_vm0, %v547_v29  ;;  %v550_v38 = vmax.f32 %v518_v30, 0.0  ;;  %v551_v39 = vmax.f32 %v519_v31, 0.0  ;;  %v817_v40 = vunpack.c.l.bf16 %v839_v27  ;;  %v818_v41 = vunpack.c.h.bf16 %v839_v27 }
  0x3a   : > { %581 = vst.msk [vmem:[%s1121_s26 + $0xa0] sm:$0xff] %vm560_vm0, %v548_v33  ;;  %582 = vst.msk [vmem:[%s1121_s26 + $0xa8] sm:$0xff] %vm560_vm0, %v549_v34  ;;  %v417_v42 = vmul.f32 %v813_v35, %v1073_v1  ;;  %v418_v43 = vmul.f32 %v814_v36, %v1073_v1  ;;  %v821_v44 = vunpack.c.l.bf16 %v840_v32  ;;  %v822_v45 = vunpack.c.h.bf16 %v840_v32 }
  0x3b   : > { %583 = vst.msk [vmem:[%s1121_s26 + $0xb0] sm:$0xff] %vm560_vm0, %v550_v38  ;;  %584 = vst.msk [vmem:[%s1121_s26 + $0xb8] sm:$0xff] %vm560_vm0, %v551_v39  ;;  %v419_v48 = vmul.f32 %v817_v40, %v1073_v1  ;;  %v420_v49 = vmul.f32 %v818_v41, %v1073_v1  ;;  %v825_v50 = vunpack.c.l.bf16 %v841_v37  ;;  %v826_v51 = vunpack.c.h.bf16 %v841_v37 }
  0x3c   : > { %v456_v52 = vadd.f32 %v1085_v5, %v417_v42  ;;  %v457_v53 = vadd.f32 %v1085_v5, %v418_v43  ;;  %v421_v56 = vmul.f32 %v821_v44, %v1073_v1  ;;  %v422_v57 = vmul.f32 %v822_v45, %v1073_v1 }
  0x3d   : > { %v458_v58 = vadd.f32 %v1085_v5, %v419_v48  ;;  %v459_v59 = vadd.f32 %v1085_v5, %v420_v49  ;;  %v423_v62 = vmul.f32 %v825_v50, %v1073_v1  ;;  %v424_v63 = vmul.f32 %v826_v51, %v1073_v1 }
  0x3e   : > { %v520_v0 = vadd.f32 %v488_v46, %v456_v52  ;;  %v521_v2 = vadd.f32 %v489_v47, %v457_v53  ;;  %v460_v3 = vadd.f32 %v1085_v5, %v421_v56  ;;  %v461_v4 = vadd.f32 %v1085_v5, %v422_v57 }
  0x3f   : > { %v522_v8 = vadd.f32 %v490_v54, %v458_v58  ;;  %v523_v9 = vadd.f32 %v491_v55, %v459_v59  ;;  %v462_v10 = vadd.f32 %v1085_v5, %v423_v62  ;;  %v463_v11 = vadd.f32 %v1085_v5, %v424_v63 }
  0x40   : > { %v552_v1 = vmax.f32 %v520_v0, 0.0  ;;  %v553_v12 = vmax.f32 %v521_v2, 0.0  ;;  %v524_v13 = vadd.f32 %v492_v60, %v460_v3  ;;  %v525_v14 = vadd.f32 %v493_v61, %v461_v4 }
  0x41   : > { %v554_v15 = vmax.f32 %v522_v8, 0.0  ;;  %v555_v16 = vmax.f32 %v523_v9, 0.0  ;;  %v526_v17 = vadd.f32 %v494_v6, %v462_v10  ;;  %v527_v18 = vadd.f32 %v495_v7, %v463_v11 }
  0x42   : > { %585 = vst.msk [vmem:[%s1121_s26 + $0xc0] sm:$0xff] %vm560_vm0, %v552_v1  ;;  %586 = vst.msk [vmem:[%s1121_s26 + $0xc8] sm:$0xff] %vm560_vm0, %v553_v12  ;;  %v556_v5 = vmax.f32 %v524_v13, 0.0  ;;  %v557_v19 = vmax.f32 %v525_v14, 0.0 }
  0x43   : > { %587 = vst.msk [vmem:[%s1121_s26 + $0xd0] sm:$0xff] %vm560_vm0, %v554_v15  ;;  %588 = vst.msk [vmem:[%s1121_s26 + $0xd8] sm:$0xff] %vm560_vm0, %v555_v16  ;;  %v558_v20 = vmax.f32 %v526_v17, 0.0  ;;  %v559_v21 = vmax.f32 %v527_v18, 0.0 }
  0x44   : > { %589 = vst.msk [vmem:[%s1121_s26 + $0xe0] sm:$0xff] %vm560_vm0, %v556_v5  ;;  %590 = vst.msk [vmem:[%s1121_s26 + $0xe8] sm:$0xff] %vm560_vm0, %v557_v19 }
  0x45   : > { %591 = vst.msk [vmem:[%s1121_s26 + $0xf0] sm:$0xff] %vm560_vm0, %v558_v20  ;;  %592 = vst.msk [vmem:[%s1121_s26 + $0xf8] sm:$0xff] %vm560_vm0, %v559_v21 }
  0x46   : > { %912 = shalt.err (!%p909_p5)
}
  0x47   : > { %s913_s12 = scalar_lea.hbm %s1261_s6, 4096  ;;  %s917_s21 = scalar_lea.hbm %s1329_s4, 8192 }
  0x48   : > { %p914_p6 = scmp.ne.s32.totalorder %s1261_s6, %s913_s12  ;;  %p918_p10 = scmp.lt.u32.totalorder %s1261_s6, %s1329_s4 }
  0x49   : > { %p919_p11 = scmp.lt.u32.totalorder %s917_s21, %s913_s12  ;;  %p921_p13 = scmp.lt.u32.totalorder %s913_s12, %s1261_s6 }
  0x4a   : > { %p915_p7 = pnand %p914_p6, %p1047_p4 }
  0x4b   : > { %p920_p12 = por %p919_p11, %p918_p10 }
  0x4c   : > { %p916_p9 = pneg %p915_p7 }
  0x4d   : > { %p922_p0 = por %p921_p13, %p920_p12 }
  0x4f   : > { %p923_p1 = pnand %p922_p0, %p916_p9 }
  0x51   : > { %926 = shalt.err (!%p923_p1)
}
  0x52   : > { %s980_s26 = smov 128   ;;  %s981_s29 = smov 8  }
  0x53   : > { %842 = dma.vmem_to_hbm [thread:$0]  (%p1047_p4), %s1263_s30, 4096, %s1261_s6, %s1279_s7, %s980_s26, %s980_s26, %s981_s29  }
  0x54 PF: > { %p848_p2 = scmp.ge.s32.totalorder %s977_s20, 2  ;;  %s625_s18 = sand.u32 1, %s957_s15  }
  0x55   : > { %s626_s5 = scalar_lea.sflag [#allocation3], %s625_s18 }
  0x56   : > { %p845_p3 = pnand %p848_p2, %p1054_p8 }
  0x58   : > { %952 = dma.done.wait (!%p845_p3), %s626_s5, 4096  }
  0x59   : > { %954 = vsyncadd (!%p845_p3), %s626_s5, 4294963200  ;;  %s17_s20 = sadd.s32 1, %s977_s20   ;;  %s1332_s15 = smov %s961_s16 }
  0x5a   : > { %p14_p5 = scmp.ge.s32.totalorder %s17_s20, 4   ;;  %s1333_s16 = smov %s965_s17 }
  0x5b   : > { %s1334_s17 = smov %s1060_s28  ;;  %s1335_s18 = smov %s973_s19 }
  0x5c   : > { %s1336_s19 = smov %s1338_s23  ;;  %16 = sbr.rel (!%p14_p5) target bundleno = 4 (0x4), region = 80 }
  0x63   :  { %631 = vsyncpa [#allocation3], 1 }
  0x64   :  { %633 = vsyncpa [#allocation3 + $0x1], 1 }

// kernel: _lambda_.4
= control target key start
LH: loop header
LB: loop body
LE: loop exit
PB: predicated region body
PF: predicated region fallthrough
CT: control target
= control target key end

     0   :  { %s4845_s15 = smov 0   ;;  %s4847_s16 = smov 0   ;;  %s7080_s0 = inlined_call_operand.vmem [shape: bf16[2,18,18,32], index: 0, kind: input, shape index: {}]   ;;  %s7081_s1 = inlined_call_operand.vmem [shape: bf16[288,32], index: 1, kind: input, shape index: {}]   ;;  %s7082_s2 = inlined_call_operand.vmem [shape: bf16[2,256,32], index: 2, kind: output, shape index: {0}]   ;;  %s7083_s3 = inlined_call_operand.vmem [shape: f32[2,1,32], index: 3, kind: output, shape index: {1}]   ;;  %s7084_s4 = inlined_call_operand.vmem [shape: f32[2,1,32], index: 4, kind: output, shape index: {2}]  }
   0x1   :  { %s4849_s17 = smov 0  }
   0x2 LB: > { %s27_s18 = sadd.s32 1, %s4811_s16  ;;  %p4050_p0 = scmp.ge.s32.totalorder %s4815_s17, 1  ;;  %s4815_s17 = sphi %s4849_s17, %s15_s17   ;;  %s4811_s16 = sphi %s4847_s16, %s7282_s16   ;;  %s4807_s15 = sphi %s4845_s15, %s7281_s15  }
   0x3   : > { %p29_p1 = scmp.ge.s32.totalorder %s27_s18, 2  ;;  %p194_p2 = scmp.lt.s32.totalorder %s4815_s17, 3 }
   0x5   : > { %s7284_s18 = smov (%p29_p1, %s27_s18), 0  ;;  %p195_p3 = pnand %p4050_p0, %p194_p2 }
   0x7   : > { %198 = sbr.rel (%p195_p3) target bundleno = 653 (0x28d), region = 28 }
   0xe   : > { %p239_p4 = scmp.lt.s32.totalorder %s4807_s15, 1  ;;  %vm804_vm0 = vcmask 1042432   ;;  %vm805_vm1 = vcmask 1046532   ;;  %s4817_s23 = smov 64   ;;  %v4702_v45 = vld [vmem:[%s7081_s1 + $0x40] sm:$0xff]   ;;  %vm2809_vm6 = vcmask 261120  }
   0xf   : > { %vm4927_vm2 = vmor %vm804_vm0, %vm805_vm1  ;;  %s4818_s24 = smov 96   ;;  %vm353_vm3 = vsmask.f32 3328  ;;  %vm354_vm4 = vsmask.f32 7440  ;;  %4475 = vmatprep.subr.bf16.mxu0 %v4702_v45  ;;  %4641 = vmatprep.subr.bf16.mxu1 %v4702_v45  ;;  %v4703_v62 = vld [vmem:[%s7081_s1] sm:$0xff]  }
  0x10   : > { %s7286_s15 = smov (!%p239_p4, %s4807_s15), 1  ;;  %4476 = vmatpush3.bf16.msra.mxu0 %v4703_v62  ;;  %4649 = vmatpush3.bf16.msra.mxu1 %v4703_v62  ;;  %s4819_s5 = smov 32   ;;  %vm5013_vm5 = vmor %vm353_vm3, %vm354_vm4  ;;  %vm2858_vm7 = vcmask 523264   ;;  %vm2891_vm8 = vcmask 785408   ;;  %vm3674_vm9 = vcmask 257024   ;;  %vm3879_vm10 = vcmask 253952  }
  0x11   : > { %s4657_s19 = smul.u32 216, %s7286_s15  ;;  %s261_s27 = scalar_lea.vmem %s7083_s3, %s7286_s15 }
  0x12   : > { %s267_s30 = scalar_lea.vmem %s7084_s4, %s7286_s15 }
  0x13   : > { %s4869_s22 = scalar_lea.vmem %s7080_s0, %s4657_s19 }
  0x14   : > { %v4150_v0 = vld [vmem:[%s4869_s22 + $0x18] sm:$0xf]  ;;  %v4873_v1 = vld [vmem:[%s4869_s22 + $0x1c] sm:$0xf]  ;;  %v4152_v5 = vld [vmem:[%s4869_s22 + $0x24] sm:$0xf] }
  0x15   : > { %7136 = vst [vmem:[#allocation2_spill] sm:$0xff] %v4873_v1  ;;  %v1591_v2 = vshrl.u32 %v4873_v1, 16  ;;  %v7085_v3 = vrot.slane %v4873_v1, 5  ;;  %v4326_v4 = vcombine.low %v4150_v0, %v4873_v1  ;;  %v4880_v6 = vld [vmem:[%s4869_s22 + $0x28] sm:$0xf]  ;;  %v1578_v7 = vshrl.u32 %v4150_v0, 16 }
  0x16   : > { %v1581_v8 = vshll.u32 %v4150_v0, 16  ;;  %v1615_v9 = vshrl.u32 %v4880_v6, 16  ;;  %v4884_v10 = vld [vmem:[%s4869_s22 + $0x24] sm:$0xe]  ;;  %v1587_v11 = vshll.u32 %v4873_v1, 16  ;;  %v1611_v13 = vshll.u32 %v4880_v6, 16 }
  0x17   : > { %v4887_v12 = vrot.slane %v1591_v2, 4  ;;  %2649 = vrot.lane.b32.xlu1 %v4326_v4, %s4817_s23  ;;  %v7086_v14 = vrot.slane %v4880_v6, 5  ;;  %v4070_v15 = vld [vmem:[%s4869_s22 + $0xc] sm:$0xf]  ;;  %v4895_v16 = vrot.slane %v7085_v3, 4  ;;  %v1580_v17 = vrot.slane %v1578_v7, 4 }
  0x18   : > { %v1583_v18 = vrot.slane %v1581_v8, 5  ;;  %v4327_v19 = vcombine.low %v4152_v5, %v4880_v6  ;;  %v4898_v20 = vrot.slane %v1615_v9, 4  ;;  %v1602_v22 = vshrl.u32 %v4152_v5, 16  ;;  %v4902_v24 = vld [vmem:[%s4869_s22 + $0x10] sm:$0xf]  ;;  %v4704_v7 = vld [vmem:[%s7081_s1 + $0x48] sm:$0xff]  }
  0x19   : > { %7137 = vst [vmem:[#allocation3_spill] sm:$0xff] %v4895_v16  ;;  %v1605_v23 = vshll.u32 %v4152_v5, 16  ;;  %v4906_v26 = vrot.slane %v7086_v14, 4  ;;  %v982_v27 = vshrl.u32 %v4902_v24, 16  ;;  %v4278_v28 = vcombine.low %v4070_v15, %v4902_v24  ;;  %v4912_v29 = vld [vmem:[%s4869_s22 + $0x14] sm:$0x1]  ;;  %4477 = vmatprep.subr.bf16.mxu0 %v4704_v7  ;;  %4642 = vmatprep.subr.bf16.mxu1 %v4704_v7 }
  0x1a   : > { %v1584_v25 = vor.u32 %v1583_v18, %v1580_v17  ;;  %2651 = vrot.lane.b32.xlu0 %v4327_v19, %s4817_s23  ;;  %v4118_v30 = vld [vmem:[%s4869_s22 + $0xc] sm:$0xe]  ;;  %v4915_v31 = vrot.slane %v1602_v22, 4  ;;  %v4920_v33 = vld [vmem:[%s4869_s22 + $0x4] sm:$0xf]  ;;  %v969_v37 = vshrl.u32 %v4070_v15, 16 }
  0x1b   : > { %v4917_v32 = vrot.slane %v1605_v23, 5  ;;  %v4923_v34 = vld [vmem:[%s4869_s22 + $0x8] sm:$0x1]  ;;  %2425 = vrot.lane.b32.xlu1 %v4278_v28, %s4818_s24  ;;  %v972_v38 = vshll.u32 %v4070_v15, 16  ;;  %v4134_v39 = vrot.slane %v4118_v30, 9  ;;  %v4936_v42 = vrot.slane %v982_v27, 4 }
  0x1c   : > { %v740_v40 = vld [vmem:[%s4869_s22] sm:$0xe]  ;;  %v4934_v41 = vrot.slane %v1584_v25, 4  ;;  %v1418_v43 = vrot.slane %v4902_v24, 5  ;;  %v4940_v44 = vld [vmem:[%s4869_s22 + $0x1c] sm:$0xf] }
  0x1d   : > { %v1421_v46 = vrot.slane %v4912_v29, 5  ;;  %v4054_v47 = vrot.slane %v740_v40, 9  ;;  %v809_v48 = vrot.slane %v4920_v33, 5  ;;  %v812_v49 = vrot.slane %v4923_v34, 5  ;;  %v4949_v50 = vld [vmem:[%s4869_s22 + $0x20] sm:$0x1] }
  0x1e   : > { %v1608_v51 = vor.u32 %v4917_v32, %v4915_v31  ;;  %v1419_v53 = vsel %vm4927_vm2, %v4134_v39, %v1418_v43  ;;  %v1420_v54 = vrot.slane %v1418_v43, 4  ;;  %v4119_v55 = vld [vmem:[%s4869_s22 + $0x18] sm:$0xe]  ;;  %v4958_v56 = vld [vmem:[%s4869_s22 + $0x10] sm:$0xf]  ;;  %v4960_v57 = vrot.slane %v969_v37, 4 }
  0x1f   : > { %v810_v58 = vsel %vm4927_vm2, %v4054_v47, %v809_v48  ;;  %v811_v59 = vrot.slane %v809_v48, 4  ;;  %v4135_v60 = vrot.slane %v4119_v55, 9  ;;  %v4965_v61 = vld [vmem:[%s4869_s22 + $0x14] sm:$0x1]  ;;  %v4970_v63 = vrot.slane %v972_v38, 5  ;;  %v4705_v38 = vld [vmem:[%s7081_s1 + $0x8] sm:$0xff]  }
  0x20   : > { %v1422_v0 = vsel %vm4927_vm2, %v1420_v54, %v1421_v46  ;;  %v1425_v2 = vrot.slane %v4940_v44, 5  ;;  %v1428_v4 = vrot.slane %v4949_v50, 5  ;;  %v741_v5 = vld [vmem:[%s4869_s22 + $0xc] sm:$0xe]  ;;  %v816_v17 = vrot.slane %v4958_v56, 5  ;;  %4478 = vmatpush3.bf16.msra.mxu0 %v4705_v38  ;;  %4650 = vmatpush3.bf16.msra.mxu1 %v4705_v38  ;;  %v4711_v32 = vld [vmem:[%s7081_s1 + $0x18] sm:$0xff]  }
  0x21   : > { %v4310_v8 = vcombine.low %v1419_v53, %v1422_v0  ;;  %v813_v9 = vsel %vm4927_vm2, %v811_v59, %v812_v49  ;;  %v4055_v15 = vrot.slane %v741_v5, 9  ;;  %v305_v18 = vld [vmem:[%s4869_s22] sm:$0xf]  ;;  %v819_v25 = vrot.slane %v4965_v61, 5  ;;  %v307_v46 = vld [vmem:[%s4869_s22 + $0xc] sm:$0xf] }
  0x22   : > { %v4262_v19 = vcombine.low %v810_v58, %v813_v9  ;;  %v1426_v22 = vsel %vm4927_vm2, %v4135_v60, %v1425_v2  ;;  %v1427_v23 = vrot.slane %v1425_v2, 4  ;;  %v818_v28 = vrot.slane %v816_v17, 4  ;;  %v4708_v2 = vld [vmem:[%s7081_s1 + $0x10] sm:$0xff]   ;;  %v5020_v9 = vld [vmem:[%s4869_s22 + $0x20] sm:$0x1] }
  0x23   : > { %2553 = vrot.lane.b32.xlu0 %v4310_v8, %s4819_s5  ;;  %v817_v27 = vsel %vm4927_vm2, %v4055_v15, %v816_v17  ;;  %v357_v30 = vshrl.u32 %v305_v18, 16  ;;  %v360_v37 = vshll.u32 %v305_v18, 16  ;;  %v366_v40 = vshll.u32 %v4920_v33, 16  ;;  %7142 = vst [vmem:[#allocation4_spill] sm:$0xff] %v5020_v9  ;;  %v5037_v31 = vld [vmem:[%s4869_s22 + $0x18] sm:$0xf] }
  0x24   : > { %2329 = vrot.lane.b32.xlu1 %v4262_v19, %s4817_s23  ;;  %v1429_v39 = vsel %vm4927_vm2, %v1427_v23, %v1428_v4  ;;  %v370_v43 = vshrl.u32 %v4920_v33, 16  ;;  %v376_v45 = vshll.u32 %v4923_v34, 16  ;;  %v820_v48 = vsel %vm4927_vm2, %v818_v28, %v819_v25  ;;  %v4707_v33 = vld [vmem:[%s7081_s1 + $0x50] sm:$0xff]   ;;  %v5315_v3 = vld [vmem:[%s4869_s22 + $0x3c] sm:$0xf] }
  0x25   : > { %v4311_v47 = vcombine.low %v1426_v22, %v1429_v39  ;;  %v359_v49 = vrot.slane %v357_v30, 4  ;;  %v362_v53 = vrot.slane %v360_v37, 5  ;;  %v4263_v54 = vcombine.low %v817_v27, %v820_v48  ;;  %4479 = vmatprep.subr.bf16.mxu0 %v4707_v33  ;;  %4643 = vmatprep.subr.bf16.mxu1 %v4707_v33  ;;  %v329_v33 = vld [vmem:[%s4869_s22 + $0x90] sm:$0xf]  ;;  %v5601_v1 = vld [vmem:[%s4869_s22 + $0x58] sm:$0xf] }
  0x26   : > { %v368_v55 = vrot.slane %v366_v40, 5  ;;  %v372_v58 = vrot.slane %v370_v43, 4  ;;  %v378_v59 = vrot.slane %v376_v45, 5  ;;  %v381_v60 = vshrl.u32 %v307_v46, 16  ;;  %4480 = vmatpush3.bf16.msra.mxu0 %v4708_v2  ;;  %4651 = vmatpush3.bf16.msra.mxu1 %v4708_v2  ;;  %v4183_v43 = vld [vmem:[%s4869_s22 + $0x2c] sm:$0x1] }
  0x27   : > { %2555 = vrot.lane.b32.xlu0 %v4311_v47, %s4819_s5  ;;  %v363_v34 = vor.u32 %v362_v53, %v359_v49  ;;  %v384_v62 = vshll.u32 %v307_v46, 16  ;;  %v390_v0 = vshll.u32 %v4958_v56, 16  ;;  %v394_v7 = vshrl.u32 %v4958_v56, 16  ;;  %v330_v2 = vld [vmem:[%s4869_s22 + $0x94] sm:$0xf]  ;;  %7163 = vst [vmem:[#allocation23_spill] sm:$0xff] %v5601_v1 }
  0x28   : > { %2331 = vrot.lane.b32.xlu1 %v4263_v54, %s4817_s23  ;;  %v373_v5 = vor.u32 %v372_v58, %v368_v55  ;;  %v400_v8 = vshll.u32 %v4965_v61, 16  ;;  %v1589_v15 = vrot.slane %v1587_v11, 5  ;;  %v383_v18 = vrot.slane %v381_v60, 4  ;;  %v4710_v11 = vld [vmem:[%s7081_s1 + $0x58] sm:$0xff]   ;;  %v744_v48 = vld [vmem:[%s4869_s22 + $0x30] sm:$0xe] }
  0x29   : > { %v364_v17 = vrot.slane %v363_v34, 4  ;;  %v386_v19 = vrot.slane %v384_v62, 5  ;;  %v392_v22 = vrot.slane %v390_v0, 5  ;;  %v5027_v23 = vrot.slane %v1608_v51, 4  ;;  %4481 = vmatprep.subr.bf16.mxu0 %v4710_v11  ;;  %4644 = vmatprep.subr.bf16.mxu1 %v4710_v11  ;;  %v4130_v11 = vld [vmem:[%s4869_s22 + $0x9c] sm:$0xe] }
  0x2a   : > { %v374_v56 = vrot.slane %v373_v5, 4  ;;  %v396_v61 = vrot.slane %v394_v7, 4  ;;  %v402_v25 = vrot.slane %v400_v8, 5  ;;  %v1594_v30 = vor.u32 %v4887_v12, %v1589_v15  ;;  %4482 = vmatpush3.bf16.msra.mxu0 %v4711_v32  ;;  %4652 = vmatpush3.bf16.msra.mxu1 %v4711_v32  ;;  %v5067_v5 = vld [vmem:[%s4869_s22 + $0x98] sm:$0x1] }
  0x2b   : > { %v369_v27 = vsel %vm5013_vm5, %v364_v17, %v368_v55  ;;  %v387_v28 = vor.u32 %v386_v19, %v383_v18  ;;  %v1597_v37 = vshll.u32 %v5020_v9, 16  ;;  %v1590_v39 = vsel %vm5013_vm5, %v4934_v41, %v1589_v15  ;;  %v4713_v17 = vld [vmem:[%s7081_s1 + $0x60] sm:$0xff]  }
  0x2c   : > { %v379_v51 = vsel %vm5013_vm5, %v374_v56, %v378_v59  ;;  %v397_v38 = vor.u32 %v396_v61, %v392_v22  ;;  %v993_v40 = vshrl.u32 %v5037_v31, 16  ;;  %v1595_v46 = vrot.slane %v1594_v30, 4  ;;  %v5084_v56 = vld [vmem:[%s4869_s22 + $0xa0] sm:$0xf]  ;;  %4483 = vmatprep.subr.bf16.mxu0 %v4713_v17  ;;  %4645 = vmatprep.subr.bf16.mxu1 %v4713_v17 }
  0x2d   : > { %v4246_v12 = vcombine.low %v369_v27, %v379_v51  ;;  %v388_v45 = vrot.slane %v387_v28, 4  ;;  %v1599_v47 = vrot.slane %v1597_v37, 5  ;;  %v996_v41 = vshll.u32 %v5037_v31, 16  ;;  %v5095_v37 = vld [vmem:[%s4869_s22 + $0xa4] sm:$0x1] }
  0x2e   : > { %v398_v49 = vrot.slane %v397_v38, 4  ;;  %v5050_v53 = vrot.slane %v993_v40, 4  ;;  %v1613_v58 = vrot.slane %v1611_v13, 5  ;;  %v1621_v59 = vshll.u32 %v4183_v43, 16 }
  0x2f   : > { %2249 = vrot.lane.b32.xlu0 %v4246_v12, %s4819_s5  ;;  %v393_v54 = vsel %vm5013_vm5, %v388_v45, %v392_v22  ;;  %v1600_v55 = vsel %vm5013_vm5, %v1595_v46, %v1599_v47  ;;  %v5063_v62 = vrot.slane %v996_v41, 5  ;;  %v2037_v0 = vrot.slane %v4183_v43, 5  ;;  %v5105_v45 = vld [vmem:[%s4869_s22 + $0xa8] sm:$0xf] }
  0x30   : > { %v403_v34 = vsel %vm5013_vm5, %v398_v49, %v402_v25  ;;  %v4342_v60 = vcombine.low %v1590_v39, %v1600_v55  ;;  %v4279_v8 = vcombine.low %v5037_v31, %v4940_v44  ;;  %v1618_v13 = vor.u32 %v4898_v20, %v1613_v58  ;;  %v752_v31 = vld [vmem:[%s4869_s22 + $0x90] sm:$0xe]  ;;  %v4715_v55 = vld [vmem:[%s7081_s1 + $0x68] sm:$0xff]  }
  0x31   : > { %v4247_v7 = vcombine.low %v393_v54, %v403_v34  ;;  %v1623_v15 = vrot.slane %v1621_v59, 5  ;;  %v1614_v18 = vsel %vm5013_vm5, %v5027_v23, %v1613_v58  ;;  %v5081_v19 = vsel %vm4927_vm2, %v4906_v26, %v2037_v0  ;;  %v5110_v54 = vld [vmem:[%s4869_s22 + $0xac] sm:$0xf] }
  0x32   : > { %7143 = vst [vmem:[#allocation5_spill] sm:$0xff] %v5081_v19  ;;  %v645_v22 = vshrl.u32 %v329_v33, 16  ;;  %v648_v44 = vshll.u32 %v329_v33, 16  ;;  %v1619_v20 = vrot.slane %v1618_v13, 4  ;;  %v654_v61 = vshll.u32 %v330_v2, 16  ;;  %7144 = vst [vmem:[#allocation6_spill] sm:$0xff] %v5110_v54 }
  0x33   : > { %2251 = vrot.lane.b32.xlu1 %v4247_v7, %s4819_s5  ;;  %2729 = vrot.lane.b32.xlu0 %v4342_v60, %s4818_s24  ;;  %v658_v25 = vshrl.u32 %v330_v2, 16  ;;  %v664_v23 = vshll.u32 %v5067_v5, 16  ;;  %v975_v27 = vor.u32 %v4970_v63, %v4960_v57  ;;  %v999_v26 = vor.u32 %v5063_v62, %v5050_v53  ;;  %v4714_v57 = vld [vmem:[%s7081_s1 + $0x20] sm:$0xff]   ;;  %v4716_v60 = vld [vmem:[%s7081_s1 + $0x28] sm:$0xff]  }
  0x34   : > { %v647_v28 = vrot.slane %v645_v22, 4  ;;  %v650_v30 = vrot.slane %v648_v44, 5  ;;  %v1624_v32 = vsel %vm5013_vm5, %v1619_v20, %v1623_v15  ;;  %v656_v51 = vrot.slane %v654_v61, 5  ;;  %4484 = vmatpush3.bf16.msra.mxu0 %v4714_v57  ;;  %4653 = vmatpush3.bf16.msra.mxu1 %v4714_v57  ;;  %v4719_v57 = vld [vmem:[%s7081_s1 + $0x30] sm:$0xff]  }
  0x35   : > { %v660_v38 = vrot.slane %v658_v25, 4  ;;  %v666_v39 = vrot.slane %v664_v23, 5  ;;  %v4343_v63 = vcombine.low %v1614_v18, %v1624_v32  ;;  %v4146_v43 = vrot.slane %v4130_v11, 9  ;;  %4485 = vmatprep.subr.bf16.mxu0 %v4715_v55  ;;  %4646 = vmatprep.subr.bf16.mxu1 %v4715_v55  ;;  %v5132_v18 = vld [vmem:[%s4869_s22 + $0xb0] sm:$0x1] }
  0x36   : > { %v651_v40 = vor.u32 %v650_v30, %v647_v28  ;;  %v1502_v12 = vrot.slane %v5084_v56, 5  ;;  %v1505_v47 = vrot.slane %v5095_v37, 5  ;;  %v4066_v49 = vrot.slane %v752_v31, 9  ;;  %7145 = vst [vmem:[#allocation7_spill] sm:$0xff] %v5132_v18  ;;  %v4120_v25 = vld [vmem:[%s4869_s22 + $0x24] sm:$0xe] }
  0x37   : > { %2427 = vrot.lane.b32.xlu1 %v4279_v8, %s4818_s24  ;;  %v661_v46 = vor.u32 %v660_v38, %v656_v51  ;;  %v893_v41 = vrot.slane %v330_v2, 5  ;;  %2731 = vrot.lane.b32.xlu0 %v4343_v63, %s4818_s24  ;;  %v896_v34 = vrot.slane %v5067_v5, 5  ;;  %v1866_v8 = vshrl.u32 %v5105_v45, 16  ;;  %v4718_v23 = vld [vmem:[%s7081_s1 + $0x70] sm:$0xff]   ;;  %v5145_v31 = vld [vmem:[%s4869_s22 + $0x28] sm:$0xf] }
  0x38   : > { %v652_v58 = vrot.slane %v651_v40, 4  ;;  %v1503_v59 = vsel %vm4927_vm2, %v4146_v43, %v1502_v12  ;;  %v1504_v33 = vrot.slane %v1502_v12, 4  ;;  %v1869_v15 = vshll.u32 %v5105_v45, 16  ;;  %4486 = vmatpush3.bf16.msra.mxu0 %v4716_v60  ;;  %v5148_v32 = vld [vmem:[%s4869_s22 + $0x2c] sm:$0x1]  ;;  %4654 = vmatpush3.bf16.msra.mxu1 %v4716_v60 }
  0x39   : > { %v662_v0 = vrot.slane %v661_v46, 4  ;;  %v894_v2 = vsel %vm4927_vm2, %v4066_v49, %v893_v41  ;;  %v895_v7 = vrot.slane %v893_v41, 4  ;;  %v1879_v17 = vshrl.u32 %v5110_v54, 16  ;;  %4487 = vmatprep.subr.bf16.mxu0 %v4718_v23  ;;  %4647 = vmatprep.subr.bf16.mxu1 %v4718_v23  ;;  %v5169_v55 = vld [vmem:[%s4869_s22 + $0x9c] sm:$0xf] }
  0x3a   : > { %v657_v13 = vsel %vm5013_vm5, %v652_v58, %v656_v51  ;;  %v1506_v5 = vsel %vm4927_vm2, %v1504_v33, %v1505_v47  ;;  %v1868_v61 = vrot.slane %v1866_v8, 4  ;;  %v5142_v11 = vrot.slane %v975_v27, 4  ;;  %v310_v60 = vld [vmem:[%s4869_s22 + $0x1c] sm:$0xf] }
  0x3b   : > { %v667_v22 = vsel %vm5013_vm5, %v662_v0, %v666_v39  ;;  %v4322_v44 = vcombine.low %v1503_v59, %v1506_v5  ;;  %v897_v20 = vsel %vm4927_vm2, %v895_v7, %v896_v34  ;;  %v1871_v30 = vrot.slane %v1869_v15, 5  ;;  %v339_v0 = vld [vmem:[%s4869_s22 + $0x20] sm:$0x1]  ;;  %v742_v15 = vld [vmem:[%s4869_s22 + $0x18] sm:$0xe] }
  0x3c   : > { %v4258_v28 = vcombine.low %v657_v13, %v667_v22  ;;  %v4338_v51 = vcombine.low %v5105_v45, %v5110_v54  ;;  %v1875_v38 = vshll.u32 %v5110_v54, 16  ;;  %v1881_v39 = vrot.slane %v1879_v17, 4  ;;  %v309_v45 = vld [vmem:[%s4869_s22 + $0x18] sm:$0xf]  ;;  %4488 = vmatpush3.bf16.msra.mxu0 %v4719_v57  ;;  %4655 = vmatpush3.bf16.msra.mxu1 %v4719_v57 }
  0x3d   : > { %2577 = vrot.lane.b32.xlu0 %v4322_v44, %s4819_s5  ;;  %v1885_v27 = vshll.u32 %v5132_v18, 16  ;;  %v4274_v40 = vcombine.low %v894_v2, %v897_v20  ;;  %v1872_v43 = vor.u32 %v1871_v30, %v1868_v61  ;;  %v4136_v12 = vrot.slane %v4120_v25, 9  ;;  %v5186_v30 = vld [vmem:[%s4869_s22 + $0x30] sm:$0xf]  ;;  %v4722_v57 = vld [vmem:[%s7081_s1 + $0x78] sm:$0xff]  }
  0x3e   : > { %2273 = vrot.lane.b32.xlu1 %v4258_v28, %s4819_s5  ;;  %v5164_v46 = vrot.slane %v999_v26, 4  ;;  %v1877_v47 = vrot.slane %v1875_v38, 5  ;;  %v1432_v49 = vrot.slane %v5145_v31, 5  ;;  %v1435_v41 = vrot.slane %v5148_v32, 5  ;;  %4489 = vmatprep.subr.bf16.mxu0 %v4722_v57 }
  0x3f   : > { %v1873_v58 = vrot.slane %v1872_v43, 4  ;;  %v1887_v59 = vrot.slane %v1885_v27, 5  ;;  %v1257_v33 = vshrl.u32 %v5169_v55, 16  ;;  %v1260_v34 = vshll.u32 %v5169_v55, 16  ;;  %4648 = vmatprep.subr.bf16.mxu1 %v4722_v57 }
  0x40   : > { %v1882_v53 = vor.u32 %v1881_v39, %v1877_v47  ;;  %v1433_v62 = vsel %vm4927_vm2, %v4136_v12, %v1432_v49  ;;  %v1434_v26 = vrot.slane %v1432_v49, 4  ;;  %v405_v2 = vshrl.u32 %v309_v45, 16 }
  0x41   : > { %2673 = vrot.lane.b32.xlu0 %v4338_v51, %s4817_s23  ;;  %v1878_v7 = vsel %vm5013_vm5, %v1873_v58, %v1877_v47  ;;  %v1259_v8 = vrot.slane %v1257_v33, 4  ;;  %v1262_v13 = vrot.slane %v1260_v34, 5  ;;  %v408_v5 = vshll.u32 %v309_v45, 16  ;;  %v5197_v47 = vld [vmem:[%s4869_s22 + $0x34] sm:$0xf] }
  0x42   : > { %2353 = vrot.lane.b32.xlu1 %v4274_v40, %s4817_s23  ;;  %v1883_v17 = vrot.slane %v1882_v53, 4  ;;  %v1436_v22 = vsel %vm4927_vm2, %v1434_v26, %v1435_v41  ;;  %v407_v44 = vrot.slane %v405_v2, 4  ;;  %v414_v20 = vshll.u32 %v310_v60, 16  ;;  %7146 = vst [vmem:[#allocation8_spill] sm:$0xff] %v5197_v47 }
  0x43   : > { %v4312_v25 = vcombine.low %v1433_v62, %v1436_v22  ;;  %v410_v23 = vrot.slane %v408_v5, 5  ;;  %v418_v28 = vshrl.u32 %v310_v60, 16  ;;  %v424_v39 = vshll.u32 %v339_v0, 16  ;;  %v4074_v5 = vld [vmem:[%s4869_s22 + $0x24] sm:$0xf] }
  0x44   : > { %v1888_v51 = vsel %vm5013_vm5, %v1883_v17, %v1887_v59  ;;  %v416_v38 = vrot.slane %v414_v20, 5  ;;  %v4056_v27 = vrot.slane %v742_v15, 9  ;;  %v4290_v43 = vcombine.low %v5169_v55, %v5084_v56  ;;  %v4724_v56 = vld [vmem:[%s7081_s1 + $0x38] sm:$0xff]  }
  0x45   : > { %v4354_v40 = vcombine.low %v1878_v7, %v1888_v51  ;;  %2557 = vrot.lane.b32.xlu0 %v4312_v25, %s4819_s5  ;;  %v411_v12 = vor.u32 %v410_v23, %v407_v44  ;;  %v420_v45 = vrot.slane %v418_v28, 4  ;;  %v1263_v49 = vor.u32 %v1262_v13, %v1259_v8  ;;  %4490 = vmatpush3.bf16.msra.mxu0 %v4724_v56  ;;  %v5217_v20 = vld [vmem:[%s4869_s22 + $0x38] sm:$0x1] }
  0x46   : > { %v823_v41 = vrot.slane %v310_v60, 5  ;;  %v826_v58 = vrot.slane %v339_v0, 5  ;;  %v1626_v59 = vshrl.u32 %v5186_v30, 16  ;;  %v426_v53 = vrot.slane %v424_v39, 5  ;;  %4656 = vmatpush3.bf16.msra.mxu1 %v4724_v56  ;;  %7147 = vst [vmem:[#allocation9_spill] sm:$0xff] %v5217_v20 }
  0x47   : > { %2753 = vrot.lane.b32.xlu1 %v4354_v40, %s4818_s24  ;;  %v412_v33 = vrot.slane %v411_v12, 4  ;;  %v421_v34 = vor.u32 %v420_v45, %v416_v38  ;;  %v1629_v62 = vshll.u32 %v5186_v30, 16  ;;  %v1639_v0 = vshrl.u32 %v5197_v47, 16  ;;  %v332_v39 = vld [vmem:[%s4869_s22 + $0xa0] sm:$0xf] }
  0x48   : > { %v824_v55 = vsel %vm4927_vm2, %v4056_v27, %v823_v41  ;;  %v825_v60 = vrot.slane %v823_v41, 4  ;;  %v1628_v26 = vrot.slane %v1626_v59, 4  ;;  %v1017_v44 = vshrl.u32 %v4074_v5, 16  ;;  %v5228_v45 = vld [vmem:[%s4869_s22 + $0xa4] sm:$0x1] }
  0x49   : > { %v417_v7 = vsel %vm5013_vm5, %v412_v33, %v416_v38  ;;  %v422_v8 = vrot.slane %v421_v34, 4  ;;  %v1631_v13 = vrot.slane %v1629_v62, 5  ;;  %v1635_v51 = vshll.u32 %v5197_v47, 16  ;;  %v331_v38 = vld [vmem:[%s4869_s22 + $0x9c] sm:$0xf] }
  0x4a   : > { %v827_v22 = vsel %vm4927_vm2, %v825_v60, %v826_v58  ;;  %v5225_v27 = vrot.slane %v1263_v49, 4  ;;  %v1020_v40 = vshll.u32 %v4074_v5, 16  ;;  %v1641_v12 = vrot.slane %v1639_v0, 4  ;;  %v5234_v33 = vld [vmem:[%s4869_s22 + $0xac] sm:$0xf] }
  0x4b   : > { %2449 = vrot.lane.b32.xlu1 %v4290_v43, %s4818_s24  ;;  %v427_v25 = vsel %vm5013_vm5, %v422_v8, %v426_v53  ;;  %v4264_v23 = vcombine.low %v824_v55, %v827_v22  ;;  %v1632_v28 = vor.u32 %v1631_v13, %v1628_v26  ;;  %v4328_v43 = vcombine.low %v5186_v30, %v5197_v47  ;;  %v5239_v56 = vld [vmem:[%s4869_s22 + $0xb0] sm:$0x1]  ;;  %v4131_v0 = vld [vmem:[%s4869_s22 + $0xa8] sm:$0xe]  ;;  %v5585_v47 = vld [vmem:[%s4869_s22 + $0x54] sm:$0xf] }
  0x4c   : > { %v4248_v57 = vcombine.low %v417_v7, %v427_v25  ;;  %v1637_v58 = vrot.slane %v1635_v51, 5  ;;  %v1645_v59 = vshll.u32 %v5217_v20, 16  ;;  %v4280_v49 = vcombine.low %v4074_v5, %v5145_v31  ;;  %v753_v25 = vld [vmem:[%s4869_s22 + $0x9c] sm:$0xe] }
  0x4d   : > { %v1633_v41 = vrot.slane %v1632_v28, 4  ;;  %v669_v34 = vshrl.u32 %v331_v38, 16  ;;  %v672_v53 = vshll.u32 %v331_v38, 16  ;;  %v678_v62 = vshll.u32 %v332_v39, 16 }
  0x4e   : > { %2253 = vrot.lane.b32.xlu0 %v4248_v57, %s4819_s5  ;;  %v5242_v30 = vrot.slane %v1017_v44, 4  ;;  %v1642_v55 = vor.u32 %v1641_v12, %v1637_v58  ;;  %v1647_v60 = vrot.slane %v1645_v59, 5  ;;  %v682_v26 = vshrl.u32 %v332_v39, 16 }
  0x4f   : > { %2333 = vrot.lane.b32.xlu1 %v4264_v23, %s4817_s23  ;;  %v1022_v7 = vrot.slane %v1020_v40, 5  ;;  %v671_v8 = vrot.slane %v669_v34, 4  ;;  %v674_v13 = vrot.slane %v672_v53, 5  ;;  %v680_v22 = vrot.slane %v678_v62, 5  ;;  %v4176_v40 = vld [vmem:[%s4869_s22 + $0xb4] sm:$0xf] }
  0x50   : > { %v1638_v31 = vsel %vm5013_vm5, %v1633_v41, %v1637_v58  ;;  %v1643_v5 = vrot.slane %v1642_v55, 4  ;;  %v684_v28 = vrot.slane %v682_v26, 4  ;;  %v688_v23 = vshll.u32 %v5228_v45, 16  ;;  %v5257_v34 = vld [vmem:[%s4869_s22 + $0xb8] sm:$0xf] }
  0x51   : > { %v675_v44 = vor.u32 %v674_v13, %v671_v8  ;;  %v4147_v51 = vrot.slane %v4131_v0, 9  ;;  %v1509_v38 = vrot.slane %v5234_v33, 5  ;;  %v1512_v57 = vrot.slane %v5239_v56, 5  ;;  %7148 = vst [vmem:[#allocation10_spill] sm:$0xff] %v5257_v34 }
  0x52   : > { %2653 = vrot.lane.b32.xlu0 %v4328_v43, %s4817_s23  ;;  %v1648_v12 = vsel %vm5013_vm5, %v1643_v5, %v1647_v60  ;;  %v685_v59 = vor.u32 %v684_v28, %v680_v22  ;;  %v690_v41 = vrot.slane %v688_v23, 5  ;;  %v4067_v58 = vrot.slane %v753_v25, 9  ;;  %v5273_v23 = vld [vmem:[%s4869_s22 + $0xbc] sm:$0x1] }
  0x53   : > { %2429 = vrot.lane.b32.xlu1 %v4280_v49, %s4818_s24  ;;  %v4344_v53 = vcombine.low %v1638_v31, %v1648_v12  ;;  %v676_v62 = vrot.slane %v675_v44, 4  ;;  %v1510_v43 = vsel %vm4927_vm2, %v4147_v51, %v1509_v38  ;;  %v1511_v55 = vrot.slane %v1509_v38, 4  ;;  %7149 = vst [vmem:[#allocation11_spill] sm:$0xff] %v5273_v23  ;;  %v4121_v12 = vld [vmem:[%s4869_s22 + $0x30] sm:$0xe] }
  0x54   : > { %v686_v26 = vrot.slane %v685_v59, 4  ;;  %v900_v0 = vrot.slane %v332_v39, 5  ;;  %v903_v8 = vrot.slane %v5228_v45, 5  ;;  %v1890_v49 = vshrl.u32 %v4176_v40, 16 }
  0x55   : > { %v681_v60 = vsel %vm5013_vm5, %v676_v62, %v680_v22  ;;  %v1513_v13 = vsel %vm4927_vm2, %v1511_v55, %v1512_v57  ;;  %v1893_v25 = vshll.u32 %v4176_v40, 16  ;;  %v1903_v31 = vshrl.u32 %v5257_v34, 16  ;;  %v5277_v57 = vld [vmem:[%s4869_s22 + $0x34] sm:$0xf]  ;;  %v5285_v62 = vld [vmem:[%s4869_s22 + $0x38] sm:$0x1] }
  0x56   : > { %2733 = vrot.lane.b32.xlu0 %v4344_v53, %s4818_s24  ;;  %v691_v39 = vsel %vm5013_vm5, %v686_v26, %v690_v41  ;;  %v4323_v5 = vcombine.low %v1510_v43, %v1513_v13  ;;  %v901_v45 = vsel %vm4927_vm2, %v4067_v58, %v900_v0  ;;  %v902_v28 = vrot.slane %v900_v0, 4 }
  0x57   : > { %v1023_v44 = vor.u32 %v1022_v7, %v5242_v30  ;;  %v4259_v22 = vcombine.low %v681_v60, %v691_v39  ;;  %v1892_v51 = vrot.slane %v1890_v49, 4  ;;  %v1895_v38 = vrot.slane %v1893_v25, 5  ;;  %v311_v60 = vld [vmem:[%s4869_s22 + $0x24] sm:$0xf] }
  0x58   : > { %v904_v41 = vsel %vm4927_vm2, %v902_v28, %v903_v8  ;;  %v1899_v53 = vshll.u32 %v5257_v34, 16  ;;  %v1905_v58 = vrot.slane %v1903_v31, 4  ;;  %v4339_v7 = vcombine.low %v4176_v40, %v5257_v34 }
  0x59   : > { %2275 = vrot.lane.b32.xlu1 %v4259_v22, %s4819_s5  ;;  %v4275_v30 = vcombine.low %v901_v45, %v904_v41  ;;  %v1896_v43 = vor.u32 %v1895_v38, %v1892_v51  ;;  %v1909_v55 = vshll.u32 %v5273_v23, 16  ;;  %v4137_v8 = vrot.slane %v4121_v12, 9  ;;  %v4096_v22 = vld [vmem:[%s4869_s22 + $0xa8] sm:$0xf]  ;;  %v340_v41 = vld [vmem:[%s4869_s22 + $0x2c] sm:$0x1] }
  0x5a   : > { %2579 = vrot.lane.b32.xlu0 %v4323_v5, %s4819_s5  ;;  %v1901_v0 = vrot.slane %v1899_v53, 5  ;;  %v1439_v49 = vrot.slane %v5277_v57, 5  ;;  %v5294_v13 = vrot.slane %v1023_v44, 4  ;;  %v1442_v40 = vrot.slane %v5285_v62, 5  ;;  %v312_v51 = vld [vmem:[%s4869_s22 + $0x28] sm:$0xf] }
  0x5b   : > { %v1897_v31 = vrot.slane %v1896_v43, 4  ;;  %v1911_v5 = vrot.slane %v1909_v55, 5  ;;  %v1281_v12 = vshrl.u32 %v4096_v22, 16  ;;  %v429_v53 = vshrl.u32 %v311_v60, 16 }
  0x5c   : > { %v1906_v39 = vor.u32 %v1905_v58, %v1901_v0  ;;  %v1440_v45 = vsel %vm4927_vm2, %v4137_v8, %v1439_v49  ;;  %v1441_v28 = vrot.slane %v1439_v49, 4  ;;  %v432_v8 = vshll.u32 %v311_v60, 16  ;;  %v743_v49 = vld [vmem:[%s4869_s22 + $0x24] sm:$0xe] }
  0x5d   : > { %2355 = vrot.lane.b32.xlu1 %v4275_v30, %s4817_s23  ;;  %v1902_v58 = vsel %vm5013_vm5, %v1897_v31, %v1901_v0  ;;  %v431_v15 = vrot.slane %v429_v53, 4  ;;  %v438_v38 = vshll.u32 %v312_v51, 16  ;;  %v1284_v2 = vshll.u32 %v4096_v22, 16 }
  0x5e   : > { %2675 = vrot.lane.b32.xlu0 %v4339_v7, %s4817_s23  ;;  %v1907_v43 = vrot.slane %v1906_v39, 4  ;;  %v1443_v55 = vsel %vm4927_vm2, %v1441_v28, %v1442_v40  ;;  %v442_v7 = vshrl.u32 %v312_v51, 16  ;;  %v434_v26 = vrot.slane %v432_v8, 5 }
  0x5f   : > { %v4313_v30 = vcombine.low %v1440_v45, %v1443_v55  ;;  %v448_v59 = vshll.u32 %v340_v41, 16  ;;  %v440_v31 = vrot.slane %v438_v38, 5  ;;  %v4057_v60 = vrot.slane %v743_v49, 9  ;;  %v5320_v55 = vld [vmem:[%s4869_s22 + $0x40] sm:$0xf] }
  0x60   : > { %v1912_v44 = vsel %vm5013_vm5, %v1907_v43, %v1911_v5  ;;  %v444_v40 = vrot.slane %v442_v7, 4  ;;  %v4291_v39 = vcombine.low %v4096_v22, %v5234_v33  ;;  %v435_v45 = vor.u32 %v434_v26, %v431_v15  ;;  %7150 = vst [vmem:[#allocation12_spill] sm:$0xff] %v5320_v55  ;;  %v5365_v38 = vld [vmem:[%s4869_s22 + $0xbc] sm:$0x1] }
  0x61   : > { %v4355_v0 = vcombine.low %v1902_v58, %v1912_v44  ;;  %v450_v28 = vrot.slane %v448_v59, 5  ;;  %v830_v53 = vrot.slane %v312_v51, 5  ;;  %v833_v43 = vrot.slane %v340_v41, 5  ;;  %v4076_v41 = vld [vmem:[%s4869_s22 + $0x30] sm:$0xf] }
  0x62   : > { %2559 = vrot.lane.b32.xlu0 %v4313_v30, %s4819_s5  ;;  %v445_v5 = vor.u32 %v444_v40, %v440_v31  ;;  %v1650_v44 = vshrl.u32 %v5315_v3, 16  ;;  %v1653_v58 = vshll.u32 %v5315_v3, 16  ;;  %v436_v8 = vrot.slane %v435_v45, 4  ;;  %v5337_v40 = vld [vmem:[%s4869_s22 + $0x44] sm:$0x1] }
  0x63   : > { %2755 = vrot.lane.b32.xlu1 %v4355_v0, %s4818_s24  ;;  %v831_v15 = vsel %vm4927_vm2, %v4057_v60, %v830_v53  ;;  %v832_v33 = vrot.slane %v830_v53, 4  ;;  %v1663_v51 = vshrl.u32 %v5320_v55, 16  ;;  %v5330_v49 = vrot.slane %v1281_v12, 4  ;;  %7151 = vst [vmem:[#allocation13_spill] sm:$0xff] %v5337_v40 }
  0x64   : > { %v446_v59 = vrot.slane %v445_v5, 4  ;;  %v1652_v26 = vrot.slane %v1650_v44, 4  ;;  %v1655_v22 = vrot.slane %v1653_v58, 5  ;;  %v441_v30 = vsel %vm5013_vm5, %v436_v8, %v440_v31  ;;  %v333_v5 = vld [vmem:[%s4869_s22 + $0xa8] sm:$0xf] }
  0x65   : > { %v834_v7 = vsel %vm4927_vm2, %v832_v33, %v833_v43  ;;  %v1041_v0 = vshrl.u32 %v4076_v41, 16  ;;  %v5339_v60 = vrot.slane %v1284_v2, 5  ;;  %v1044_v12 = vshll.u32 %v4076_v41, 16  ;;  %v334_v44 = vld [vmem:[%s4869_s22 + $0xac] sm:$0xf] }
  0x66   : > { %v451_v45 = vsel %vm5013_vm5, %v446_v59, %v450_v28  ;;  %v4265_v53 = vcombine.low %v831_v15, %v834_v7  ;;  %v4329_v31 = vcombine.low %v5315_v3, %v5320_v55  ;;  %v1656_v43 = vor.u32 %v1655_v22, %v1652_v26  ;;  %v351_v33 = vld [vmem:[%s4869_s22 + $0xb0] sm:$0x1]  ;;  %v5357_v3 = vld [vmem:[%s4869_s22 + $0xb8] sm:$0xf] }
  0x67   : > { %2451 = vrot.lane.b32.xlu1 %v4291_v39, %s4818_s24  ;;  %v4249_v58 = vcombine.low %v441_v30, %v451_v45  ;;  %v1659_v8 = vshll.u32 %v5320_v55, 16  ;;  %v5350_v2 = vrot.slane %v1041_v0, 4  ;;  %v5352_v39 = vrot.slane %v1044_v12, 5  ;;  %v4132_v45 = vld [vmem:[%s4869_s22 + $0xb4] sm:$0xe] }
  0x68   : > { %v1665_v63 = vrot.slane %v1663_v51, 4  ;;  %v1669_v28 = vshll.u32 %v5337_v40, 16  ;;  %v1657_v15 = vrot.slane %v1656_v43, 4  ;;  %v693_v30 = vshrl.u32 %v333_v5, 16  ;;  %v745_v40 = vld [vmem:[%s4869_s22 + $0x3c] sm:$0xe] }
  0x69   : > { %2255 = vrot.lane.b32.xlu0 %v4249_v58, %s4819_s5  ;;  %v1661_v59 = vrot.slane %v1659_v8, 5  ;;  %v696_v7 = vshll.u32 %v333_v5, 16  ;;  %v1287_v26 = vor.u32 %v5339_v60, %v5330_v49  ;;  %v4281_v22 = vcombine.low %v4076_v41, %v5277_v57  ;;  %v754_v60 = vld [vmem:[%s4869_s22 + $0xa8] sm:$0xe] }
  0x6a   : > { %v702_v51 = vshll.u32 %v334_v44, 16  ;;  %v706_v0 = vshrl.u32 %v334_v44, 16  ;;  %v1671_v58 = vrot.slane %v1669_v28, 5  ;;  %v695_v43 = vrot.slane %v693_v30, 4  ;;  %v5374_v28 = vld [vmem:[%s4869_s22 + $0xc0] sm:$0xf] }
  0x6b   : > { %2335 = vrot.lane.b32.xlu1 %v4265_v53, %s4817_s23  ;;  %v1666_v12 = vor.u32 %v1665_v63, %v1661_v59  ;;  %v698_v8 = vrot.slane %v696_v7, 5  ;;  %v1047_v5 = vor.u32 %v5352_v39, %v5350_v2  ;;  %v712_v49 = vshll.u32 %v351_v33, 16 }
  0x6c   : > { %v704_v25 = vrot.slane %v702_v51, 5  ;;  %v708_v17 = vrot.slane %v706_v0, 4  ;;  %v1662_v57 = vsel %vm5013_vm5, %v1657_v15, %v1661_v59  ;;  %v4148_v63 = vrot.slane %v4132_v45, 9 }
  0x6d   : > { %2655 = vrot.lane.b32.xlu0 %v4329_v31, %s4817_s23  ;;  %v1667_v41 = vrot.slane %v1666_v12, 4  ;;  %v699_v53 = vor.u32 %v698_v8, %v695_v43  ;;  %v714_v7 = vrot.slane %v712_v49, 5  ;;  %v1516_v2 = vrot.slane %v5357_v3, 5 }
  0x6e   : > { %v709_v30 = vor.u32 %v708_v17, %v704_v25  ;;  %v1519_v39 = vrot.slane %v5365_v38, 5  ;;  %v4068_v15 = vrot.slane %v754_v60, 9  ;;  %v907_v59 = vrot.slane %v334_v44, 5  ;;  %v5384_v17 = vld [vmem:[%s4869_s22 + $0xc4] sm:$0xf] }
  0x6f   : > { %2431 = vrot.lane.b32.xlu1 %v4281_v22, %s4818_s24  ;;  %v1672_v31 = vsel %vm5013_vm5, %v1667_v41, %v1671_v58  ;;  %v700_v51 = vrot.slane %v699_v53, 4  ;;  %v1517_v12 = vsel %vm4927_vm2, %v4148_v63, %v1516_v2  ;;  %v1518_v22 = vrot.slane %v1516_v2, 4  ;;  %7152 = vst [vmem:[#allocation14_spill] sm:$0xff] %v5384_v17  ;;  %v5391_v60 = vld [vmem:[%s4869_s22 + $0xc8] sm:$0x1] }
  0x70   : > { %v4345_v0 = vcombine.low %v1662_v57, %v1672_v31  ;;  %v710_v45 = vrot.slane %v709_v30, 4  ;;  %v908_v8 = vsel %vm4927_vm2, %v4068_v15, %v907_v59  ;;  %v909_v58 = vrot.slane %v907_v59, 4  ;;  %7153 = vst [vmem:[#allocation15_spill] sm:$0xff] %v5391_v60  ;;  %v5401_v53 = vld [vmem:[%s4869_s22 + $0x40] sm:$0xf] }
  0x71   : > { %v705_v43 = vsel %vm5013_vm5, %v700_v51, %v704_v25  ;;  %v910_v49 = vrot.slane %v351_v33, 5  ;;  %v1520_v57 = vsel %vm4927_vm2, %v1518_v22, %v1519_v39  ;;  %v1914_v41 = vshrl.u32 %v5374_v28, 16  ;;  %v4122_v31 = vld [vmem:[%s4869_s22 + $0x3c] sm:$0xe]  ;;  %v5411_v59 = vld [vmem:[%s4869_s22 + $0x44] sm:$0x1] }
  0x72   : > { %2735 = vrot.lane.b32.xlu0 %v4345_v0, %s4818_s24  ;;  %v715_v44 = vsel %vm5013_vm5, %v710_v45, %v714_v7  ;;  %v1917_v25 = vshll.u32 %v5374_v28, 16  ;;  %v4324_v30 = vcombine.low %v1517_v12, %v1520_v57  ;;  %v1927_v2 = vshrl.u32 %v5384_v17, 16  ;;  %v314_v7 = vld [vmem:[%s4869_s22 + $0x34] sm:$0xf] }
  0x73   : > { %v4260_v63 = vcombine.low %v705_v43, %v715_v44  ;;  %v911_v33 = vsel %vm4927_vm2, %v909_v58, %v910_v49  ;;  %v5407_v51 = vrot.slane %v1287_v26, 4  ;;  %v1916_v39 = vrot.slane %v1914_v41, 4  ;;  %v313_v44 = vld [vmem:[%s4869_s22 + $0x30] sm:$0xf] }
  0x74   : > { %v1919_v15 = vrot.slane %v1917_v25, 5  ;;  %v4276_v0 = vcombine.low %v908_v8, %v911_v33  ;;  %v1923_v45 = vshll.u32 %v5384_v17, 16  ;;  %v1929_v12 = vrot.slane %v1927_v2, 4 }
  0x75   : > { %2277 = vrot.lane.b32.xlu1 %v4260_v63, %s4819_s5  ;;  %v1933_v22 = vshll.u32 %v5391_v60, 16  ;;  %v4340_v26 = vcombine.low %v5374_v28, %v5384_v17  ;;  %v4138_v49 = vrot.slane %v4122_v31, 9  ;;  %v5421_v57 = vrot.slane %v1047_v5, 4  ;;  %v4098_v63 = vld [vmem:[%s4869_s22 + $0xb4] sm:$0xf] }
  0x76   : > { %2581 = vrot.lane.b32.xlu0 %v4324_v30, %s4819_s5  ;;  %v1920_v58 = vor.u32 %v1919_v15, %v1916_v39  ;;  %v1925_v8 = vrot.slane %v1923_v45, 5  ;;  %v1446_v41 = vrot.slane %v5401_v53, 5  ;;  %v1449_v25 = vrot.slane %v5411_v59, 5  ;;  %v341_v39 = vld [vmem:[%s4869_s22 + $0x38] sm:$0x1] }
  0x77   : > { %v1935_v2 = vrot.slane %v1933_v22, 5  ;;  %v1305_v43 = vshrl.u32 %v4098_v63, 16  ;;  %v1308_v30 = vshll.u32 %v4098_v63, 16  ;;  %v453_v15 = vshrl.u32 %v313_v44, 16 }
  0x78   : > { %v1921_v33 = vrot.slane %v1920_v58, 4  ;;  %v1930_v28 = vor.u32 %v1929_v12, %v1925_v8  ;;  %v1447_v31 = vsel %vm4927_vm2, %v4138_v49, %v1446_v41  ;;  %v1448_v5 = vrot.slane %v1446_v41, 4 }
  0x79   : > { %2357 = vrot.lane.b32.xlu1 %v4276_v0, %s4817_s23  ;;  %v1307_v58 = vrot.slane %v1305_v43, 4  ;;  %v1310_v22 = vrot.slane %v1308_v30, 5  ;;  %v456_v61 = vshll.u32 %v313_v44, 16  ;;  %v455_v12 = vrot.slane %v453_v15, 4  ;;  %v5446_v15 = vld [vmem:[%s4869_s22 + $0x4c] sm:$0xf] }
  0x7a   : > { %2677 = vrot.lane.b32.xlu0 %v4340_v26, %s4817_s23  ;;  %v1926_v45 = vsel %vm5013_vm5, %v1921_v33, %v1925_v8  ;;  %v1931_v36 = vrot.slane %v1930_v28, 4  ;;  %v1450_v0 = vsel %vm4927_vm2, %v1448_v5, %v1449_v25  ;;  %v462_v49 = vshll.u32 %v314_v7, 16  ;;  %v5439_v26 = vld [vmem:[%s4869_s22 + $0x48] sm:$0xf]  ;;  %7154 = vst [vmem:[#allocation16_spill] sm:$0xff] %v5446_v15 }
  0x7b   : > { %v4314_v52 = vcombine.low %v1447_v31, %v1450_v0  ;;  %v458_v21 = vrot.slane %v456_v61, 5  ;;  %v466_v14 = vshrl.u32 %v314_v7, 16  ;;  %v472_v44 = vshll.u32 %v341_v39, 16 }
  0x7c   : > { %v1936_v43 = vsel %vm5013_vm5, %v1931_v36, %v1935_v2  ;;  %v464_v8 = vrot.slane %v462_v49, 5  ;;  %v4058_v33 = vrot.slane %v744_v48, 9  ;;  %v4292_v25 = vcombine.low %v4098_v63, %v5357_v3 }
  0x7d   : > { %v4356_v30 = vcombine.low %v1926_v45, %v1936_v43  ;;  %v459_v28 = vor.u32 %v458_v21, %v455_v12  ;;  %v468_v5 = vrot.slane %v466_v14, 4  ;;  %v1311_v31 = vor.u32 %v1310_v22, %v1307_v58  ;;  %v4078_v22 = vld [vmem:[%s4869_s22 + $0x3c] sm:$0xf]  ;;  %v4133_v12 = vld [vmem:[%s4869_s22 + $0xc0] sm:$0xe] }
  0x7e   : > { %2561 = vrot.lane.b32.xlu0 %v4314_v52, %s4819_s5  ;;  %v837_v61 = vrot.slane %v314_v7, 5  ;;  %v840_v0 = vrot.slane %v341_v39, 5  ;;  %v1674_v41 = vshrl.u32 %v5439_v26, 16  ;;  %v474_v48 = vrot.slane %v472_v44, 5  ;;  %v5463_v44 = vld [vmem:[%s4869_s22 + $0x50] sm:$0x1] }
  0x7f   : > { %2757 = vrot.lane.b32.xlu1 %v4356_v30, %s4818_s24  ;;  %v460_v36 = vrot.slane %v459_v28, 4  ;;  %v469_v2 = vor.u32 %v468_v5, %v464_v8  ;;  %v1677_v52 = vshll.u32 %v5439_v26, 16  ;;  %v1687_v63 = vshrl.u32 %v5446_v15, 16  ;;  %7155 = vst [vmem:[#allocation17_spill] sm:$0xff] %v5463_v44  ;;  %v335_v5 = vld [vmem:[%s4869_s22 + $0xb4] sm:$0xf] }
  0x80   : > { %v838_v21 = vsel %vm4927_vm2, %v4058_v33, %v837_v61  ;;  %v839_v14 = vrot.slane %v837_v61, 4  ;;  %v1676_v3 = vrot.slane %v1674_v41, 4  ;;  %v1065_v43 = vshrl.u32 %v4078_v22, 16  ;;  %v5471_v61 = vld [vmem:[%s4869_s22 + $0xb8] sm:$0xf] }
  0x81   : > { %v465_v39 = vsel %vm5013_vm5, %v460_v36, %v464_v8  ;;  %v470_v45 = vrot.slane %v469_v2, 4  ;;  %v1679_v58 = vrot.slane %v1677_v52, 5  ;;  %v1683_v28 = vshll.u32 %v5446_v15, 16 }
  0x82   : > { %v841_v41 = vsel %vm4927_vm2, %v839_v14, %v840_v0  ;;  %v5473_v36 = vrot.slane %v1311_v31, 4  ;;  %v1068_v2 = vshll.u32 %v4078_v22, 16  ;;  %v1689_v52 = vrot.slane %v1687_v63, 4  ;;  %v5476_v14 = vld [vmem:[%s4869_s22 + $0xbc] sm:$0x1] }
  0x83   : > { %2453 = vrot.lane.b32.xlu1 %v4292_v25, %s4818_s24  ;;  %v475_v8 = vsel %vm5013_vm5, %v470_v45, %v474_v48  ;;  %v4266_v33 = vcombine.low %v838_v21, %v841_v41  ;;  %v1680_v30 = vor.u32 %v1679_v58, %v1676_v3  ;;  %v4330_v25 = vcombine.low %v5439_v26, %v5446_v15  ;;  %v5482_v45 = vld [vmem:[%s4869_s22 + $0xc4] sm:$0xf]  ;;  %v5488_v41 = vld [vmem:[%s4869_s22 + $0xc8] sm:$0x1] }
  0x84   : > { %v4250_v0 = vcombine.low %v465_v39, %v475_v8  ;;  %v1685_v21 = vrot.slane %v1683_v28, 5  ;;  %v1693_v3 = vshll.u32 %v5463_v44, 16  ;;  %v4282_v31 = vcombine.low %v4078_v22, %v5401_v53  ;;  %7156 = vst [vmem:[#allocation18_spill] sm:$0xff] %v5488_v41 }
  0x85   : > { %v1681_v48 = vrot.slane %v1680_v30, 4  ;;  %v717_v39 = vshrl.u32 %v335_v5, 16  ;;  %v720_v58 = vshll.u32 %v335_v5, 16  ;;  %v726_v63 = vshll.u32 %v5471_v61, 16  ;;  %v755_v5 = vld [vmem:[%s4869_s22 + $0xb4] sm:$0xe] }
  0x86   : > { %2257 = vrot.lane.b32.xlu0 %v4250_v0, %s4819_s5  ;;  %v5491_v26 = vrot.slane %v1065_v43, 4  ;;  %v1690_v8 = vor.u32 %v1689_v52, %v1685_v21  ;;  %v1695_v30 = vrot.slane %v1693_v3, 5  ;;  %v730_v28 = vshrl.u32 %v5471_v61, 16 }
  0x87   : > { %2337 = vrot.lane.b32.xlu1 %v4266_v33, %s4817_s23  ;;  %v5495_v0 = vrot.slane %v1068_v2, 5  ;;  %v719_v7 = vrot.slane %v717_v39, 4  ;;  %v722_v53 = vrot.slane %v720_v58, 5  ;;  %v728_v22 = vrot.slane %v726_v63, 5  ;;  %v5507_v58 = vld [vmem:[%s4869_s22 + $0xcc] sm:$0xf] }
  0x88   : > { %v1686_v49 = vsel %vm5013_vm5, %v1681_v48, %v1685_v21  ;;  %v1691_v60 = vrot.slane %v1690_v8, 4  ;;  %v732_v33 = vrot.slane %v730_v28, 4  ;;  %v736_v43 = vshll.u32 %v5476_v14, 16  ;;  %v5513_v28 = vld [vmem:[%s4869_s22 + $0xd0] sm:$0xf] }
  0x89   : > { %v5501_v52 = vpop.permute.xlu1 %2649  ;;  %v723_v3 = vor.u32 %v722_v53, %v719_v7  ;;  %v4149_v17 = vrot.slane %v4133_v12, 9  ;;  %v1523_v2 = vrot.slane %v5482_v45, 5  ;;  %v1526_v39 = vrot.slane %v5488_v41, 5  ;;  %7157 = vst [vmem:[#allocation19_spill] sm:$0xff] %v5513_v28 }
  0x8a   : > { %2657 = vrot.lane.b32.xlu0 %v4330_v25, %s4817_s23  ;;  %v1696_v48 = vsel %vm5013_vm5, %v1691_v60, %v1695_v30  ;;  %v733_v21 = vor.u32 %v732_v33, %v728_v22  ;;  %v738_v63 = vrot.slane %v736_v43, 5  ;;  %v4069_v8 = vrot.slane %v755_v5, 9 }
  0x8b   : > { %2433 = vrot.lane.b32.xlu1 %v4282_v31, %s4818_s24  ;;  %v4346_v7 = vcombine.low %v1686_v49, %v1696_v48  ;;  %v724_v12 = vrot.slane %v723_v3, 4  ;;  %v1524_v25 = vsel %vm4927_vm2, %v4149_v17, %v1523_v2  ;;  %v1525_v53 = vrot.slane %v1523_v2, 4  ;;  %v5534_v2 = vld [vmem:[%s4869_s22 + $0xd4] sm:$0x1]  ;;  %v5537_v48 = vld [vmem:[%s4869_s22 + $0x4c] sm:$0xf] }
  0x8c   : > { %v5515_v23 = vpop.permute.xlu0 %2651  ;;  %v734_v18 = vrot.slane %v733_v21, 4  ;;  %v914_v31 = vrot.slane %v5471_v61, 5  ;;  %v917_v60 = vrot.slane %v5476_v14, 5  ;;  %v1938_v30 = vshrl.u32 %v5507_v58, 16  ;;  %7158 = vst [vmem:[#allocation20_spill] sm:$0xff] %v5534_v2 }
  0x8d   : > { %v729_v49 = vsel %vm5013_vm5, %v724_v12, %v728_v22  ;;  %v1527_v5 = vsel %vm4927_vm2, %v1525_v53, %v1526_v39  ;;  %v1941_v17 = vshll.u32 %v5507_v58, 16  ;;  %v1951_v33 = vshrl.u32 %v5513_v28, 16  ;;  %v5539_v22 = vpop.permute.xlu1 %2425  ;;  %v4123_v53 = vld [vmem:[%s4869_s22 + $0x48] sm:$0xe]  ;;  %v315_v39 = vld [vmem:[%s4869_s22 + $0x3c] sm:$0xf] }
  0x8e   : > { %2737 = vrot.lane.b32.xlu0 %v4346_v7, %s4818_s24  ;;  %v739_v61 = vsel %vm5013_vm5, %v734_v18, %v738_v63  ;;  %v4325_v14 = vcombine.low %v1524_v25, %v1527_v5  ;;  %v915_v43 = vsel %vm4927_vm2, %v4069_v8, %v914_v31  ;;  %v916_v3 = vrot.slane %v914_v31, 4  ;;  %v5549_v31 = vld [vmem:[%s4869_s22 + $0x50] sm:$0x1] }
  0x8f   : > { %v4261_v21 = vcombine.low %v729_v49, %v739_v61  ;;  %v1940_v7 = vrot.slane %v1938_v30, 4  ;;  %v1943_v12 = vrot.slane %v1941_v17, 5  ;;  %v1071_v18 = vor.u32 %v5495_v0, %v5491_v26  ;;  %7159 = vst [vmem:[#allocation21_spill] sm:$0xff] %v5549_v31 }
  0x90   : > { %v918_v63 = vsel %vm4927_vm2, %v916_v3, %v917_v60  ;;  %v1947_v8 = vshll.u32 %v5513_v28, 16  ;;  %v1953_v25 = vrot.slane %v1951_v33, 4  ;;  %v4341_v49 = vcombine.low %v5507_v58, %v5513_v28  ;;  %v5559_v60 = vld [vmem:[%s4869_s22 + $0xc0] sm:$0xf] }
  0x91   : > { %2279 = vrot.lane.b32.xlu1 %v4261_v21, %s4819_s5  ;;  %v4277_v30 = vcombine.low %v915_v43, %v918_v63  ;;  %v1944_v26 = vor.u32 %v1943_v12, %v1940_v7  ;;  %v1957_v0 = vshll.u32 %v5534_v2, 16  ;;  %v4139_v61 = vrot.slane %v4123_v53, 9 }
  0x92   : > { %2583 = vrot.lane.b32.xlu0 %v4325_v14, %s4819_s5  ;;  %v1949_v33 = vrot.slane %v1947_v8, 5  ;;  %v1453_v3 = vrot.slane %v5537_v48, 5  ;;  %v1456_v43 = vrot.slane %v5549_v31, 5  ;;  %v1329_v58 = vshrl.u32 %v5559_v60, 16  ;;  %v316_v8 = vld [vmem:[%s4869_s22 + $0x40] sm:$0xf] }
  0x93   : > { %v1945_v21 = vrot.slane %v1944_v26, 4  ;;  %v1959_v14 = vrot.slane %v1957_v0, 5  ;;  %v1332_v17 = vshll.u32 %v5559_v60, 16  ;;  %v5572_v34 = vrot.slane %v1071_v18, 4  ;;  %v342_v0 = vld [vmem:[%s4869_s22 + $0x44] sm:$0x1] }
  0x94   : > { %v1954_v7 = vor.u32 %v1953_v25, %v1949_v33  ;;  %v1454_v12 = vsel %vm4927_vm2, %v4139_v61, %v1453_v3  ;;  %v1455_v63 = vrot.slane %v1453_v3, 4  ;;  %v1331_v26 = vrot.slane %v1329_v58, 4 }
  0x95   : > { %v5551_v5 = vpop.permute.xlu0 %2553  ;;  %2359 = vrot.lane.b32.xlu1 %v4277_v30, %s4817_s23  ;;  %v1950_v25 = vsel %vm5013_vm5, %v1945_v21, %v1949_v33  ;;  %v477_v61 = vshrl.u32 %v315_v39, 16  ;;  %v1334_v44 = vrot.slane %v1332_v17, 5  ;;  %v480_v15 = vshll.u32 %v315_v39, 16 }
  0x96   : > { %v5570_v53 = vpop.permute.xlu1 %2329  ;;  %2679 = vrot.lane.b32.xlu0 %v4341_v49, %s4817_s23  ;;  %v1955_v54 = vrot.slane %v1954_v7, 4  ;;  %v1457_v3 = vsel %vm4927_vm2, %v1455_v63, %v1456_v43  ;;  %v486_v20 = vshll.u32 %v316_v8, 16  ;;  %v490_v49 = vshrl.u32 %v316_v8, 16 }
  0x97   : > { %v4315_v55 = vcombine.low %v1454_v12, %v1457_v3  ;;  %v479_v30 = vrot.slane %v477_v61, 4  ;;  %v7160_v33 = vrot.slane %v4880_v6, 5  ;;  %v7161_v21 = vrot.slane %v4884_v10, 9 }
  0x98   : > { %v1960_v39 = vsel %vm5013_vm5, %v1955_v54, %v1959_v14  ;;  %v482_v17 = vrot.slane %v480_v15, 5  ;;  %v496_v43 = vshll.u32 %v342_v0, 16  ;;  %v488_v12 = vrot.slane %v486_v20, 5 }
  0x99   : > { %v5582_v18 = vpop.permute.xlu0 %2555  ;;  %v5593_v58 = vsel %vm4927_vm2, %v7161_v21, %v7160_v33  ;;  %v4357_v7 = vcombine.low %v1950_v25, %v1960_v39  ;;  %v492_v63 = vrot.slane %v490_v49, 4  ;;  %v4059_v61 = vrot.slane %v745_v40, 9  ;;  %v5651_v39 = vld [vmem:[%s4869_s22 + $0x50] sm:$0x1] }
  0x9a   : > { %7162 = vst [vmem:[#allocation22_spill] sm:$0xff] %v5593_v58  ;;  %2563 = vrot.lane.b32.xlu0 %v4315_v55, %s4819_s5  ;;  %v4293_v6 = vcombine.low %v5559_v60, %v5482_v45  ;;  %v483_v3 = vor.u32 %v482_v17, %v479_v30  ;;  %v498_v10 = vrot.slane %v496_v43, 5  ;;  %v844_v19 = vrot.slane %v316_v8, 5  ;;  %v5603_v33 = vpop.permute.xlu1 %2331 }
  0x9b   : > { %2759 = vrot.lane.b32.xlu1 %v4357_v7, %s4818_s24  ;;  %v493_v54 = vor.u32 %v492_v63, %v488_v12  ;;  %v847_v15 = vrot.slane %v342_v0, 5  ;;  %v1698_v55 = vshrl.u32 %v5585_v47, 16  ;;  %v1701_v20 = vshll.u32 %v5585_v47, 16 }
  0x9c   : > { %v1335_v40 = vor.u32 %v1334_v44, %v1331_v26  ;;  %v484_v14 = vrot.slane %v483_v3, 4  ;;  %v845_v45 = vsel %vm4927_vm2, %v4059_v61, %v844_v19  ;;  %v846_v60 = vrot.slane %v844_v19, 4  ;;  %v5620_v19 = vld [vmem:[%s4869_s22 + $0x5c] sm:$0x1] }
  0x9d   : > { %v494_v25 = vrot.slane %v493_v54, 4  ;;  %v1700_v30 = vrot.slane %v1698_v55, 4  ;;  %v1703_v49 = vrot.slane %v1701_v20, 5  ;;  %v1711_v21 = vshrl.u32 %v5601_v1, 16  ;;  %7164 = vst [vmem:[#allocation24_spill] sm:$0xff] %v5620_v19 }
  0x9e   : > { %v489_v44 = vsel %vm5013_vm5, %v484_v14, %v488_v12  ;;  %v848_v26 = vsel %vm4927_vm2, %v846_v60, %v847_v15  ;;  %v5627_v61 = vrot.slane %v1335_v40, 4  ;;  %v4080_v12 = vld [vmem:[%s4869_s22 + $0x48] sm:$0xf]  ;;  %v1707_v15 = vshll.u32 %v5601_v1, 16 }
  0x9f   : > { %2455 = vrot.lane.b32.xlu1 %v4293_v6, %s4818_s24  ;;  %v499_v7 = vsel %vm5013_vm5, %v494_v25, %v498_v10  ;;  %v4267_v63 = vcombine.low %v845_v45, %v848_v26  ;;  %v1704_v54 = vor.u32 %v1703_v49, %v1700_v30  ;;  %v317_v55 = vld [vmem:[%s4869_s22 + $0x48] sm:$0xf]  ;;  %v4331_v6 = vcombine.low %v5585_v47, %v5601_v1  ;;  %v5641_v45 = vld [vmem:[%s4869_s22 + $0x4c] sm:$0xf] }
  0xa0   : > { %7165 = vst [vmem:[#allocation25_spill] sm:$0xff] %v5627_v61  ;;  %v4251_v3 = vcombine.low %v489_v44, %v499_v7  ;;  %v1713_v10 = vrot.slane %v1711_v21, 4  ;;  %v1717_v40 = vshll.u32 %v5620_v19, 16  ;;  %v1089_v25 = vshrl.u32 %v4080_v12, 16 }
  0xa1   : > { %v5610_v8 = vpop.permute.xlu0 %2249  ;;  %v1092_v30 = vshll.u32 %v4080_v12, 16  ;;  %v1705_v49 = vrot.slane %v1704_v54, 4  ;;  %v1709_v44 = vrot.slane %v1707_v15, 5  ;;  %v4283_v26 = vcombine.low %v4080_v12, %v5537_v48  ;;  %v4124_v15 = vld [vmem:[%s4869_s22 + $0x54] sm:$0xe] }
  0xa2   : > { %2259 = vrot.lane.b32.xlu0 %v4251_v3, %s4819_s5  ;;  %v7166_v7 = vshll.u32 %v4912_v29, 16  ;;  %v7167_v21 = vshll.u32 %v4902_v24, 16  ;;  %v501_v60 = vshrl.u32 %v317_v55, 16  ;;  %v1719_v3 = vrot.slane %v1717_v40, 5  ;;  %v5662_v12 = vld [vmem:[%s4869_s22 + $0x58] sm:$0xf] }
  0xa3   : > { %2339 = vrot.lane.b32.xlu1 %v4267_v63, %s4817_s23  ;;  %v1714_v43 = vor.u32 %v1713_v10, %v1709_v44  ;;  %v504_v0 = vshll.u32 %v317_v55, 16  ;;  %v510_v54 = vshll.u32 %v5641_v45, 16  ;;  %v1710_v63 = vsel %vm5013_vm5, %v1705_v49, %v1709_v44  ;;  %v5671_v44 = vld [vmem:[%s4869_s22 + $0x5c] sm:$0x1] }
  0xa4   : > { %v990_v47 = vrot.slane %v7166_v7, 5  ;;  %v980_v17 = vrot.slane %v7167_v21, 5  ;;  %v503_v48 = vrot.slane %v501_v60, 4  ;;  %v514_v49 = vshrl.u32 %v5641_v45, 16  ;;  %7168 = vst [vmem:[#allocation26_spill] sm:$0xff] %v5671_v44 }
  0xa5   : > { %v5632_v20 = vpop.permute.xlu1 %2251  ;;  %v5634_v14 = vpop.permute.xlu0 %2729  ;;  %v1715_v55 = vrot.slane %v1714_v43, 4  ;;  %v506_v40 = vrot.slane %v504_v0, 5  ;;  %v512_v21 = vrot.slane %v510_v54, 5  ;;  %v4140_v60 = vrot.slane %v4124_v15, 9 }
  0xa6   : > { %v981_v29 = vsel %vm5013_vm5, %v5142_v11, %v980_v17  ;;  %v985_v24 = vor.u32 %v4936_v42, %v980_v17  ;;  %2659 = vrot.lane.b32.xlu0 %v4331_v6, %s4817_s23  ;;  %v5673_v11 = vrot.slane %v1089_v25, 4  ;;  %v520_v17 = vshll.u32 %v5651_v39, 16 }
  0xa7   : > { %2435 = vrot.lane.b32.xlu1 %v4283_v26, %s4818_s24  ;;  %v1720_v2 = vsel %vm5013_vm5, %v1715_v55, %v1719_v3  ;;  %v507_v6 = vor.u32 %v506_v40, %v503_v48  ;;  %v516_v0 = vrot.slane %v514_v49, 4  ;;  %v1460_v43 = vrot.slane %v5662_v12, 5  ;;  %v4162_v40 = vld [vmem:[%s4869_s22 + $0x60] sm:$0xf] }
  0xa8   : > { %v986_v42 = vrot.slane %v985_v24, 4  ;;  %v5680_v54 = vrot.slane %v1092_v30, 5  ;;  %v4347_v28 = vcombine.low %v1710_v63, %v1720_v2  ;;  %v1463_v26 = vrot.slane %v5671_v44, 5  ;;  %v746_v24 = vld [vmem:[%s4869_s22 + $0x48] sm:$0xe] }
  0xa9   : > { %v5664_v7 = vpop.permute.xlu1 %2427  ;;  %v5666_v10 = vpop.permute.xlu0 %2731  ;;  %v508_v15 = vrot.slane %v507_v6, 4  ;;  %v517_v58 = vor.u32 %v516_v0, %v512_v21  ;;  %v522_v3 = vrot.slane %v520_v17, 5  ;;  %v1461_v30 = vsel %vm4927_vm2, %v4140_v60, %v1460_v43  ;;  %v4751_v2 = vld [vmem:[%s4869_s22 + $0x1c] sm:$0xf] }
  0xaa   : > { %v991_v25 = vsel %vm5013_vm5, %v986_v42, %v990_v47  ;;  %2739 = vrot.lane.b32.xlu0 %v4347_v28, %s4818_s24  ;;  %v1462_v55 = vrot.slane %v1460_v43, 4  ;;  %v1002_v63 = vshll.u32 %v4751_v2, 16  ;;  %v1006_v47 = vshrl.u32 %v4751_v2, 16 }
  0xab   : > { %v5686_v1 = vcombine.low %v981_v29, %v991_v25  ;;  %v513_v42 = vsel %vm5013_vm5, %v508_v15, %v512_v21  ;;  %v518_v17 = vrot.slane %v517_v58, 4  ;;  %v4060_v6 = vrot.slane %v746_v24, 9  ;;  %v5706_v25 = vld [vmem:[%s7081_s1 + $0x80] sm:$0xff]  }
  0xac   : > { %v1464_v28 = vsel %vm4927_vm2, %v1462_v55, %v1463_v26  ;;  %v1004_v0 = vrot.slane %v1002_v63, 5  ;;  %v1008_v60 = vrot.slane %v1006_v47, 4  ;;  %v851_v43 = vrot.slane %v5641_v45, 5  ;;  %v5712_v58 = vld [vmem:[%s4869_s22 + $0x64] sm:$0xf]  ;;  %4605 = vmatprep.subr.bf16.mxu1 %v5706_v25 }
  0xad   : > { %v523_v2 = vsel %vm5013_vm5, %v518_v17, %v522_v3  ;;  %v4316_v29 = vcombine.low %v1461_v30, %v1464_v28  ;;  %v854_v21 = vrot.slane %v5651_v39, 5  ;;  %v1722_v24 = vshrl.u32 %v4162_v40, 16  ;;  %v4082_v28 = vld [vmem:[%s4869_s22 + $0x54] sm:$0xf] }
  0xae   : > { %v1095_v26 = vor.u32 %v5680_v54, %v5673_v11  ;;  %v4252_v15 = vcombine.low %v513_v42, %v523_v2  ;;  %v1009_v45 = vor.u32 %v1008_v60, %v1004_v0  ;;  %v7169_v55 = vshll.u32 %v4949_v50, 16 }
  0xaf   : > { %v5688_v48 = vpop.permute.xlu0 %2577  ;;  %2565 = vrot.lane.b32.xlu0 %v4316_v29, %s4819_s5  ;;  %v852_v39 = vsel %vm4927_vm2, %v4060_v6, %v851_v43  ;;  %v853_v3 = vrot.slane %v851_v43, 4  ;;  %v1724_v30 = vrot.slane %v1722_v24, 4  ;;  %v1725_v17 = vshll.u32 %v4162_v40, 16  ;;  %v5736_v24 = vld [vmem:[%s4869_s22 + $0x68] sm:$0x1] }
  0xb0   : > { %v5695_v49 = vpop.permute.xlu1 %2273  ;;  %v1014_v63 = vrot.slane %v7169_v55, 5  ;;  %2261 = vrot.lane.b32.xlu1 %v4252_v15, %s4819_s5  ;;  %v1005_v50 = vsel %vm5013_vm5, %v5164_v46, %v1004_v0  ;;  %v1010_v54 = vrot.slane %v1009_v45, 4  ;;  %v1735_v29 = vshrl.u32 %v5712_v58, 16  ;;  %7170 = vst [vmem:[#allocation27_spill] sm:$0xff] %v5736_v24  ;;  %v4752_v0 = vld [vmem:[%s4869_s22 + $0x4] sm:$0xf] }
  0xb1   : > { %v4332_v42 = vcombine.low %v4162_v40, %v5712_v58  ;;  %v855_v6 = vsel %vm4927_vm2, %v853_v3, %v854_v21  ;;  %v1727_v60 = vrot.slane %v1725_v17, 5  ;;  %v1113_v43 = vshrl.u32 %v4082_v28, 16  ;;  %v4753_v45 = vld [vmem:[%s4869_s22] sm:$0xf]  ;;  %v319_v17 = vld [vmem:[%s4869_s22 + $0x54] sm:$0xf] }
  0xb2   : > { %v1116_v2 = vshll.u32 %v4082_v28, 16  ;;  %v1015_v15 = vsel %vm5013_vm5, %v1010_v54, %v1014_v63  ;;  %v4268_v46 = vcombine.low %v852_v39, %v855_v6  ;;  %v4230_v55 = vcombine.low %v4753_v45, %v4752_v0  ;;  %v5753_v6 = vld [vmem:[%s4869_s22 + $0x58] sm:$0xf]  ;;  %v5779_v45 = vld [vmem:[%s4869_s22 + $0x64] sm:$0xf] }
  0xb3   : > { %v5724_v11 = vpop.permute.xlu0 %2673  ;;  %v4295_v40 = vcombine.low %v1005_v50, %v1015_v15  ;;  %2661 = vrot.lane.b32.xlu0 %v4332_v42, %s4817_s23  ;;  %v5743_v19 = vrot.slane %v1113_v43, 4  ;;  %v1728_v3 = vor.u32 %v1727_v60, %v1724_v30  ;;  %v4284_v16 = vcombine.low %v4082_v28, %v5662_v12  ;;  %v5784_v60 = vld [vmem:[%s4869_s22 + $0x68] sm:$0x1] }
  0xb4   : > { %v5718_v47 = vpop.permute.xlu1 %2353  ;;  %v5745_v21 = vrot.slane %v1116_v2, 5  ;;  %2341 = vrot.lane.b32.xlu1 %v4268_v46, %s4817_s23  ;;  %v1731_v63 = vshll.u32 %v5712_v58, 16  ;;  %v1737_v39 = vrot.slane %v1735_v29, 4  ;;  %v1741_v54 = vshll.u32 %v5736_v24, 16  ;;  %v5768_v2 = vld [vmem:[%s4869_s22 + $0x5c] sm:$0x1] }
  0xb5   : > { %v5757_v42 = vrot.slane %v1095_v26, 4  ;;  %v2942_v30 = vsel %vm2809_vm6, %v5686_v1, %v5551_v5  ;;  %v1729_v12 = vrot.slane %v1728_v3, 4  ;;  %v2812_v29 = vsel %vm2809_vm6, %v4230_v55, %v5610_v8  ;;  %v4125_v8 = vld [vmem:[%s4869_s22 + $0x60] sm:$0xe] }
  0xb6   : > { %v1733_v43 = vrot.slane %v1731_v63, 5  ;;  %v525_v15 = vshrl.u32 %v319_v17, 16  ;;  %v528_v46 = vshll.u32 %v319_v17, 16  ;;  %v5772_v26 = vsel %vm2809_vm6, %v4295_v40, %v5582_v18 }
  0xb7   : > { %7171 = vst [vmem:[#allocation28_spill] sm:$0xff] %v5757_v42  ;;  %v5763_v28 = vpop.permute.xlu0 %2557  ;;  %v534_v5 = vshll.u32 %v5753_v6, 16  ;;  %v538_v0 = vshrl.u32 %v5753_v6, 16  ;;  %v1743_v3 = vrot.slane %v1741_v54, 5  ;;  %v544_v9 = vshll.u32 %v5768_v2, 16 }
  0xb8   : > { %2437 = vrot.lane.b32.xlu1 %v4284_v16, %s4818_s24  ;;  %v1738_v55 = vor.u32 %v1737_v39, %v1733_v43  ;;  %v527_v63 = vrot.slane %v525_v15, 4  ;;  %v530_v17 = vrot.slane %v528_v46, 5  ;;  %v1734_v40 = vsel %vm5013_vm5, %v1729_v12, %v1733_v43 }
  0xb9   : > { %v5755_v50 = vpop.permute.xlu1 %2753  ;;  %v536_v1 = vrot.slane %v534_v5, 5  ;;  %v540_v44 = vrot.slane %v538_v0, 4  ;;  %v4141_v61 = vrot.slane %v4125_v8, 9  ;;  %v1467_v16 = vrot.slane %v5779_v45, 5  ;;  %v747_v8 = vld [vmem:[%s4869_s22 + $0x54] sm:$0xe] }
  0xba   : > { %v1739_v31 = vrot.slane %v1738_v55, 4  ;;  %v531_v42 = vor.u32 %v530_v17, %v527_v63  ;;  %v546_v54 = vrot.slane %v544_v9, 5  ;;  %v1470_v15 = vrot.slane %v5784_v60, 5  ;;  %v4164_v17 = vld [vmem:[%s4869_s22 + $0x6c] sm:$0xf] }
  0xbb   : > { %v541_v39 = vor.u32 %v540_v44, %v536_v1  ;;  %v1468_v5 = vsel %vm4927_vm2, %v4141_v61, %v1467_v16  ;;  %v1469_v0 = vrot.slane %v1467_v16, 4  ;;  %v2989_v9 = vsel %vm2858_vm7, %v2942_v30, %v5501_v52 }
  0xbc   : > { %v1744_v12 = vsel %vm5013_vm5, %v1739_v31, %v1743_v3  ;;  %v532_v43 = vrot.slane %v531_v42, 4  ;;  %v3021_v61 = vsel %vm2891_vm8, %v2989_v9, %v5634_v14  ;;  %v2860_v42 = vsel %vm2858_vm7, %v2812_v29, %v5570_v53  ;;  %v5814_v3 = vld [vmem:[%s4869_s22 + $0x70] sm:$0xf] }
  0xbd   : > { %v5786_v18 = vpop.permute.xlu1 %2449  ;;  %v4348_v63 = vcombine.low %v1734_v40, %v1744_v12  ;;  %v542_v44 = vrot.slane %v541_v39, 4  ;;  %v1471_v31 = vsel %vm4927_vm2, %v1469_v0, %v1470_v15  ;;  %7172 = vst [vmem:[#allocation29_spill] sm:$0xff] %v5814_v3  ;;  %3256 = vmatprep.mubr.bf16.mxu0 %v3021_v61  ;;  %v4061_v40 = vrot.slane %v747_v8, 9  ;;  %v4754_v12 = vld [vmem:[%s4869_s22 + $0x10] sm:$0xf] }
  0xbe   : > { %v537_v41 = vsel %vm5013_vm5, %v532_v43, %v536_v1  ;;  %v4317_v30 = vcombine.low %v1468_v5, %v1471_v31  ;;  %v2893_v1 = vsel %vm2891_vm8, %v2860_v42, %v5539_v22  ;;  %v858_v53 = vrot.slane %v5753_v6, 5  ;;  %v4756_v31 = vld [vmem:[%s4869_s22 + $0xa0] sm:$0xf] }
  0xbf   : > { %2741 = vrot.lane.b32.xlu0 %v4348_v63, %s4818_s24  ;;  %v547_v52 = vsel %vm5013_vm5, %v542_v44, %v546_v54  ;;  %3257 = vmatmul.mubr.bf16.vlgmr.msra.gmra.mrb[0].mxu0 %v2893_v1  ;;  %v861_v29 = vrot.slane %v5768_v2, 5  ;;  %v1746_v39 = vshrl.u32 %v4164_v17, 16  ;;  %v4755_v54 = vld [vmem:[%s4869_s22 + $0xc] sm:$0xf]  ;;  %v1749_v5 = vshll.u32 %v4164_v17, 16 }
  0xc0   : > { %v5793_v46 = vpop.permute.xlu0 %2253  ;;  %v4253_v14 = vcombine.low %v537_v41, %v547_v52  ;;  %v4231_v43 = vcombine.low %v4755_v54, %v4754_v12  ;;  %v1759_v0 = vshrl.u32 %v5814_v3, 16  ;;  %v859_v41 = vsel %vm4927_vm2, %v4061_v40, %v858_v53  ;;  %v748_v15 = vld [vmem:[%s4869_s22 + $0x60] sm:$0xe] }
  0xc1   : > { %v5800_v55 = vpop.permute.xlu1 %2333  ;;  %v860_v6 = vrot.slane %v858_v53, 4  ;;  %v1748_v2 = vrot.slane %v1746_v39, 4  ;;  %v2991_v8 = vsel %vm2858_vm7, %v5772_v26, %v5515_v23  ;;  %v1751_v63 = vrot.slane %v1749_v5, 5  ;;  %v4758_v53 = vld [vmem:[%s4869_s22 + $0x94] sm:$0xf] }
  0xc2   : > { %2263 = vrot.lane.b32.xlu1 %v4253_v14, %s4819_s5  ;;  %v4333_v44 = vcombine.low %v4164_v17, %v5814_v3  ;;  %v3024_v9 = vsel %vm2891_vm8, %v2991_v8, %v5666_v10  ;;  %v1266_v61 = vshll.u32 %v4756_v31, 16  ;;  %v7173_v52 = vor.u32 %v5745_v21, %v5743_v19  ;;  %v4757_v14 = vld [vmem:[%s4869_s22 + $0x90] sm:$0xf]  ;;  %v5858_v19 = vld [vmem:[%s4869_s22 + $0x74] sm:$0x1] }
  0xc3   : > { %2567 = vrot.lane.b32.xlu0 %v4317_v30, %s4819_s5  ;;  %v862_v26 = vsel %vm4927_vm2, %v860_v6, %v861_v29  ;;  %3264 = vmatprep.mubr.bf16.mxu0 %v3024_v9  ;;  %v1270_v17 = vshrl.u32 %v4756_v31, 16  ;;  %v4084_v30 = vld [vmem:[%s4869_s22 + $0x60] sm:$0xf]  ;;  %v2815_v10 = vsel %vm2809_vm6, %v4231_v43, %v5632_v20  ;;  %v4242_v39 = vcombine.low %v4757_v14, %v4758_v53 }
  0xc4   : > { %v5821_v16 = vpop.permute.xlu0 %2653  ;;  %v5847_v1 = vrot.slane %v7173_v52, 4  ;;  %v4269_v40 = vcombine.low %v859_v41, %v862_v26  ;;  %v1268_v12 = vrot.slane %v1266_v61, 5  ;;  %7174 = vst [vmem:[#allocation30_spill] sm:$0xff] %v5858_v19  ;;  %v1752_v29 = vor.u32 %v1751_v63, %v1748_v2  ;;  %v321_v9 = vld [vmem:[%s4869_s22 + $0x60] sm:$0xf] }
  0xc5   : > { %v5829_v22 = vpop.permute.xlu1 %2429  ;;  %v1272_v5 = vrot.slane %v1270_v17, 4  ;;  %v7175_v20 = vshll.u32 %v5095_v37, 16  ;;  %v4285_v41 = vcombine.low %v4084_v30, %v5779_v45  ;;  %v1755_v6 = vshll.u32 %v5814_v3, 16  ;;  %v5881_v17 = vld [vmem:[%s4869_s22 + $0x64] sm:$0xf] }
  0xc6   : > { %2343 = vrot.lane.b32.xlu1 %v4269_v40, %s4817_s23  ;;  %v1761_v8 = vrot.slane %v1759_v0, 4  ;;  %v1137_v63 = vshrl.u32 %v4084_v30, 16  ;;  %v1753_v52 = vrot.slane %v1752_v29, 4  ;;  %v5876_v37 = vsel %vm2809_vm6, %v4242_v39, %v5695_v49  ;;  %v4126_v29 = vld [vmem:[%s4869_s22 + $0x6c] sm:$0xe] }
  0xc7   : > { %2663 = vrot.lane.b32.xlu0 %v4333_v44, %s4817_s23  ;;  %v1278_v43 = vrot.slane %v7175_v20, 5  ;;  %v1273_v2 = vor.u32 %v1272_v5, %v1268_v12  ;;  %v1765_v44 = vshll.u32 %v5858_v19, 16  ;;  %v1140_v45 = vshll.u32 %v4084_v30, 16  ;;  %v5889_v5 = vld [vmem:[%s4869_s22 + $0x68] sm:$0x1] }
  0xc8   : > { %v5842_v42 = vpop.permute.xlu0 %2733  ;;  %v1757_v26 = vrot.slane %v1755_v6, 5  ;;  %v2862_v0 = vsel %vm2858_vm7, %v2815_v10, %v5603_v33  ;;  %v1269_v40 = vsel %vm5013_vm5, %v5225_v27, %v1268_v12  ;;  %v549_v49 = vshrl.u32 %v321_v9, 16 }
  0xc9   : > { %v1274_v14 = vrot.slane %v1273_v2, 4  ;;  %v2896_v53 = vsel %vm2891_vm8, %v2862_v0, %v5664_v7  ;;  %v1767_v10 = vrot.slane %v1765_v44, 5  ;;  %v552_v39 = vshll.u32 %v321_v9, 16  ;;  %v5905_v44 = vld [vmem:[%s4869_s22 + $0x70] sm:$0xf] }
  0xca   : > { %2439 = vrot.lane.b32.xlu1 %v4285_v41, %s4818_s24  ;;  %v1758_v30 = vsel %vm5013_vm5, %v1753_v52, %v1757_v26  ;;  %v1762_v33 = vor.u32 %v1761_v8, %v1757_v26  ;;  %3265 = vmatmul.mubr.bf16.gmra.mrb[4].mxu0 %v2896_v53  ;;  %v551_v12 = vrot.slane %v549_v49, 4  ;;  %v558_v20 = vshll.u32 %v5881_v17, 16 }
  0xcb   : > { %v5869_v31 = vpop.permute.xlu1 %2275  ;;  %v1279_v7 = vsel %vm5013_vm5, %v1274_v14, %v1278_v43  ;;  %v562_v41 = vshrl.u32 %v5881_v17, 16  ;;  %v554_v8 = vrot.slane %v552_v39, 5  ;;  %v568_v9 = vshll.u32 %v5889_v5, 16  ;;  %v5910_v14 = vld [vmem:[%s4869_s22 + $0x74] sm:$0x1] }
  0xcc   : > { %v5871_v61 = vpop.permute.xlu0 %2579  ;;  %v4306_v2 = vcombine.low %v1269_v40, %v1279_v7  ;;  %v1763_v52 = vrot.slane %v1762_v33, 4  ;;  %v5907_v26 = vrot.slane %v1137_v63, 4  ;;  %v560_v0 = vrot.slane %v558_v20, 5  ;;  %7176 = vst [vmem:[#allocation31_spill] sm:$0xff] %v5910_v14 }
  0xcd   : > { %v564_v43 = vrot.slane %v562_v41, 4  ;;  %v4142_v53 = vrot.slane %v4126_v29, 9  ;;  %v5914_v54 = vrot.slane %v1140_v45, 5  ;;  %v555_v33 = vor.u32 %v554_v8, %v551_v12  ;;  %v4759_v29 = vld [vmem:[%s4869_s22 + $0x28] sm:$0xf] }
  0xce   : > { %v2978_v49 = vsel %vm2809_vm6, %v4306_v2, %v5688_v48  ;;  %v1768_v40 = vsel %vm5013_vm5, %v1763_v52, %v1767_v10  ;;  %v570_v23 = vrot.slane %v568_v9, 5  ;;  %v1474_v63 = vrot.slane %v5905_v44, 5 }
  0xcf   : > { %v5895_v27 = vpop.permute.xlu1 %2355  ;;  %v4349_v39 = vcombine.low %v1758_v30, %v1768_v40  ;;  %v565_v7 = vor.u32 %v564_v43, %v560_v0  ;;  %v556_v20 = vrot.slane %v555_v33, 4  ;;  %v1477_v41 = vrot.slane %v5910_v14, 5  ;;  %v4166_v40 = vld [vmem:[%s4869_s22 + $0x78] sm:$0xf] }
  0xd0   : > { %v5901_v6 = vpop.permute.xlu0 %2675  ;;  %v1026_v21 = vshll.u32 %v4759_v29, 16  ;;  %v1030_v3 = vshrl.u32 %v4759_v29, 16  ;;  %v3013_v45 = vsel %vm2858_vm7, %v2978_v49, %v5724_v11  ;;  %v1475_v10 = vsel %vm4927_vm2, %v4142_v53, %v1474_v63 }
  0xd1   : > { %2743 = vrot.lane.b32.xlu0 %v4349_v39, %s4818_s24  ;;  %v566_v30 = vrot.slane %v565_v7, 4  ;;  %v1476_v12 = vrot.slane %v1474_v63, 4  ;;  %v561_v52 = vsel %vm5013_vm5, %v556_v20, %v560_v0  ;;  %v4062_v43 = vrot.slane %v748_v15, 9 }
  0xd2   : > { %v1028_v8 = vrot.slane %v1026_v21, 5  ;;  %v1032_v9 = vrot.slane %v1030_v3, 4  ;;  %v865_v49 = vrot.slane %v5881_v17, 5  ;;  %v868_v53 = vrot.slane %v5889_v5, 5  ;;  %v5943_v21 = vld [vmem:[%s4869_s22 + $0x7c] sm:$0xf] }
  0xd3   : > { %v571_v33 = vsel %vm5013_vm5, %v566_v30, %v570_v23  ;;  %v1478_v11 = vsel %vm4927_vm2, %v1476_v12, %v1477_v41  ;;  %v7177_v29 = vshll.u32 %v5148_v32, 16  ;;  %7178 = vst [vmem:[#allocation32_spill] sm:$0xff] %v5943_v21  ;;  %v3057_v17 = vsel %vm2891_vm8, %v3013_v45, %v5755_v50  ;;  %v4086_v45 = vld [vmem:[%s4869_s22 + $0x6c] sm:$0xf] }
  0xd4   : > { %v5929_v2 = vpop.permute.xlu0 %2559  ;;  %v4254_v39 = vcombine.low %v561_v52, %v571_v33  ;;  %v4318_v7 = vcombine.low %v1475_v10, %v1478_v11  ;;  %v1033_v63 = vor.u32 %v1032_v9, %v1028_v8  ;;  %v866_v15 = vsel %vm4927_vm2, %v4062_v43, %v865_v49  ;;  %3352 = vmatprep.mubr.bf16.mxu1 %v3057_v17  ;;  %v5969_v43 = vld [vmem:[%s4869_s22 + $0x80] sm:$0x1] }
  0xd5   : > { %v5922_v48 = vpop.permute.xlu1 %2755  ;;  %v1038_v0 = vrot.slane %v7177_v29, 5  ;;  %v867_v23 = vrot.slane %v865_v49, 4  ;;  %v1770_v20 = vshrl.u32 %v4166_v40, 16  ;;  %v1143_v5 = vor.u32 %v5914_v54, %v5907_v26  ;;  %7179 = vst [vmem:[#allocation33_spill] sm:$0xff] %v5969_v43  ;;  %v4760_v49 = vld [vmem:[%s4869_s22 + $0x18] sm:$0xf] }
  0xd6   : > { %2265 = vrot.lane.b32.xlu1 %v4254_v39, %s4819_s5  ;;  %2569 = vrot.lane.b32.xlu0 %v4318_v7, %s4819_s5  ;;  %v1029_v32 = vsel %vm5013_vm5, %v5294_v13, %v1028_v8  ;;  %v1034_v41 = vrot.slane %v1033_v63, 4  ;;  %v1773_v30 = vshll.u32 %v4166_v40, 16  ;;  %v1783_v54 = vshrl.u32 %v5943_v21, 16  ;;  %v4744_v63 = vld [vmem:[%s7081_s1 + $0x88] sm:$0xff]  }
  0xd7   : > { %v869_v10 = vsel %vm4927_vm2, %v867_v23, %v868_v53  ;;  %v1772_v50 = vrot.slane %v1770_v20, 4  ;;  %v4334_v26 = vcombine.low %v4166_v40, %v5943_v21  ;;  %v2884_v11 = vsel %vm2858_vm7, %v5876_v37, %v5718_v47  ;;  %v4761_v53 = vld [vmem:[%s4869_s22 + $0x1c] sm:$0xf] }
  0xd8   : > { %v1039_v13 = vsel %vm5013_vm5, %v1034_v41, %v1038_v0  ;;  %v4270_v8 = vcombine.low %v866_v15, %v869_v10  ;;  %v1775_v9 = vrot.slane %v1773_v30, 5  ;;  %v4232_v39 = vcombine.low %v4760_v49, %v4761_v53  ;;  %v323_v15 = vld [vmem:[%s4869_s22 + $0x6c] sm:$0xf]  ;;  %v5992_v41 = vld [vmem:[%s4869_s22 + $0x70] sm:$0xf] }
  0xd9   : > { %v5945_v3 = vpop.permute.xlu1 %2451  ;;  %v4296_v40 = vcombine.low %v1029_v32, %v1039_v13  ;;  %v1161_v7 = vshrl.u32 %v4086_v45, 16  ;;  %v4286_v29 = vcombine.low %v4086_v45, %v5905_v44  ;;  %v2929_v47 = vsel %vm2891_vm8, %v2884_v11, %v5786_v18 }
  0xda   : > { %2345 = vrot.lane.b32.xlu1 %v4270_v8, %s4817_s23  ;;  %2665 = vrot.lane.b32.xlu0 %v4334_v26, %s4817_s23  ;;  %v1776_v37 = vor.u32 %v1775_v9, %v1772_v50  ;;  %v1779_v0 = vshll.u32 %v5943_v21, 16  ;;  %v5988_v23 = vrot.slane %v1143_v5, 4  ;;  %v1164_v17 = vshll.u32 %v4086_v45, 16  ;;  %v5999_v5 = vld [vmem:[%s4869_s22 + $0x74] sm:$0x1] }
  0xdb   : > { %v5963_v12 = vpop.permute.xlu0 %2255  ;;  %3353 = vmatmul.mubr.bf16.vlgmr.msra.gmra.mrb[0].mxu1 %v2929_v47  ;;  %v1785_v20 = vrot.slane %v1783_v54, 4  ;;  %v1789_v32 = vshll.u32 %v5969_v43, 16  ;;  %v2948_v54 = vsel %vm2809_vm6, %v4296_v40, %v5763_v28  ;;  %v2818_v26 = vsel %vm2809_vm6, %v4232_v39, %v5793_v46  ;;  %v6009_v8 = vld [vmem:[%s4869_s22 + $0x7c] sm:$0xf]  ;;  %v6012_v9 = vld [vmem:[%s4869_s22 + $0x80] sm:$0x1] }
  0xdc   : > { %v1777_v10 = vrot.slane %v1776_v37, 4  ;;  %v1781_v50 = vrot.slane %v1779_v0, 5  ;;  %4606 = vmatpush3.bf16.msra.mxu1 %v5706_v25  ;;  %v6006_v45 = vrot.slane %v1161_v7, 4  ;;  %v573_v13 = vshrl.u32 %v323_v15, 16  ;;  %7180 = vst [vmem:[#allocation34_spill] sm:$0xff] %v6009_v8  ;;  %7181 = vst [vmem:[#allocation35_spill] sm:$0xff] %v6012_v9 }
  0xdd   : > { %v5971_v33 = vpop.permute.xlu1 %2335  ;;  %4607 = vmatprep.subr.bf16.mxu1 %v4744_v63  ;;  %v1791_v49 = vrot.slane %v1789_v32, 5  ;;  %v576_v53 = vshll.u32 %v323_v15, 16  ;;  %v582_v28 = vshll.u32 %v5992_v41, 16  ;;  %v4127_v40 = vld [vmem:[%s4869_s22 + $0x78] sm:$0xe]  ;;  %v1166_v46 = vrot.slane %v1164_v17, 5 }
  0xde   : > { %2441 = vrot.lane.b32.xlu1 %v4286_v29, %s4818_s24  ;;  %v1786_v25 = vor.u32 %v1785_v20, %v1781_v50  ;;  %v575_v39 = vrot.slane %v573_v13, 4  ;;  %v586_v7 = vshrl.u32 %v5992_v41, 16  ;;  %v592_v47 = vshll.u32 %v5999_v5, 16  ;;  %v749_v37 = vld [vmem:[%s4869_s22 + $0x6c] sm:$0xe] }
  0xdf   : > { %v5994_v44 = vpop.permute.xlu0 %2655  ;;  %v1782_v0 = vsel %vm5013_vm5, %v1777_v10, %v1781_v50  ;;  %v578_v18 = vrot.slane %v576_v53, 5  ;;  %v584_v29 = vrot.slane %v582_v28, 5  ;;  %v4143_v52 = vrot.slane %v4127_v40, 9  ;;  %v4168_v13 = vld [vmem:[%s4869_s22 + $0x84] sm:$0xf] }
  0xe0   : > { %v1787_v30 = vrot.slane %v1786_v25, 4  ;;  %4608 = vmatpush3.bf16.msra.mxu1 %v4744_v63  ;;  %v588_v15 = vrot.slane %v586_v7, 4  ;;  %v594_v32 = vrot.slane %v592_v47, 5  ;;  %v1481_v17 = vrot.slane %v6009_v8, 5  ;;  %v750_v43 = vld [vmem:[%s4869_s22 + $0x78] sm:$0xe] }
  0xe1   : > { %v6014_v11 = vpop.permute.xlu1 %2431  ;;  %v579_v21 = vor.u32 %v578_v18, %v575_v39  ;;  %v1484_v19 = vrot.slane %v6012_v9, 5  ;;  %v4063_v24 = vrot.slane %v749_v37, 9  ;;  %v872_v40 = vrot.slane %v5992_v41, 5  ;;  %v6048_v37 = vld [vmem:[%s4869_s22 + $0x88] sm:$0xf] }
  0xe2   : > { %v1792_v14 = vsel %vm5013_vm5, %v1787_v30, %v1791_v49  ;;  %v589_v50 = vor.u32 %v588_v15, %v584_v29  ;;  %v1482_v25 = vsel %vm4927_vm2, %v4143_v52, %v1481_v17  ;;  %v1483_v53 = vrot.slane %v1481_v17, 4 }
  0xe3   : > { %v4350_v10 = vcombine.low %v1782_v0, %v1792_v14  ;;  %v580_v28 = vrot.slane %v579_v21, 4  ;;  %v875_v7 = vrot.slane %v5999_v5, 5  ;;  %v1794_v47 = vshrl.u32 %v4168_v13, 16 }
  0xe4   : > { %v6024_v20 = vpop.permute.xlu0 %2735  ;;  %v1167_v18 = vor.u32 %v1166_v46, %v6006_v45  ;;  %v590_v14 = vrot.slane %v589_v50, 4  ;;  %v1485_v52 = vsel %vm4927_vm2, %v1483_v53, %v1484_v19  ;;  %v1797_v49 = vshll.u32 %v4168_v13, 16  ;;  %v4088_v50 = vld [vmem:[%s4869_s22 + $0x78] sm:$0xf] }
  0xe5   : > { %2745 = vrot.lane.b32.xlu0 %v4350_v10, %s4818_s24  ;;  %v2993_v39 = vsel %vm2858_vm7, %v2948_v54, %v5821_v16  ;;  %v585_v21 = vsel %vm5013_vm5, %v580_v28, %v584_v29  ;;  %v4319_v41 = vcombine.low %v1482_v25, %v1485_v52  ;;  %v874_v5 = vrot.slane %v872_v40, 4 }
  0xe6   : > { %v595_v45 = vsel %vm5013_vm5, %v590_v14, %v594_v32  ;;  %v873_v46 = vsel %vm4927_vm2, %v4063_v24, %v872_v40  ;;  %v1796_v19 = vrot.slane %v1794_v47, 4  ;;  %v1799_v0 = vrot.slane %v1797_v49, 5  ;;  %v4764_v47 = vld [vmem:[%s4869_s22 + $0xa0] sm:$0xf] }
  0xe7   : > { %v6033_v63 = vpop.permute.xlu1 %2277  ;;  %v2864_v16 = vsel %vm2858_vm7, %v2818_v26, %v5800_v55  ;;  %v4255_v54 = vcombine.low %v585_v21, %v595_v45  ;;  %v876_v29 = vsel %vm4927_vm2, %v874_v5, %v875_v7  ;;  %v3027_v15 = vsel %vm2891_vm8, %v2993_v39, %v5842_v42  ;;  %v4762_v26 = vld [vmem:[%s4869_s22 + $0xac] sm:$0xf]  ;;  %v4763_v7 = vld [vmem:[%s4869_s22 + $0x9c] sm:$0xf]  ;;  %v325_v5 = vld [vmem:[%s4869_s22 + $0x78] sm:$0xf] }
  0xe8   : > { %v6037_v30 = vpop.permute.xlu0 %2581  ;;  %v1807_v24 = vshrl.u32 %v6048_v37, 16  ;;  %v4335_v32 = vcombine.low %v4168_v13, %v6048_v37  ;;  %3272 = vmatprep.mubr.bf16.mxu0 %v3027_v15  ;;  %v2899_v55 = vsel %vm2891_vm8, %v2864_v16, %v5829_v22  ;;  %v1290_v10 = vshll.u32 %v4762_v26, 16  ;;  %v6076_v13 = vld [vmem:[%s4869_s22 + $0x8c] sm:$0x1] }
  0xe9   : > { %2571 = vrot.lane.b32.xlu0 %v4319_v41, %s4819_s5  ;;  %v6071_v42 = vrot.slane %v1167_v18, 4  ;;  %2267 = vrot.lane.b32.xlu1 %v4255_v54, %s4819_s5  ;;  %v4271_v28 = vcombine.low %v873_v46, %v876_v29  ;;  %v1294_v40 = vshrl.u32 %v4762_v26, 16  ;;  %7183 = vst [vmem:[#allocation37_spill] sm:$0xff] %v6076_v13  ;;  %v4243_v22 = vcombine.low %v4763_v7, %v4764_v47  ;;  %v6091_v26 = vld [vmem:[%s4869_s22 + $0x7c] sm:$0xf] }
  0xea   : > { %3273 = vmatmul.mubr.bf16.gmra.mrb[8].mxu0 %v2899_v55  ;;  %v1292_v14 = vrot.slane %v1290_v10, 5  ;;  %v1185_v52 = vshrl.u32 %v4088_v50, 16  ;;  %v1800_v49 = vor.u32 %v1799_v0, %v1796_v19  ;;  %v1803_v41 = vshll.u32 %v6048_v37, 16  ;;  %v4128_v18 = vld [vmem:[%s4869_s22 + $0x84] sm:$0xe] }
  0xeb   : > { %v6060_v17 = vpop.permute.xlu1 %2357  ;;  %7182 = vst [vmem:[#allocation36_spill] sm:$0xff] %v6071_v42  ;;  %v1296_v21 = vrot.slane %v1294_v40, 4  ;;  %v7184_v45 = vshll.u32 %v5239_v56, 16  ;;  %v1188_v16 = vshll.u32 %v4088_v50, 16  ;;  %v1809_v54 = vrot.slane %v1807_v24, 4 }
  0xec   : > { %v6069_v25 = vpop.permute.xlu0 %2677  ;;  %v1813_v29 = vshll.u32 %v6076_v13, 16  ;;  %v4287_v0 = vcombine.low %v4088_v50, %v6009_v8  ;;  %v1801_v15 = vrot.slane %v1800_v49, 4  ;;  %v1805_v55 = vrot.slane %v1803_v41, 5  ;;  %v6110_v41 = vld [vmem:[%s4869_s22 + $0x88] sm:$0xf] }
  0xed   : > { %2667 = vrot.lane.b32.xlu0 %v4335_v32, %s4817_s23  ;;  %v1302_v46 = vrot.slane %v7184_v45, 5  ;;  %2347 = vrot.lane.b32.xlu1 %v4271_v28, %s4817_s23  ;;  %v1297_v19 = vor.u32 %v1296_v21, %v1292_v14  ;;  %v6097_v56 = vsel %vm2809_vm6, %v4243_v22, %v5869_v31  ;;  %v6099_v24 = vrot.slane %v1185_v52, 4  ;;  %v6102_v32 = vld [vmem:[%s4869_s22 + $0x80] sm:$0x1]  ;;  %7185 = vst [vmem:[#allocation38_spill] sm:$0xff] %v6110_v41 }
  0xee   : > { %v597_v28 = vshrl.u32 %v325_v5, 16  ;;  %v600_v40 = vshll.u32 %v325_v5, 16  ;;  %v1293_v50 = vsel %vm5013_vm5, %v5407_v51, %v1292_v14  ;;  %v1810_v49 = vor.u32 %v1809_v54, %v1805_v55  ;;  %v6124_v39 = vld [vmem:[%s4869_s22 + $0x8c] sm:$0x1] }
  0xef   : > { %v1298_v47 = vrot.slane %v1297_v19, 4  ;;  %v1815_v21 = vrot.slane %v1813_v29, 5  ;;  %v606_v52 = vshll.u32 %v6091_v26, 16  ;;  %v610_v45 = vshrl.u32 %v6091_v26, 16  ;;  %7186 = vst [vmem:[#allocation39_spill] sm:$0xff] %v6124_v39 }
  0xf0   : > { %v6104_v7 = vpop.permute.xlu0 %2561  ;;  %v599_v31 = vrot.slane %v597_v28, 4  ;;  %v602_v22 = vrot.slane %v600_v40, 5  ;;  %v1806_v51 = vsel %vm5013_vm5, %v1801_v15, %v1805_v55  ;;  %v1811_v14 = vrot.slane %v1810_v49, 4 }
  0xf1   : > { %v6093_v10 = vpop.permute.xlu1 %2757  ;;  %v1303_v5 = vsel %vm5013_vm5, %v1298_v47, %v1302_v46  ;;  %2443 = vrot.lane.b32.xlu1 %v4287_v0, %s4818_s24  ;;  %v616_v54 = vshll.u32 %v6102_v32, 16  ;;  %v608_v40 = vrot.slane %v606_v52, 5  ;;  %v612_v53 = vrot.slane %v610_v45, 4  ;;  %v4765_v45 = vld [vmem:[%s4869_s22 + $0x34] sm:$0xf] }
  0xf2   : > { %v4307_v19 = vcombine.low %v1293_v50, %v1303_v5  ;;  %v603_v28 = vor.u32 %v602_v22, %v599_v31  ;;  %v6126_v9 = vrot.slane %v1188_v16, 5  ;;  %v1816_v46 = vsel %vm5013_vm5, %v1811_v14, %v1815_v21 }
  0xf3   : > { %v4144_v0 = vrot.slane %v4128_v18, 9  ;;  %v1488_v15 = vrot.slane %v6110_v41, 5  ;;  %v4351_v55 = vcombine.low %v1806_v51, %v1816_v46  ;;  %v613_v49 = vor.u32 %v612_v53, %v608_v40 }
  0xf4   : > { %v604_v47 = vrot.slane %v603_v28, 4  ;;  %v618_v8 = vrot.slane %v616_v54, 5  ;;  %v2981_v31 = vsel %vm2809_vm6, %v4307_v19, %v5871_v61  ;;  %v1491_v18 = vrot.slane %v6124_v39, 5  ;;  %v4170_v28 = vld [vmem:[%s4869_s22 + $0x90] sm:$0xf] }
  0xf5   : > { %v6121_v29 = vpop.permute.xlu1 %2453  ;;  %v1489_v16 = vsel %vm4927_vm2, %v4144_v0, %v1488_v15  ;;  %v1490_v22 = vrot.slane %v1488_v15, 4  ;;  %2747 = vrot.lane.b32.xlu0 %v4351_v55, %s4818_s24  ;;  %v614_v52 = vrot.slane %v613_v49, 4  ;;  %v1050_v5 = vshll.u32 %v4765_v45, 16  ;;  %v6154_v55 = vld [vmem:[%s4869_s22 + $0x94] sm:$0xf] }
  0xf6   : > { %v609_v53 = vsel %vm5013_vm5, %v604_v47, %v608_v40  ;;  %v1054_v51 = vshrl.u32 %v4765_v45, 16  ;;  %v3015_v61 = vsel %vm2858_vm7, %v2981_v31, %v5901_v6  ;;  %v4064_v54 = vrot.slane %v750_v43, 9  ;;  %7187 = vst [vmem:[#allocation40_spill] sm:$0xff] %v6154_v55 }
  0xf7   : > { %v1492_v14 = vsel %vm4927_vm2, %v1490_v22, %v1491_v18  ;;  %v879_v19 = vrot.slane %v6091_v26, 5  ;;  %v619_v46 = vsel %vm5013_vm5, %v614_v52, %v618_v8  ;;  %v1052_v15 = vrot.slane %v1050_v5, 5 }
  0xf8   : > { %v6132_v50 = vpop.permute.xlu0 %2257  ;;  %v4320_v0 = vcombine.low %v1489_v16, %v1492_v14  ;;  %v1056_v40 = vrot.slane %v1054_v51, 4  ;;  %v4256_v49 = vcombine.low %v609_v53, %v619_v46  ;;  %v882_v43 = vrot.slane %v6102_v32, 5  ;;  %v4090_v14 = vld [vmem:[%s4869_s22 + $0x84] sm:$0xf] }
  0xf9   : > { %v6139_v21 = vpop.permute.xlu1 %2337  ;;  %v880_v6 = vsel %vm4927_vm2, %v4064_v54, %v879_v19  ;;  %v881_v31 = vrot.slane %v879_v19, 4  ;;  %v7188_v8 = vshll.u32 %v5285_v62, 16  ;;  %v3060_v22 = vsel %vm2891_vm8, %v3015_v61, %v5922_v48 }
  0xfa   : > { %2573 = vrot.lane.b32.xlu0 %v4320_v0, %s4819_s5  ;;  %v1057_v26 = vor.u32 %v1056_v40, %v1052_v15  ;;  %v1818_v18 = vshrl.u32 %v4170_v28, 16  ;;  %2269 = vrot.lane.b32.xlu1 %v4256_v49, %s4819_s5  ;;  %v1053_v32 = vsel %vm5013_vm5, %v5421_v57, %v1052_v15  ;;  %v1821_v62 = vshll.u32 %v4170_v28, 16  ;;  %v4766_v0 = vld [vmem:[%s4869_s22 + $0x24] sm:$0xf]  ;;  %v4767_v15 = vld [vmem:[%s4869_s22 + $0x28] sm:$0xf] }
  0xfb   : > { %v1062_v16 = vrot.slane %v7188_v8, 5  ;;  %v883_v53 = vsel %vm4927_vm2, %v881_v31, %v882_v43  ;;  %3360 = vmatprep.mubr.bf16.mxu1 %v3060_v22  ;;  %v1831_v45 = vshrl.u32 %v6154_v55, 16  ;;  %v4336_v61 = vcombine.low %v4170_v28, %v6154_v55  ;;  %v6187_v49 = vld [vmem:[%s4869_s22 + $0x98] sm:$0x1] }
  0xfc   : > { %v6156_v47 = vpop.permute.xlu0 %2657  ;;  %v1058_v48 = vrot.slane %v1057_v26, 4  ;;  %v4272_v5 = vcombine.low %v880_v6, %v883_v53  ;;  %v1820_v51 = vrot.slane %v1818_v18, 4  ;;  %v1191_v19 = vor.u32 %v6126_v9, %v6099_v24  ;;  %v6199_v26 = vld [vmem:[%s4869_s22 + $0x84] sm:$0xf]  ;;  %v6203_v18 = vld [vmem:[%s4869_s22 + $0x88] sm:$0xf] }
  0xfd   : > { %v6166_v52 = vpop.permute.xlu1 %2433  ;;  %v2886_v57 = vsel %vm2858_vm7, %v6097_v56, %v5895_v27  ;;  %v1823_v46 = vrot.slane %v1821_v62, 5  ;;  %v4233_v40 = vcombine.low %v4766_v0, %v4767_v15  ;;  %v1209_v6 = vshrl.u32 %v4090_v14, 16  ;;  %7189 = vst [vmem:[#allocation41_spill] sm:$0xff] %v6199_v26  ;;  %v6219_v0 = vld [vmem:[%s4869_s22 + $0x94] sm:$0xf] }
  0xfe   : > { %v1063_v28 = vsel %vm5013_vm5, %v1058_v48, %v1062_v16  ;;  %2669 = vrot.lane.b32.xlu0 %v4336_v61, %s4817_s23  ;;  %v2932_v9 = vsel %vm2891_vm8, %v2886_v57, %v5945_v3  ;;  %v1827_v24 = vshll.u32 %v6154_v55, 16  ;;  %2349 = vrot.lane.b32.xlu1 %v4272_v5, %s4817_s23  ;;  %v1212_v31 = vshll.u32 %v4090_v14, 16  ;;  %v348_v61 = vld [vmem:[%s4869_s22 + $0x8c] sm:$0x1]  ;;  %v751_v27 = vld [vmem:[%s4869_s22 + $0x84] sm:$0xe] }
  0xff   : > { %v4297_v56 = vcombine.low %v1053_v32, %v1063_v28  ;;  %v4288_v43 = vcombine.low %v4090_v14, %v6110_v41  ;;  %3361 = vmatmul.mubr.bf16.gmra.mrb[4].mxu1 %v2932_v9  ;;  %v1824_v8 = vor.u32 %v1823_v46, %v1820_v51  ;;  %v1833_v22 = vrot.slane %v1831_v45, 4  ;;  %v4172_v41 = vld [vmem:[%s4869_s22 + $0x9c] sm:$0xf] }
 0x100   : > { %v6177_v54 = vpop.permute.xlu0 %2737  ;;  %v1829_v16 = vrot.slane %v1827_v24, 5  ;;  %v1837_v3 = vshll.u32 %v6187_v49, 16  ;;  %v6209_v62 = vrot.slane %v1191_v19, 4  ;;  %v2821_v51 = vsel %vm2809_vm6, %v4233_v40, %v5963_v12  ;;  %v4129_v40 = vld [vmem:[%s4869_s22 + $0x90] sm:$0xe] }
 0x101   : > { %v6216_v45 = vrot.slane %v1209_v6, 4  ;;  %v1825_v14 = vrot.slane %v1824_v8, 4  ;;  %v6221_v15 = vrot.slane %v1212_v31, 5  ;;  %v621_v19 = vshrl.u32 %v6199_v26, 16  ;;  %v6232_v31 = vld [vmem:[%s4869_s22 + $0x98] sm:$0x1] }
 0x102   : > { %7190 = vst [vmem:[#allocation42_spill] sm:$0xff] %v6209_v62  ;;  %v1834_v57 = vor.u32 %v1833_v22, %v1829_v16  ;;  %v1839_v46 = vrot.slane %v1837_v3, 5  ;;  %2445 = vrot.lane.b32.xlu1 %v4288_v43, %s4818_s24  ;;  %v624_v28 = vshll.u32 %v6199_v26, 16  ;;  %v630_v12 = vshll.u32 %v6203_v18, 16 }
 0x103   : > { %v6205_v53 = vpop.permute.xlu1 %2279  ;;  %v1830_v6 = vsel %vm5013_vm5, %v1825_v14, %v1829_v16  ;;  %v634_v24 = vshrl.u32 %v6203_v18, 16  ;;  %v640_v8 = vshll.u32 %v348_v61, 16  ;;  %v2951_v43 = vsel %vm2809_vm6, %v4297_v56, %v5929_v2 }
 0x104   : > { %v6207_v32 = vpop.permute.xlu0 %2583  ;;  %v1835_v9 = vrot.slane %v1834_v57, 4  ;;  %v623_v3 = vrot.slane %v621_v19, 4  ;;  %v626_v48 = vrot.slane %v624_v28, 5  ;;  %v632_v5 = vrot.slane %v630_v12, 5 }
 0x105   : > { %v636_v14 = vrot.slane %v634_v24, 4  ;;  %v642_v57 = vrot.slane %v640_v8, 5  ;;  %v4145_v39 = vrot.slane %v4129_v40, 9  ;;  %v1495_v13 = vrot.slane %v6219_v0, 5  ;;  %v6253_v8 = vld [vmem:[%s4869_s22 + $0xa0] sm:$0xf] }
 0x106   : > { %v1840_v16 = vsel %vm5013_vm5, %v1835_v9, %v1839_v46  ;;  %v627_v55 = vor.u32 %v626_v48, %v623_v3  ;;  %v1498_v2 = vrot.slane %v6232_v31, 5  ;;  %v4065_v19 = vrot.slane %v751_v27, 9 }
 0x107   : > { %v6234_v22 = vpop.permute.xlu1 %2359  ;;  %v4352_v62 = vcombine.low %v1830_v6, %v1840_v16  ;;  %v637_v56 = vor.u32 %v636_v14, %v632_v5  ;;  %v886_v28 = vrot.slane %v6203_v18, 5  ;;  %v889_v12 = vrot.slane %v348_v61, 5 }
 0x108   : > { %v6239_v26 = vpop.permute.xlu0 %2679  ;;  %v628_v42 = vrot.slane %v627_v55, 4  ;;  %v1496_v46 = vsel %vm4927_vm2, %v4145_v39, %v1495_v13  ;;  %v1497_v40 = vrot.slane %v1495_v13, 4  ;;  %v1842_v9 = vshrl.u32 %v4172_v41, 16 }
 0x109   : > { %2749 = vrot.lane.b32.xlu0 %v4352_v62, %s4818_s24  ;;  %v1215_v48 = vor.u32 %v6221_v15, %v6216_v45  ;;  %v638_v6 = vrot.slane %v637_v56, 4  ;;  %v888_v24 = vrot.slane %v886_v28, 4  ;;  %v1845_v3 = vshll.u32 %v4172_v41, 16 }
 0x10a   : > { %v633_v61 = vsel %vm5013_vm5, %v628_v42, %v632_v5  ;;  %v1499_v55 = vsel %vm4927_vm2, %v1497_v40, %v1498_v2  ;;  %v887_v13 = vsel %vm4927_vm2, %v4065_v19, %v886_v28  ;;  %v1844_v39 = vrot.slane %v1842_v9, 4  ;;  %v4768_v28 = vld [vmem:[%s4869_s22 + $0xa8] sm:$0xf]  ;;  %v4770_v40 = vld [vmem:[%s4869_s22 + $0xb8] sm:$0xf] }
 0x10b   : > { %v643_v45 = vsel %vm5013_vm5, %v638_v6, %v642_v57  ;;  %v4321_v15 = vcombine.low %v1496_v46, %v1499_v55  ;;  %v890_v16 = vsel %vm4927_vm2, %v888_v24, %v889_v12  ;;  %v1847_v42 = vrot.slane %v1845_v3, 5  ;;  %v4769_v12 = vld [vmem:[%s4869_s22 + $0xac] sm:$0xf]  ;;  %v4092_v6 = vld [vmem:[%s4869_s22 + $0x90] sm:$0xf] }
 0x10c   : > { %v6263_v62 = vpop.permute.xlu0 %2563  ;;  %v2866_v5 = vsel %vm2858_vm7, %v2821_v51, %v5971_v33  ;;  %v2995_v14 = vsel %vm2858_vm7, %v2951_v43, %v5994_v44  ;;  %v4257_v2 = vcombine.low %v633_v61, %v643_v45  ;;  %v1855_v56 = vshrl.u32 %v6253_v8, 16  ;;  %v6289_v24 = vld [vmem:[%s4869_s22 + $0xa4] sm:$0x1] }
 0x10d   : > { %v6255_v27 = vpop.permute.xlu1 %2759  ;;  %2575 = vrot.lane.b32.xlu0 %v4321_v15, %s4819_s5  ;;  %v4337_v57 = vcombine.low %v4172_v41, %v6253_v8  ;;  %v3030_v19 = vsel %vm2891_vm8, %v2995_v14, %v6024_v20  ;;  %v4244_v46 = vcombine.low %v4768_v28, %v4769_v12  ;;  %v1314_v33 = vshll.u32 %v4770_v40, 16 }
 0x10e   : > { %v2100_v44 = vrot.slane %v6187_v49, 5  ;;  %2271 = vrot.lane.b32.xlu1 %v4257_v2, %s4819_s5  ;;  %v4273_v43 = vcombine.low %v887_v13, %v890_v16  ;;  %3280 = vmatprep.mubr.bf16.mxu0 %v3030_v19  ;;  %v2902_v9 = vsel %vm2891_vm8, %v2866_v5, %v6014_v11  ;;  %v1318_v41 = vshrl.u32 %v4770_v40, 16 }
 0x10f   : > { %3281 = vmatmul.mubr.bf16.gmra.mrb[12].mxu0 %v2902_v9  ;;  %v1316_v20 = vrot.slane %v1314_v33, 5  ;;  %v1233_v3 = vshrl.u32 %v4092_v6, 16  ;;  %v1236_v61 = vshll.u32 %v4092_v6, 16  ;;  %v1848_v55 = vor.u32 %v1847_v42, %v1844_v39 }
 0x110   : > { %v6291_v45 = vrot.slane %v1215_v48, 4  ;;  %v2104_v15 = vrot.slane %v6253_v8, 5  ;;  %v1320_v14 = vrot.slane %v1318_v41, 4  ;;  %v1851_v13 = vshll.u32 %v6253_v8, 16 }
 0x111   : > { %v6281_v51 = vpop.permute.xlu1 %2455  ;;  %2671 = vrot.lane.b32.xlu0 %v4337_v57, %s4817_s23  ;;  %v2854_v11 = vsel %vm2809_vm6, %v4244_v46, %v6033_v63  ;;  %v7191_v5 = vshll.u32 %v5365_v38, 16  ;;  %v1857_v19 = vrot.slane %v1855_v56, 4  ;;  %v1861_v48 = vshll.u32 %v6289_v24, 16  ;;  %v4771_v63 = vld [vmem:[%s4869_s22 + $0x40] sm:$0xf] }
 0x112   : > { %2351 = vrot.lane.b32.xlu1 %v4273_v43, %s4817_s23  ;;  %v1321_v39 = vor.u32 %v1320_v14, %v1316_v20  ;;  %v4289_v42 = vcombine.low %v4092_v6, %v6219_v0  ;;  %v1849_v28 = vrot.slane %v1848_v55, 4  ;;  %v1853_v12 = vrot.slane %v1851_v13, 5  ;;  %v4772_v55 = vld [vmem:[%s4869_s22 + $0x30] sm:$0xf]  ;;  %v4773_v14 = vld [vmem:[%s4869_s22 + $0x34] sm:$0xf] }
 0x113   : > { %v1326_v2 = vrot.slane %v7191_v5, 5  ;;  %v6305_v40 = vrot.slane %v1233_v3, 4  ;;  %v6307_v57 = vrot.slane %v1236_v61, 5  ;;  %v1074_v46 = vshll.u32 %v4771_v63, 16 }
 0x114   : > { %v6295_v16 = vpop.permute.xlu0 %2259  ;;  %v1078_v38 = vshrl.u32 %v4771_v63, 16  ;;  %v1317_v33 = vsel %vm5013_vm5, %v5473_v36, %v1316_v20  ;;  %v1322_v43 = vrot.slane %v1321_v39, 4  ;;  %v1858_v9 = vor.u32 %v1857_v19, %v1853_v12  ;;  %v4774_v19 = vld [vmem:[%s4869_s22 + $0xb4] sm:$0xf] }
 0x115   : > { %v6310_v56 = vpop.permute.xlu1 %2339  ;;  %v1863_v41 = vrot.slane %v1861_v48, 5  ;;  %v2888_v6 = vsel %vm2858_vm7, %v2854_v11, %v6060_v17  ;;  %v1076_v3 = vrot.slane %v1074_v46, 5  ;;  %v4234_v13 = vcombine.low %v4772_v55, %v4773_v14  ;;  %v4775_v48 = vld [vmem:[%s4869_s22 + $0xb8] sm:$0xf]  ;;  %v4777_v14 = vld [vmem:[%s4869_s22 + $0x4c] sm:$0xf] }
 0x116   : > { %v1080_v61 = vrot.slane %v1078_v38, 4  ;;  %v1327_v5 = vsel %vm5013_vm5, %v1322_v43, %v1326_v2  ;;  %2447 = vrot.lane.b32.xlu1 %v4289_v42, %s4818_s24  ;;  %v1854_v36 = vsel %vm5013_vm5, %v1849_v28, %v1853_v12  ;;  %v1859_v20 = vrot.slane %v1858_v9, 4  ;;  %v4776_v12 = vld [vmem:[%s4869_s22 + $0xc4] sm:$0xf] }
 0x117   : > { %v4245_v39 = vcombine.low %v4774_v19, %v4775_v48  ;;  %v4308_v17 = vcombine.low %v1317_v33, %v1327_v5  ;;  %v7192_v46 = vshll.u32 %v5411_v59, 16  ;;  %v2935_v55 = vsel %vm2891_vm8, %v2888_v6, %v6121_v29 }
 0x118   : > { %v6326_v63 = vpop.permute.xlu0 %2659  ;;  %v1081_v11 = vor.u32 %v1080_v61, %v1076_v3  ;;  %v1864_v2 = vsel %vm5013_vm5, %v1859_v20, %v1863_v41  ;;  %v1077_v42 = vsel %vm5013_vm5, %v5572_v34, %v1076_v3  ;;  %v2824_v28 = vsel %vm2809_vm6, %v4234_v13, %v6132_v50  ;;  %v4198_v13 = vld [vmem:[%s4869_s22 + $0x18] sm:$0xe] }
 0x119   : > { %v1086_v38 = vrot.slane %v7192_v46, 5  ;;  %v1338_v33 = vshll.u32 %v4776_v12, 16  ;;  %v2984_v59 = vsel %vm2809_vm6, %v4308_v17, %v6037_v30  ;;  %v4353_v43 = vcombine.low %v1854_v36, %v1864_v2  ;;  %v2436_v41 = vpop.permute.xlu1 %2435  ;;  %v7193_v36 = vld [vmem:[#allocation18_spill] sm:$0xff]  ;;  %v7195_v17 = vld [vmem:[#allocation25_spill] sm:$0xff] }
 0x11a   : > { %v1082_v9 = vrot.slane %v1081_v11, 4  ;;  %v2868_v29 = vsel %vm2858_vm7, %v2824_v28, %v6139_v21  ;;  %v3017_v6 = vsel %vm2858_vm7, %v2984_v59, %v6069_v25  ;;  %v2857_v34 = vsel %vm2809_vm6, %v4245_v39, %v6205_v53  ;;  %v4778_v46 = vld [vmem:[%s4869_s22 + $0x3c] sm:$0xf]  ;;  %v7196_v59 = vld [vmem:[#allocation28_spill] sm:$0xff] }
 0x11b   : > { %v1340_v50 = vrot.slane %v1338_v33, 5  ;;  %v1342_v3 = vshrl.u32 %v4776_v12, 16  ;;  %2751 = vrot.lane.b32.xlu0 %v4353_v43, %s4818_s24  ;;  %v3063_v30 = vsel %vm2891_vm8, %v3017_v6, %v6093_v10  ;;  %v2905_v21 = vsel %vm2891_vm8, %v2868_v29, %v6166_v52  ;;  %v7197_v43 = vld [vmem:[#allocation21_spill] sm:$0xff]  ;;  %v7199_v6 = vld [vmem:[#allocation4_spill] sm:$0xff] }
 0x11c   : > { %v1087_v61 = vsel %vm5013_vm5, %v1082_v9, %v1086_v38  ;;  %v1098_v25 = vshll.u32 %v4777_v14, 16  ;;  %3368 = vmatprep.mubr.bf16.mxu1 %v3063_v30  ;;  %v7194_v20 = vshll.u32 %v7193_v36, 16  ;;  %v1102_v48 = vshrl.u32 %v4777_v14, 16  ;;  %v6359_v39 = vpop.permute.xlu0 %2739  ;;  %v4779_v38 = vld [vmem:[%s4869_s22 + $0x40] sm:$0xf]  ;;  %v7204_v36 = vld [vmem:[#allocation5_spill] sm:$0xff] }
 0x11d   : > { %v4298_v5 = vcombine.low %v1077_v42, %v1087_v61  ;;  %v1344_v53 = vrot.slane %v1342_v3, 4  ;;  %3369 = vmatmul.mubr.bf16.gmra.mrb[8].mxu1 %v2935_v55  ;;  %v1341_v10 = vsel %vm5013_vm5, %v7195_v17, %v1340_v50  ;;  %v2890_v52 = vsel %vm2858_vm7, %v2857_v34, %v6234_v22  ;;  %v7201_v3 = vld [vmem:[#allocation3_spill] sm:$0xff] }
 0x11e   : > { %v1350_v19 = vrot.slane %v7194_v20, 5  ;;  %v1100_v11 = vrot.slane %v1098_v25, 5  ;;  %v4235_v2 = vcombine.low %v4778_v46, %v4779_v38  ;;  %v1104_v12 = vrot.slane %v1102_v48, 4  ;;  %v7205_v20 = vld [vmem:[#allocation22_spill] sm:$0xff]  ;;  %v4781_v17 = vld [vmem:[%s4869_s22 + $0x4c] sm:$0xf] }
 0x11f   : > { %v2954_v42 = vsel %vm2809_vm6, %v4298_v5, %v6104_v7  ;;  %v1345_v28 = vor.u32 %v1344_v53, %v1340_v50  ;;  %v4214_v33 = vrot.slane %v4198_v13, 9  ;;  %v7198_v9 = vshll.u32 %v7197_v43, 16  ;;  %v7202_v13 = vld [vmem:[#allocation2_spill] sm:$0xff]  ;;  %v4201_v43 = vld [vmem:[%s4869_s22 + $0x3c] sm:$0xe] }
 0x120   : > { %v2997_v55 = vsel %vm2858_vm7, %v2954_v42, %v6156_v47  ;;  %v1101_v22 = vsel %vm5013_vm5, %v7196_v59, %v1100_v11  ;;  %v7200_v34 = vrot.slane %v7199_v6, 5  ;;  %v1105_v30 = vor.u32 %v1104_v12, %v1100_v11  ;;  %v4200_v11 = vld [vmem:[%s4869_s22 + $0x30] sm:$0xe] }
 0x121   : > { %v1110_v29 = vrot.slane %v7198_v9, 5  ;;  %v3033_v61 = vsel %vm2891_vm8, %v2997_v55, %v6177_v54  ;;  %v1346_v47 = vrot.slane %v1345_v28, 4  ;;  %v2827_v14 = vsel %vm2809_vm6, %v4235_v2, %v6295_v16  ;;  %v4780_v54 = vld [vmem:[%s4869_s22 + $0x48] sm:$0xf]  ;;  %v2566_v28 = vpop.permute.xlu0 %2565 }
 0x122   : > { %v2031_v7 = vsel %vm4927_vm2, %v7201_v3, %v7200_v34  ;;  %v2262_v50 = vpop.permute.xlu1 %2261  ;;  %3288 = vmatprep.mubr.bf16.mxu0 %v3033_v61  ;;  %v2870_v25 = vsel %vm2858_vm7, %v2827_v14, %v6310_v56  ;;  %v7203_v5 = vrot.slane %v7202_v13, 5  ;;  %v4359_v48 = vcombine.low %v7205_v20, %v7204_v36  ;;  %v4782_v56 = vld [vmem:[%s4869_s22 + $0x58] sm:$0xf]  ;;  %v7206_v61 = vld [vmem:[#allocation8_spill] sm:$0xff] }
 0x123   : > { %v4236_v46 = vcombine.low %v4780_v54, %v4781_v17  ;;  %3289 = vmatmul.mubr.bf16.gmra.mrb[16].mxu0 %v2905_v21  ;;  %v1351_v16 = vsel %vm5013_vm5, %v1346_v47, %v1350_v19  ;;  %v1106_v38 = vrot.slane %v1105_v30, 4  ;;  %v1122_v42 = vshll.u32 %v4782_v56, 16  ;;  %v7208_v47 = vld [vmem:[#allocation26_spill] sm:$0xff]  ;;  %v4202_v54 = vld [vmem:[%s4869_s22 + $0x48] sm:$0xe] }
 0x124   : > { %v2028_v53 = vsel %vm4927_vm2, %v4214_v33, %v7203_v5  ;;  %v4309_v12 = vcombine.low %v1341_v10, %v1351_v16  ;;  %v2938_v33 = vsel %vm2891_vm8, %v2890_v52, %v6281_v51  ;;  %v2908_v55 = vsel %vm2891_vm8, %v2870_v25, %v2436_v41  ;;  %v7211_v5 = vld [vmem:[#allocation9_spill] sm:$0xff] }
 0x125   : > { %v4358_v2 = vcombine.low %v2028_v53, %v2031_v7  ;;  %v1126_v59 = vshrl.u32 %v4782_v56, 16  ;;  %v1111_v9 = vsel %vm5013_vm5, %v1106_v38, %v1110_v29  ;;  %v2830_v21 = vsel %vm2809_vm6, %v4236_v46, %v2262_v50 }
 0x126   : > { %v1124_v19 = vrot.slane %v1122_v42, 5  ;;  %v4216_v6 = vrot.slane %v4200_v11, 9  ;;  %v2987_v34 = vsel %vm2809_vm6, %v4309_v12, %v6207_v32  ;;  %v4299_v3 = vcombine.low %v1101_v22, %v1111_v9  ;;  %v2342_v7 = vpop.permute.xlu1 %2341  ;;  %v2662_v11 = vpop.permute.xlu0 %2661 }
 0x127   : > { %v1128_v10 = vrot.slane %v1126_v59, 4  ;;  %v7207_v51 = vrot.slane %v7206_v61, 5  ;;  %v3019_v41 = vsel %vm2858_vm7, %v2987_v34, %v6239_v26  ;;  %v7209_v30 = vshll.u32 %v7208_v47, 16  ;;  %v7218_v34 = vld [vmem:[#allocation16_spill] sm:$0xff] }
 0x128   : > { %v4217_v25 = vrot.slane %v4201_v43, 9  ;;  %v2957_v32 = vsel %vm2809_vm6, %v4299_v3, %v6263_v62  ;;  %v3066_v22 = vsel %vm2891_vm8, %v3019_v41, %v6255_v27  ;;  %v7212_v53 = vrot.slane %v7211_v5, 5  ;;  %v7213_v62 = vld [vmem:[#allocation12_spill] sm:$0xff]  ;;  %v7216_v43 = vld [vmem:[#allocation13_spill] sm:$0xff]  ;;  %v4204_v41 = vld [vmem:[%s4869_s22 + $0x60] sm:$0xe] }
 0x129   : > { %v2043_v52 = vrot.slane %v7207_v51, 4  ;;  %v1134_v29 = vrot.slane %v7209_v30, 5  ;;  %v7210_v50 = vmov %v7207_v51  ;;  %v1129_v13 = vor.u32 %v1128_v10, %v1124_v19  ;;  %3376 = vmatprep.mubr.bf16.mxu1 %v3066_v22  ;;  %v4783_v10 = vld [vmem:[%s4869_s22 + $0x64] sm:$0xf] }
 0x12a   : > { %v6419_v14 = vsel %vm4927_vm2, %v4216_v6, %v7210_v50  ;;  %v2999_v17 = vsel %vm2858_vm7, %v2957_v32, %v6326_v63  ;;  %v7214_v16 = vrot.slane %v7213_v62, 5  ;;  %3377 = vmatmul.mubr.bf16.gmra.mrb[12].mxu1 %v2938_v33  ;;  %v1125_v63 = vsel %vm5013_vm5, %v5847_v1, %v1124_v19  ;;  %v4203_v1 = vld [vmem:[%s4869_s22 + $0x54] sm:$0xe]  ;;  %v2438_v19 = vpop.permute.xlu1 %2437 }
 0x12b   : > { %v2045_v26 = vsel %vm4927_vm2, %v2043_v52, %v7212_v53  ;;  %v3036_v42 = vsel %vm2891_vm8, %v2999_v17, %v6359_v39  ;;  %v1130_v12 = vrot.slane %v1129_v13, 4  ;;  %v2872_v59 = vsel %vm2858_vm7, %v2830_v21, %v2342_v7  ;;  %4609 = vmatprep.mubr.msk.bf16.mxu1 %vm2809_vm6, %v4358_v2  ;;  %v7224_v13 = vld [vmem:[#allocation23_spill] sm:$0xff] }
 0x12c   : > { %v4360_v46 = vcombine.low %v6419_v14, %v2045_v26  ;;  %v6437_v27 = vsel %vm4927_vm2, %v4217_v25, %v7214_v16  ;;  %v7215_v38 = vmov %v7214_v16  ;;  %3296 = vmatprep.mubr.bf16.mxu0 %v3036_v42  ;;  %v7217_v9 = vrot.slane %v7216_v43, 5  ;;  %v7228_v43 = vld [vmem:[#allocation24_spill] sm:$0xff] }
 0x12d   : > { %v2050_v56 = vrot.slane %v7215_v38, 4  ;;  %v4218_v33 = vrot.slane %v4202_v54, 9  ;;  %v7219_v39 = vrot.slane %v7218_v34, 5  ;;  %v1146_v61 = vshll.u32 %v4783_v10, 16  ;;  %3297 = vmatmul.mubr.bf16.gmra.mrb[20].mxu0 %v2908_v55  ;;  %v7222_v55 = vld [vmem:[#allocation17_spill] sm:$0xff] }
 0x12e   : > { %v1135_v21 = vsel %vm5013_vm5, %v1130_v12, %v1134_v29  ;;  %v1150_v7 = vshrl.u32 %v4783_v10, 16  ;;  %v7220_v51 = vshll.u32 %v5784_v60, 16  ;;  %v7223_v14 = vrot.slane %v7222_v55, 5  ;;  %v4785_v55 = vld [vmem:[%s4869_s22 + $0x58] sm:$0xf] }
 0x12f   : > { %v6452_v6 = vsel %vm4927_vm2, %v2050_v56, %v7217_v9  ;;  %v2057_v3 = vrot.slane %v7219_v39, 4  ;;  %v4300_v47 = vcombine.low %v1125_v63, %v1135_v21  ;;  %v7221_v30 = vmov %v7219_v39  ;;  %v4205_v56 = vld [vmem:[%s4869_s22 + $0x6c] sm:$0xe] }
 0x130   : > { %v4361_v2 = vcombine.low %v6437_v27, %v6452_v6  ;;  %v1158_v52 = vrot.slane %v7220_v51, 5  ;;  %v6469_v50 = vsel %vm4927_vm2, %v4218_v33, %v7221_v30  ;;  %v1148_v25 = vrot.slane %v1146_v61, 5  ;;  %v7233_v51 = vld [vmem:[#allocation29_spill] sm:$0xff]  ;;  %v4784_v30 = vld [vmem:[%s4869_s22 + $0x54] sm:$0xf] }
 0x131   : > { %v6475_v29 = vsel %vm4927_vm2, %v2057_v3, %v7223_v14  ;;  %v1152_v32 = vrot.slane %v1150_v7, 4  ;;  %v4219_v22 = vrot.slane %v4203_v1, 9  ;;  %v7225_v5 = vrot.slane %v7224_v13, 5  ;;  %v2742_v54 = vpop.permute.xlu0 %2741  ;;  %v7231_v3 = vld [vmem:[#allocation27_spill] sm:$0xff]  ;;  %v4207_v13 = vld [vmem:[%s4869_s22 + $0x84] sm:$0xe] }
 0x132   : > { %v4362_v60 = vcombine.low %v6469_v50, %v6475_v29  ;;  %v2960_v26 = vsel %vm2809_vm6, %v4300_v47, %v2566_v28  ;;  %v1149_v17 = vsel %vm5013_vm5, %v5988_v23, %v1148_v25  ;;  %v4220_v62 = vrot.slane %v4204_v41, 9  ;;  %4610 = vmatmul.mubr.msk.bf16.vlgmr.msra.gmra.mrb[16].mxu1 %vm2809_vm6, %v4359_v48  ;;  %v4786_v48 = vld [vmem:[%s4869_s22 + $0x70] sm:$0xf] }
 0x133   : > { %v2064_v53 = vrot.slane %v7225_v5, 4  ;;  %v7226_v16 = vrot.slane %v5712_v58, 5  ;;  %v3001_v42 = vsel %vm2858_vm7, %v2960_v26, %v2662_v11  ;;  %v1153_v63 = vor.u32 %v1152_v32, %v1148_v25  ;;  %4613 = vmatprep.mubr.msk.bf16.mxu1 %vm2809_vm6, %v4360_v46 }
 0x134   : > { %v7227_v12 = vmov %v7225_v5  ;;  %v7229_v9 = vrot.slane %v7228_v43, 5  ;;  %v3039_v33 = vsel %vm2891_vm8, %v3001_v42, %v2742_v54  ;;  %v7232_v10 = vrot.slane %v7231_v3, 5  ;;  %v2264_v58 = vpop.permute.xlu1 %2263  ;;  %v7238_v42 = vld [vmem:[#allocation32_spill] sm:$0xff] }
 0x135   : > { %v2071_v38 = vrot.slane %v7226_v16, 4  ;;  %v6493_v28 = vsel %vm4927_vm2, %v4219_v22, %v7227_v12  ;;  %v7230_v34 = vmov %v7226_v16  ;;  %3304 = vmatprep.mubr.bf16.mxu0 %v3039_v33  ;;  %v1154_v1 = vrot.slane %v1153_v63, 4  ;;  %v2568_v20 = vpop.permute.xlu0 %2567  ;;  %v4206_v22 = vld [vmem:[%s4869_s22 + $0x78] sm:$0xe] }
 0x136   : > { %v6499_v23 = vsel %vm4927_vm2, %v2064_v53, %v7229_v9  ;;  %v6508_v39 = vsel %vm4927_vm2, %v4220_v62, %v7230_v34  ;;  %v4221_v7 = vrot.slane %v4205_v56, 9  ;;  %v7234_v41 = vrot.slane %v7233_v51, 5  ;;  %v4208_v51 = vld [vmem:[%s4869_s22 + $0x90] sm:$0xe] }
 0x137   : > { %v4363_v11 = vcombine.low %v6493_v28, %v6499_v23  ;;  %v6514_v61 = vsel %vm4927_vm2, %v2071_v38, %v7232_v10  ;;  %v4237_v14 = vcombine.low %v4784_v30, %v4785_v55  ;;  %v2911_v36 = vsel %vm2891_vm8, %v2872_v59, %v2438_v19  ;;  %v7236_v59 = vld [vmem:[#allocation30_spill] sm:$0xff]  ;;  %v7243_v30 = vld [vmem:[#allocation36_spill] sm:$0xff] }
 0x138   : > { %v4364_v21 = vcombine.low %v6508_v39, %v6514_v61  ;;  %v2078_v47 = vrot.slane %v7234_v41, 4  ;;  %v1170_v25 = vshll.u32 %v4786_v48, 16  ;;  %v1174_v32 = vshrl.u32 %v4786_v48, 16  ;;  %3305 = vmatmul.mubr.bf16.gmra.mrb[24].mxu0 %v2911_v36 }
 0x139   : > { %v1239_v5 = vor.u32 %v6307_v57, %v6305_v40  ;;  %v1159_v53 = vsel %vm5013_vm5, %v1154_v1, %v1158_v52  ;;  %v7235_v46 = vmov %v7234_v41  ;;  %v7237_v19 = vrot.slane %v7236_v59, 5 }
 0x13a   : > { %v6539_v26 = vsel %vm4927_vm2, %v4221_v7, %v7235_v46  ;;  %v4301_v62 = vcombine.low %v1149_v17, %v1159_v53  ;;  %v1172_v38 = vrot.slane %v1170_v25, 5  ;;  %v1176_v56 = vrot.slane %v1174_v32, 4  ;;  %v7241_v17 = vld [vmem:[#allocation31_spill] sm:$0xff]  ;;  %v4209_v25 = vld [vmem:[%s4869_s22 + $0x9c] sm:$0xe]  ;;  %4614 = vmatmul.mubr.msk.bf16.gmra.mrb[20].mxu1 %vm2809_vm6, %v4361_v2 }
 0x13b   : > { %v6545_v54 = vsel %vm4927_vm2, %v2078_v47, %v7237_v19  ;;  %v4222_v52 = vrot.slane %v4206_v22, 9  ;;  %v7239_v63 = vrot.slane %v7238_v42, 5  ;;  %v4223_v43 = vrot.slane %v4207_v13, 9  ;;  %v2344_v47 = vpop.permute.xlu1 %2343  ;;  %v7248_v46 = vld [vmem:[#allocation37_spill] sm:$0xff]  ;;  %v7252_v42 = vld [vmem:[#allocation34_spill] sm:$0xff]  ;;  %4617 = vmatprep.mubr.msk.bf16.mxu1 %vm2809_vm6, %v4362_v60 }
 0x13c   : > { %v4365_v16 = vcombine.low %v6539_v26, %v6545_v54  ;;  %v7240_v9 = vrot.slane %v6048_v37, 5  ;;  %v2107_v34 = vrot.slane %v6289_v24, 5  ;;  %v2833_v3 = vsel %vm2809_vm6, %v4237_v14, %v2264_v58  ;;  %v7245_v24 = vld [vmem:[#allocation33_spill] sm:$0xff]  ;;  %v7250_v37 = vld [vmem:[#allocation40_spill] sm:$0xff]  ;;  %v4787_v54 = vld [vmem:[%s4869_s22 + $0x60] sm:$0xf] }
 0x13d   : > { %v2085_v12 = vrot.slane %v7239_v63, 4  ;;  %v1177_v10 = vor.u32 %v1176_v56, %v1172_v38  ;;  %v7242_v1 = vshll.u32 %v7241_v17, 16  ;;  %v2963_v41 = vsel %vm2809_vm6, %v4301_v62, %v2568_v20  ;;  %v2664_v20 = vpop.permute.xlu0 %2663 }
 0x13e   : > { %v2092_v33 = vrot.slane %v7240_v9, 4  ;;  %v1173_v55 = vsel %vm5013_vm5, %v7243_v30, %v1172_v38  ;;  %v7244_v36 = vmov %v7239_v63  ;;  %v7246_v58 = vrot.slane %v7245_v24, 5 }
 0x13f   : > { %v1182_v7 = vrot.slane %v7242_v1, 5  ;;  %v6566_v48 = vsel %vm4927_vm2, %v4222_v52, %v7244_v36  ;;  %v1178_v32 = vrot.slane %v1177_v10, 4  ;;  %v7247_v13 = vmov %v7240_v9  ;;  %v4211_v9 = vld [vmem:[%s4869_s22 + $0xb4] sm:$0xe]  ;;  %v7256_v36 = vld [vmem:[#allocation42_spill] sm:$0xff] }
 0x140   : > { %v6572_v14 = vsel %vm4927_vm2, %v2085_v12, %v7246_v58  ;;  %v6581_v53 = vsel %vm4927_vm2, %v4223_v43, %v7247_v13  ;;  %v7249_v59 = vrot.slane %v7248_v46, 5  ;;  %v4224_v38 = vrot.slane %v4208_v51, 9  ;;  %v4210_v43 = vld [vmem:[%s4869_s22 + $0xa8] sm:$0xe]  ;;  %v7259_v13 = vld [vmem:[#allocation10_spill] sm:$0xff] }
 0x141   : > { %v4366_v22 = vcombine.low %v6566_v48, %v6572_v14  ;;  %v7251_v56 = vrot.slane %v7250_v37, 5  ;;  %v1194_v63 = vshll.u32 %v7252_v42, 16  ;;  %v2874_v12 = vsel %vm2858_vm7, %v2833_v3, %v2344_v47  ;;  %v7262_v37 = vld [vmem:[#allocation7_spill] sm:$0xff] }
 0x142   : > { %v6587_v19 = vsel %vm4927_vm2, %v2092_v33, %v7249_v59  ;;  %v1183_v27 = vsel %vm5013_vm5, %v1178_v32, %v1182_v7  ;;  %v1198_v6 = vshrl.u32 %v7252_v42, 16  ;;  %v4225_v2 = vrot.slane %v4209_v25, 9  ;;  %v7257_v25 = vld [vmem:[#allocation35_spill] sm:$0xff]  ;;  %4618 = vmatmul.mubr.msk.bf16.gmra.mrb[24].mxu1 %vm2809_vm6, %v4363_v11  ;;  %v7268_v11 = vld [vmem:[#allocation14_spill] sm:$0xff] }
 0x143   : > { %v4367_v62 = vcombine.low %v6581_v53, %v6587_v19  ;;  %v2099_v52 = vrot.slane %v7251_v56, 4  ;;  %v3003_v33 = vsel %vm2858_vm7, %v2963_v41, %v2664_v20  ;;  %v6609_v10 = vcombine.low %v1173_v55, %v1183_v27  ;;  %v7254_v41 = vld [vmem:[#allocation6_spill] sm:$0xff]  ;;  %v2440_v55 = vpop.permute.xlu1 %2439  ;;  %4621 = vmatprep.mubr.msk.bf16.mxu1 %vm2809_vm6, %v4364_v21  ;;  %v7271_v21 = vld [vmem:[#allocation15_spill] sm:$0xff] }
 0x144   : > { %v7253_v17 = vmov %v7251_v56  ;;  %v1196_v3 = vrot.slane %v1194_v63, 5  ;;  %v1200_v1 = vrot.slane %v1198_v6, 4  ;;  %v6629_v7 = vsel %vm4927_vm2, %v4225_v2, %v2104_v15 }
 0x145   : > { %v6615_v50 = vsel %vm4927_vm2, %v4224_v38, %v7253_v17  ;;  %v6621_v29 = vsel %vm4927_vm2, %v2099_v52, %v2100_v44  ;;  %v2106_v51 = vrot.slane %v2104_v15, 4  ;;  %v4226_v49 = vrot.slane %v4210_v43, 9  ;;  %v7265_v43 = vld [vmem:[#allocation11_spill] sm:$0xff] }
 0x146   : > { %v4368_v60 = vcombine.low %v6615_v50, %v6621_v29  ;;  %v7255_v47 = vrot.slane %v7254_v41, 5  ;;  %v4227_v30 = vrot.slane %v4211_v9, 9  ;;  %v1197_v24 = vsel %vm5013_vm5, %v7256_v36, %v1196_v3  ;;  %v7267_v41 = vld [vmem:[#allocation38_spill] sm:$0xff] }
 0x147   : > { %v1201_v58 = vor.u32 %v1200_v1, %v1196_v3  ;;  %v7258_v20 = vshll.u32 %v7257_v25, 16  ;;  %v7260_v46 = vrot.slane %v7259_v13, 5  ;;  %v6644_v8 = vsel %vm4927_vm2, %v2106_v51, %v2107_v34  ;;  %v4212_v34 = vld [vmem:[%s4869_s22 + $0xc0] sm:$0xe]  ;;  %v4213_v3 = vld [vmem:[%s4869_s22 + $0xcc] sm:$0xe]  ;;  %v2744_v1 = vpop.permute.xlu0 %2743 }
 0x148   : > { %v2113_v44 = vrot.slane %v7255_v47, 4  ;;  %v7261_v15 = vmov %v7255_v47  ;;  %v7263_v56 = vrot.slane %v7262_v37, 5  ;;  %v4369_v6 = vcombine.low %v6629_v7, %v6644_v8  ;;  %v7275_v37 = vld [vmem:[#allocation39_spill] sm:$0xff] }
 0x149   : > { %v1206_v32 = vrot.slane %v7258_v20, 5  ;;  %v2120_v59 = vrot.slane %v7260_v46, 4  ;;  %v6650_v38 = vsel %vm4927_vm2, %v4226_v49, %v7261_v15  ;;  %v7264_v42 = vmov %v7260_v46  ;;  %v7273_v46 = vld [vmem:[#allocation19_spill] sm:$0xff] }
 0x14a   : > { %v6656_v52 = vsel %vm4927_vm2, %v2113_v44, %v7263_v56  ;;  %v6662_v63 = vsel %vm4927_vm2, %v4227_v30, %v7264_v42  ;;  %v1202_v27 = vrot.slane %v1201_v58, 4  ;;  %v7266_v9 = vrot.slane %v7265_v43, 5  ;;  %4622 = vmatmul.mubr.msk.bf16.gmra.mrb[28].mxu1 %vm2809_vm6, %v4365_v16  ;;  %v4788_v16 = vld [vmem:[%s4869_s22 + $0x64] sm:$0xf] }
 0x14b   : > { %v4370_v2 = vcombine.low %v6650_v38, %v6656_v52  ;;  %v2914_v51 = vsel %vm2891_vm8, %v2874_v12, %v2440_v55  ;;  %v1218_v47 = vshll.u32 %v7267_v41, 16  ;;  %v1222_v44 = vshrl.u32 %v7267_v41, 16  ;;  %v2570_v35 = vpop.permute.xlu0 %2569  ;;  %4625 = vmatprep.mubr.msk.bf16.mxu1 %vm2809_vm6, %v4366_v22 }
 0x14c   : > { %v6673_v17 = vsel %vm4927_vm2, %v2120_v59, %v7266_v9  ;;  %v3042_v30 = vsel %vm2891_vm8, %v3003_v33, %v2744_v1  ;;  %v1207_v28 = vsel %vm5013_vm5, %v1202_v27, %v1206_v32  ;;  %v4228_v23 = vrot.slane %v4212_v34, 9  ;;  %v7278_v9 = vld [vmem:[#allocation20_spill] sm:$0xff] }
 0x14d   : > { %v4371_v49 = vcombine.low %v6662_v63, %v6673_v17  ;;  %v7269_v12 = vrot.slane %v7268_v11, 5  ;;  %3312 = vmatprep.mubr.bf16.mxu0 %v3042_v30  ;;  %v6694_v36 = vcombine.low %v1197_v24, %v1207_v28  ;;  %v1220_v58 = vrot.slane %v1218_v47, 5  ;;  %v2266_v28 = vpop.permute.xlu1 %2265 }
 0x14e   : > { %v1224_v25 = vrot.slane %v1222_v44, 4  ;;  %v4229_v20 = vrot.slane %v4213_v3, 9  ;;  %v1252_v13 = vshll.u32 %v6232_v31, 16  ;;  %3313 = vmatmul.mubr.bf16.gmra.mrb[28].mxu0 %v2914_v51  ;;  %v7272_v33 = vrot.slane %v7271_v21, 5 }
 0x14f   : > { %v2127_v55 = vrot.slane %v7269_v12, 4  ;;  %v7270_v39 = vmov %v7269_v12  ;;  %v7274_v59 = vrot.slane %v7273_v46, 5  ;;  %v7276_v56 = vshll.u32 %v7275_v37, 16  ;;  %v4791_v46 = vld [vmem:[%s4869_s22 + $0x78] sm:$0xf] }
 0x150   : > { %v2126_v61 = vsel %vm4927_vm2, %v4228_v23, %v7270_v39  ;;  %v1225_v15 = vor.u32 %v1224_v25, %v1220_v58  ;;  %v1240_v43 = vrot.slane %v1239_v5, 4  ;;  %v7279_v3 = vrot.slane %v7278_v9, 5  ;;  %v2666_v25 = vpop.permute.xlu0 %2665  ;;  %v4790_v39 = vld [vmem:[%s4869_s22 + $0x70] sm:$0xf] }
 0x151   : > { %v2129_v32 = vsel %vm4927_vm2, %v2127_v55, %v7272_v33  ;;  %v2134_v24 = vrot.slane %v7274_v59, 4  ;;  %v1230_v42 = vrot.slane %v7276_v56, 5  ;;  %v7277_v31 = vmov %v7274_v59  ;;  %v2346_v55 = vpop.permute.xlu1 %2345  ;;  %v4792_v59 = vld [vmem:[%s4869_s22 + $0x7c] sm:$0xf] }
 0x152   : > { %v4372_v34 = vcombine.low %v2126_v61, %v2129_v32  ;;  %v2133_v27 = vsel %vm4927_vm2, %v4229_v20, %v7277_v31  ;;  %v1242_v51 = vshll.u32 %v6219_v0, 16  ;;  %v1246_v41 = vshrl.u32 %v6219_v0, 16  ;;  %4626 = vmatmul.mubr.msk.bf16.gmra.mrb[32].mxu1 %vm2809_vm6, %v4367_v62 }
 0x153   : > { %v2136_v1 = vsel %vm4927_vm2, %v2134_v24, %v7279_v3  ;;  %v1221_v47 = vsel %vm5013_vm5, %v6291_v45, %v1220_v58  ;;  %v1226_v44 = vrot.slane %v1225_v15, 4  ;;  %v1254_v11 = vrot.slane %v1252_v13, 5  ;;  %4629 = vmatprep.mubr.msk.bf16.mxu1 %vm2809_vm6, %v4368_v60  ;;  %v4789_v60 = vld [vmem:[%s4869_s22 + $0x6c] sm:$0xf]  ;;  %s4442_s22 = sshll.u32 %s7286_s15, 7 }
 0x154   : > { %v4373_v30 = vcombine.low %v2133_v27, %v2136_v1  ;;  %v1244_v40 = vrot.slane %v1242_v51, 5  ;;  %v1248_v57 = vrot.slane %v1246_v41, 4  ;;  %v4238_v58 = vcombine.low %v4787_v54, %v4788_v16  ;;  %v7280_v51 = vld [vmem:[#allocation41_spill] sm:$0xff]  ;;  %s6835_s5 = scalar_lea.vmem %s7082_s2, %s4442_s22 }
 0x155   : > { %v1231_v0 = vsel %vm5013_vm5, %v1226_v44, %v1230_v42  ;;  %v2966_v4 = vsel %vm2809_vm6, %v6609_v10, %v2570_v35  ;;  %v2442_v14 = vpop.permute.xlu1 %2441  ;;  %v4239_v61 = vcombine.low %v4789_v60, %v4790_v39  ;;  %v4241_v41 = vcombine.low %v7280_v51, %v6203_v18 }
 0x156   : > { %v4304_v45 = vcombine.low %v1221_v47, %v1231_v0  ;;  %v1245_v5 = vsel %vm5013_vm5, %v1240_v43, %v1244_v40  ;;  %v1249_v23 = vor.u32 %v1248_v57, %v1244_v40  ;;  %v2836_v48 = vsel %vm2809_vm6, %v4238_v58, %v2266_v28 }
 0x157   : > { %v3005_v22 = vsel %vm2858_vm7, %v2966_v4, %v2666_v25  ;;  %v2746_v13 = vpop.permute.xlu0 %2745  ;;  %v2876_v53 = vsel %vm2858_vm7, %v2836_v48, %v2346_v55 }
 0x158   : > { %v1250_v12 = vrot.slane %v1249_v23, 4  ;;  %v3045_v19 = vsel %vm2891_vm8, %v3005_v22, %v2746_v13  ;;  %v2917_v62 = vsel %vm2891_vm8, %v2876_v53, %v2442_v14 }
 0x159   : > { %3320 = vmatprep.mubr.bf16.mxu0 %v3045_v19 }
 0x15a   : > { %v1255_v26 = vsel %vm5013_vm5, %v1250_v12, %v1254_v11  ;;  %3321 = vmatmul.mubr.bf16.gmra.mrb[32].mxu0 %v2917_v62  ;;  %4630 = vmatmul.mubr.msk.bf16.gmra.mrb[36].mxu1 %vm2809_vm6, %v4369_v6 }
 0x15b   : > { %v4305_v20 = vcombine.low %v1245_v5, %v1255_v26  ;;  %v2268_v50 = vpop.permute.xlu1 %2267  ;;  %4633 = vmatprep.mubr.msk.bf16.mxu1 %vm2809_vm6, %v4370_v2  ;;  %v2572_v10 = vpop.permute.xlu0 %2571 }
 0x15c   : > { %v2839_v7 = vsel %vm2809_vm6, %v4239_v61, %v2268_v50  ;;  %v2969_v8 = vsel %vm2809_vm6, %v6694_v36, %v2572_v10  ;;  %v4240_v36 = vcombine.low %v4791_v46, %v4792_v59 }
 0x15f   : > { %v2348_v29 = vpop.permute.xlu1 %2347  ;;  %v2668_v21 = vpop.permute.xlu0 %2667 }
 0x160   : > { %v3007_v52 = vsel %vm2858_vm7, %v2969_v8, %v2668_v21  ;;  %v2878_v2 = vsel %vm2858_vm7, %v2839_v7, %v2348_v29 }
 0x162   : > { %4634 = vmatmul.mubr.msk.bf16.gmra.mrb[40].mxu1 %vm2809_vm6, %v4371_v49 }
 0x163   : > { %4637 = vmatprep.mubr.msk.bf16.mxu1 %vm2809_vm6, %v4372_v34  ;;  %v2444_v38 = vpop.permute.xlu1 %2443 }
 0x164   : > { %v2920_v63 = vsel %vm2891_vm8, %v2878_v2, %v2444_v38 }
 0x167   : > { %v2748_v6 = vpop.permute.xlu0 %2747 }
 0x168   : > { %v3048_v33 = vsel %vm2891_vm8, %v3007_v52, %v2748_v6 }
 0x169   : > { %3328 = vmatprep.mubr.bf16.mxu0 %v3048_v33 }
 0x16a   : > { %4638 = vmatmul.mubr.msk.bf16.gmra.mrb[44].mxu1 %vm2809_vm6, %v4373_v30  ;;  %3329 = vmatmul.mubr.bf16.gmra.mrb[36].mxu0 %v2920_v63 }
 0x16c   : > { %v2270_v17 = vpop.permute.xlu1 %2269  ;;  %v2574_v49 = vpop.permute.xlu0 %2573 }
 0x16d   : > { %v2842_v15 = vsel %vm2809_vm6, %v4240_v36, %v2270_v17  ;;  %v2972_v37 = vsel %vm2809_vm6, %v4304_v45, %v2574_v49 }
 0x170   : > { %v2350_v32 = vpop.permute.xlu1 %2349  ;;  %v2670_v24 = vpop.permute.xlu0 %2669 }
 0x171   : > { %v3009_v42 = vsel %vm2858_vm7, %v2972_v37, %v2670_v24  ;;  %v2880_v31 = vsel %vm2858_vm7, %v2842_v15, %v2350_v32 }
 0x174   : > { %v2446_v56 = vpop.permute.xlu1 %2445 }
 0x175   : > { %v2923_v43 = vsel %vm2891_vm8, %v2880_v31, %v2446_v56 }
 0x17b   : > { %v2750_v34 = vpop.permute.xlu0 %2749 }
 0x17c   : > { %v3051_v27 = vsel %vm2891_vm8, %v3009_v42, %v2750_v34 }
 0x17d   : > { %3336 = vmatprep.mubr.bf16.mxu0 %v3051_v27 }
 0x17e   : > { %3337 = vmatmul.mubr.bf16.gmra.mrb[40].mxu0 %v2923_v43 }
 0x17f   : > { %v2576_v3 = vpop.permute.xlu0 %2575 }
 0x180   : > { %v2272_v9 = vpop.permute.xlu1 %2271  ;;  %v2975_v30 = vsel %vm2809_vm6, %v4305_v20, %v2576_v3 }
 0x181   : > { %v2845_v44 = vsel %vm2809_vm6, %v4241_v41, %v2272_v9 }
 0x183   : > { %v2672_v47 = vpop.permute.xlu0 %2671 }
 0x184   : > { %v2352_v1 = vpop.permute.xlu1 %2351  ;;  %v3011_v40 = vsel %vm2858_vm7, %v2975_v30, %v2672_v47 }
 0x185   : > { %v2882_v35 = vsel %vm2858_vm7, %v2845_v44, %v2352_v1 }
 0x188   : > { %v2448_v28 = vpop.permute.xlu1 %2447 }
 0x189   : > { %v2926_v45 = vsel %vm2891_vm8, %v2882_v35, %v2448_v28 }
 0x18d   : > { %v2752_v57 = vpop.permute.xlu0 %2751 }
 0x18e   : > { %v3054_v0 = vsel %vm2891_vm8, %v3011_v40, %v2752_v57 }
 0x18f   : > { %3344 = vmatprep.mubr.bf16.mxu0 %v3054_v0 }
 0x190   : > { %3345 = vmatmul.mubr.bf16.gmra.mrb[44].mxu0 %v2926_v45 }
 0x192   : > { %v4491_v5 = vpop.f32.mrb[0].mxu0 }
 0x193   : > { %v4492_v23 = vpop.f32.mrb[1].mxu0 }
 0x194   : > { %v6795_v18 = vadd.f32 %v4492_v23, %v4491_v5  ;;  %v4494_v11 = vpop.f32.mrb[2].mxu0 }
 0x195   : > { %v4495_v12 = vpop.f32.mrb[3].mxu0 }
 0x196   : > { %v6797_v55 = vadd.f32 %v4495_v12, %v4494_v11 }
 0x19d   : > { %v4497_v26 = vpop.f32.mrb[4].mxu0 }
 0x19e   : > { %v4498_v54 = vpop.f32.mrb[5].mxu0 }
 0x19f   : > { %v4499_v16 = vadd.f32 %v4498_v54, %v4497_v26  ;;  %v4500_v58 = vpop.f32.mrb[6].mxu0 }
 0x1a0   : > { %v4501_v25 = vpop.f32.mrb[7].mxu0 }
 0x1a1   : > { %v4502_v20 = vadd.f32 %v4501_v25, %v4500_v58 }
 0x1ae   : > { %v4563_v48 = vpop.f32.mrb[0].mxu1 }
 0x1af   : > { %v4564_v4 = vpop.f32.mrb[1].mxu1 }
 0x1b0   : > { %v6799_v14 = vadd.f32 %v4564_v4, %v4563_v48  ;;  %v4566_v22 = vpop.f32.mrb[2].mxu1 }
 0x1b1   : > { %v4567_v13 = vpop.f32.mrb[3].mxu1 }
 0x1b2   : > { %v6801_v53 = vadd.f32 %v4567_v13, %v4566_v22 }
 0x1bd   : > { %v4503_v19 = vpop.f32.mrb[8].mxu0 }
 0x1be   : > { %v4504_v62 = vpop.f32.mrb[9].mxu0 }
 0x1bf   : > { %v6803_v50 = vadd.f32 %v4504_v62, %v4503_v19  ;;  %v4506_v10 = vpop.f32.mrb[10].mxu0 }
 0x1c0   : > { %v4507_v29 = vpop.f32.mrb[11].mxu0 }
 0x1c1   : > { %v6805_v60 = vadd.f32 %v4507_v29, %v4506_v10 }
 0x1d2   : > { %v4569_v39 = vpop.f32.mrb[4].mxu1 }
 0x1d3   : > { %v4570_v61 = vpop.f32.mrb[5].mxu1 }
 0x1d4   : > { %v6807_v21 = vadd.f32 %v4570_v61, %v4569_v39  ;;  %v4572_v7 = vpop.f32.mrb[6].mxu1 }
 0x1d5   : > { %v4573_v8 = vpop.f32.mrb[7].mxu1 }
 0x1d6   : > { %v6809_v38 = vadd.f32 %v4573_v8, %v4572_v7 }
 0x1e2   : > { %v4509_v52 = vpop.f32.mrb[12].mxu0 }
 0x1e3   : > { %v4510_v6 = vpop.f32.mrb[13].mxu0 }
 0x1e4   : > { %v6811_v2 = vadd.f32 %v4510_v6, %v4509_v52  ;;  %v4512_v33 = vpop.f32.mrb[14].mxu0 }
 0x1e5   : > { %v4513_v63 = vpop.f32.mrb[15].mxu0 }
 0x1e6   : > { %v6813_v17 = vadd.f32 %v4513_v63, %v4512_v33 }
 0x1f0   : > { %v4575_v49 = vpop.f32.mrb[8].mxu1 }
 0x1f1   : > { %v4576_v32 = vpop.f32.mrb[9].mxu1 }
 0x1f2   : > { %v6815_v46 = vadd.f32 %v4576_v32, %v4575_v49  ;;  %v4578_v59 = vpop.f32.mrb[10].mxu1 }
 0x1f3   : > { %v4579_v36 = vpop.f32.mrb[11].mxu1 }
 0x1f4   : > { %v6817_v24 = vadd.f32 %v4579_v36, %v4578_v59 }
 0x1f6   : > { %v4515_v15 = vpop.f32.mrb[16].mxu0 }
 0x1f7   : > { %v4516_v37 = vpop.f32.mrb[17].mxu0 }
 0x1f8   : > { %v6819_v56 = vadd.f32 %v4516_v37, %v4515_v15  ;;  %v4518_v42 = vpop.f32.mrb[18].mxu0 }
 0x1f9   : > { %v4519_v34 = vpop.f32.mrb[19].mxu0 }
 0x1fa   : > { %v6821_v31 = vadd.f32 %v4519_v34, %v4518_v42 }
 0x1fd   : > { %v4581_v27 = vpop.f32.mrb[12].mxu1 }
 0x1fe   : > { %v4582_v43 = vpop.f32.mrb[13].mxu1 }
 0x1ff   : > { %v6823_v9 = vadd.f32 %v4582_v43, %v4581_v27  ;;  %v4584_v3 = vpop.f32.mrb[14].mxu1 }
 0x200   : > { %v4521_v1 = vpop.f32.mrb[20].mxu0  ;;  %v4585_v51 = vpop.f32.mrb[15].mxu1 }
 0x201   : > { %v4522_v41 = vpop.f32.mrb[21].mxu0  ;;  %v6825_v47 = vadd.f32 %v4585_v51, %v4584_v3 }
 0x202   : > { %v6827_v44 = vadd.f32 %v4522_v41, %v4521_v1  ;;  %v4524_v30 = vpop.f32.mrb[22].mxu0 }
 0x203   : > { %v4525_v28 = vpop.f32.mrb[23].mxu0 }
 0x204   : > { %v6829_v40 = vadd.f32 %v4525_v28, %v4524_v30 }
 0x205   : > { %v4611_v57 = vpop.f32.mrb[16].mxu1 }
 0x206   : > { %v3428_v35 = vadd.f32 %v4611_v57, %v4499_v16  ;;  %v3419_v0 = vpop.f32.mrb[17].mxu1 }
 0x207   : > { %v3420_v45 = vadd.f32 %v6795_v18, %v3419_v0  ;;  %v4612_v5 = vpop.f32.mrb[18].mxu1 }
 0x208   : > { %v4445_v11 = vpack.c.bf16 %v3428_v35, %v3428_v35  ;;  %v3431_v12 = vadd.f32 %v4612_v5, %v4502_v20  ;;  %v3422_v26 = vpop.f32.mrb[19].mxu1  ;;  %v3779_v4 = vmul.f32 %v3428_v35, %v3428_v35  ;;  %v3710_v61 = vsel %vm2809_vm6, %v3428_v35, 0.0 }
 0x209   : > { %v4443_v58 = vpack.c.bf16 %v3420_v45, %v3420_v45  ;;  %v3777_v16 = vmul.f32 %v3420_v45, %v3420_v45  ;;  %v3423_v25 = vadd.f32 %v6797_v55, %v3422_v26  ;;  %v3707_v18 = vsel %vm2809_vm6, %v3420_v45, 0.0 }
 0x20a   : > { %3677 = vst.msk [vmem:[%s6835_s5 + $0x8] sm:$0xf] %vm3674_vm9, %v4445_v11  ;;  %v4446_v22 = vpack.c.bf16 %v3431_v12, %v3431_v12  ;;  %v3780_v10 = vmul.f32 %v3431_v12, %v3431_v12  ;;  %v3812_v32 = vsel %vm2809_vm6, %v3779_v4, 0.0  ;;  %v3712_v15 = vsel %vm2809_vm6, %v3431_v12, 0.0 }
 0x20b   : > { %v4527_v23 = vpop.f32.mrb[24].mxu0  ;;  %3675 = vst.msk [vmem:[%s6835_s5] sm:$0xf] %vm3674_vm9, %v4443_v58  ;;  %v4444_v19 = vpack.c.bf16 %v3423_v25, %v3423_v25  ;;  %v3708_v20 = vsel %vm2809_vm6, %v3423_v25, 0.0  ;;  %v3778_v62 = vmul.f32 %v3423_v25, %v3423_v25  ;;  %v3809_v7 = vsel %vm2809_vm6, %v3777_v16, 0.0 }
 0x20c   : > { %v4528_v54 = vpop.f32.mrb[25].mxu0  ;;  %3678 = vst.msk [vmem:[%s6835_s5 + $0xc] sm:$0xf] %vm3674_vm9, %v4446_v22  ;;  %v3709_v29 = vadd.f32 %v3708_v20, %v3707_v18  ;;  %v3814_v37 = vsel %vm2809_vm6, %v3780_v10, 0.0 }
 0x20d   : > { %v4530_v48 = vpop.f32.mrb[26].mxu0  ;;  %v6847_v55 = vadd.f32 %v4528_v54, %v4527_v23  ;;  %3676 = vst.msk [vmem:[%s6835_s5 + $0x4] sm:$0xf] %vm3674_vm9, %v4444_v19  ;;  %v3810_v8 = vsel %vm2809_vm6, %v3778_v62, 0.0  ;;  %v4615_v52 = vpop.f32.mrb[20].mxu1 }
 0x20e   : > { %v4531_v13 = vpop.f32.mrb[27].mxu0  ;;  %v3711_v6 = vadd.f32 %v3710_v61, %v3709_v29  ;;  %v3811_v33 = vadd.f32 %v3810_v8, %v3809_v7  ;;  %v3444_v63 = vadd.f32 %v4615_v52, %v6811_v2  ;;  %v3435_v49 = vpop.f32.mrb[21].mxu1 }
 0x20f   : > { %v6849_v39 = vadd.f32 %v4531_v13, %v4530_v48  ;;  %v3436_v59 = vadd.f32 %v6803_v50, %v3435_v49  ;;  %v4616_v36 = vpop.f32.mrb[22].mxu1 }
 0x210   : > { %v3813_v42 = vadd.f32 %v3812_v32, %v3811_v33  ;;  %v4449_v34 = vpack.c.bf16 %v3444_v63, %v3444_v63  ;;  %v3438_v27 = vpop.f32.mrb[23].mxu1  ;;  %v3713_v3 = vadd.f32 %v3712_v15, %v3711_v6  ;;  %v3447_v41 = vadd.f32 %v4616_v36, %v6813_v17 }
 0x211   : > { %v4447_v43 = vpack.c.bf16 %v3436_v59, %v3436_v59  ;;  %v3714_v1 = vsel %vm2809_vm6, %v3436_v59, 0.0  ;;  %v3781_v2 = vmul.f32 %v3436_v59, %v3436_v59  ;;  %v3439_v50 = vadd.f32 %v6805_v60, %v3438_v27 }
 0x212   : > { %3681 = vst.msk [vmem:[%s6835_s5 + $0x18] sm:$0xf] %vm3674_vm9, %v4449_v34  ;;  %v3815_v51 = vadd.f32 %v3814_v37, %v3813_v42  ;;  %v3715_v30 = vadd.f32 %v3714_v1, %v3713_v3  ;;  %v3783_v57 = vmul.f32 %v3444_v63, %v3444_v63  ;;  %v4450_v0 = vpack.c.bf16 %v3447_v41, %v3447_v41 }
 0x213   : > { %3679 = vst.msk [vmem:[%s6835_s5 + $0x10] sm:$0xf] %vm3674_vm9, %v4447_v43  ;;  %v3816_v28 = vsel %vm2809_vm6, %v3781_v2, 0.0  ;;  %v4448_v45 = vpack.c.bf16 %v3439_v50, %v3439_v50  ;;  %v3716_v5 = vsel %vm2809_vm6, %v3439_v50, 0.0  ;;  %v3782_v23 = vmul.f32 %v3439_v50, %v3439_v50 }
 0x214   : > { %v3817_v35 = vadd.f32 %v3816_v28, %v3815_v51  ;;  %3682 = vst.msk [vmem:[%s6835_s5 + $0x1c] sm:$0xf] %vm3674_vm9, %v4450_v0  ;;  %v3717_v12 = vadd.f32 %v3716_v5, %v3715_v30  ;;  %v3718_v26 = vsel %vm2809_vm6, %v3444_v63, 0.0  ;;  %v3784_v54 = vmul.f32 %v3447_v41, %v3447_v41 }
 0x215   : > { %v4619_v11 = vpop.f32.mrb[24].mxu1  ;;  %3680 = vst.msk [vmem:[%s6835_s5 + $0x14] sm:$0xf] %vm3674_vm9, %v4448_v45  ;;  %v3818_v58 = vsel %vm2809_vm6, %v3782_v23, 0.0  ;;  %v3820_v48 = vsel %vm2809_vm6, %v3783_v57, 0.0  ;;  %v3720_v19 = vsel %vm2809_vm6, %v3447_v41, 0.0 }
 0x216   : > { %v3460_v17 = vadd.f32 %v4619_v11, %v6827_v44  ;;  %v3451_v60 = vpop.f32.mrb[25].mxu1  ;;  %v3719_v4 = vadd.f32 %v3718_v26, %v3717_v12  ;;  %v3819_v22 = vadd.f32 %v3818_v58, %v3817_v35  ;;  %v3822_v6 = vsel %vm2809_vm6, %v3784_v54, 0.0 }
 0x217   : > { %v3452_v16 = vadd.f32 %v6819_v56, %v3451_v60  ;;  %v4620_v25 = vpop.f32.mrb[26].mxu1 }
 0x218   : > { %v4453_v13 = vpack.c.bf16 %v3460_v17, %v3460_v17  ;;  %v3454_v18 = vpop.f32.mrb[27].mxu1  ;;  %v3821_v61 = vadd.f32 %v3820_v48, %v3819_v22  ;;  %v3721_v56 = vadd.f32 %v3720_v19, %v3719_v4  ;;  %v3463_v7 = vadd.f32 %v4620_v25, %v6829_v40 }
 0x219   : > { %v4451_v20 = vpack.c.bf16 %v3452_v16, %v3452_v16  ;;  %v3722_v62 = vsel %vm2809_vm6, %v3452_v16, 0.0  ;;  %v3785_v10 = vmul.f32 %v3452_v16, %v3452_v16  ;;  %v3455_v8 = vadd.f32 %v6821_v31, %v3454_v18 }
 0x21a   : > { %3685 = vst.msk [vmem:[%s6835_s5 + $0x28] sm:$0xf] %vm3674_vm9, %v4453_v13  ;;  %v3787_v32 = vmul.f32 %v3460_v17, %v3460_v17  ;;  %v3723_v59 = vadd.f32 %v3722_v62, %v3721_v56  ;;  %v3823_v36 = vadd.f32 %v3822_v6, %v3821_v61  ;;  %v4454_v15 = vpack.c.bf16 %v3463_v7, %v3463_v7 }
 0x21b   : > { %3683 = vst.msk [vmem:[%s6835_s5 + $0x20] sm:$0xf] %vm3674_vm9, %v4451_v20  ;;  %v3824_v33 = vsel %vm2809_vm6, %v3785_v10, 0.0  ;;  %v4452_v37 = vpack.c.bf16 %v3455_v8, %v3455_v8  ;;  %v3724_v40 = vsel %vm2809_vm6, %v3455_v8, 0.0  ;;  %v3786_v42 = vmul.f32 %v3455_v8, %v3455_v8 }
 0x21c   : > { %v3825_v34 = vadd.f32 %v3824_v33, %v3823_v36  ;;  %3686 = vst.msk [vmem:[%s6835_s5 + $0x2c] sm:$0xf] %vm3674_vm9, %v4454_v15  ;;  %v3725_v27 = vadd.f32 %v3724_v40, %v3723_v59  ;;  %v3726_v2 = vsel %vm2809_vm6, %v3460_v17, 0.0  ;;  %v3788_v51 = vmul.f32 %v3463_v7, %v3463_v7 }
 0x21d   : > { %v4623_v31 = vpop.f32.mrb[28].mxu1  ;;  %3684 = vst.msk [vmem:[%s6835_s5 + $0x24] sm:$0xf] %vm3674_vm9, %v4452_v37  ;;  %v3826_v41 = vsel %vm2809_vm6, %v3786_v42, 0.0  ;;  %v3828_v28 = vsel %vm2809_vm6, %v3787_v32, 0.0  ;;  %v3728_v5 = vsel %vm2809_vm6, %v3463_v7, 0.0 }
 0x21e   : > { %v3467_v43 = vpop.f32.mrb[29].mxu1  ;;  %v3727_v57 = vadd.f32 %v3726_v2, %v3725_v27  ;;  %v3827_v35 = vadd.f32 %v3826_v41, %v3825_v34  ;;  %v3830_v54 = vsel %vm2809_vm6, %v3788_v51, 0.0 }
 0x21f   : > { %v3468_v50 = vadd.f32 %v6847_v55, %v3467_v43  ;;  %v4624_v30 = vpop.f32.mrb[30].mxu1 }
 0x220   : > { %v3470_v45 = vpop.f32.mrb[31].mxu1  ;;  %v3829_v17 = vadd.f32 %v3828_v28, %v3827_v35  ;;  %v3729_v60 = vadd.f32 %v3728_v5, %v3727_v57 }
 0x221   : > { %v4533_v44 = vpop.f32.mrb[28].mxu0  ;;  %v4455_v23 = vpack.c.bf16 %v3468_v50, %v3468_v50  ;;  %v3730_v11 = vsel %vm2809_vm6, %v3468_v50, 0.0  ;;  %v3789_v12 = vmul.f32 %v3468_v50, %v3468_v50  ;;  %v3471_v55 = vadd.f32 %v6849_v39, %v3470_v45 }
 0x222   : > { %v4534_v29 = vpop.f32.mrb[29].mxu0  ;;  %v3731_v25 = vadd.f32 %v3730_v11, %v3729_v60  ;;  %v3831_v48 = vadd.f32 %v3830_v54, %v3829_v17 }
 0x223   : > { %v4536_v52 = vpop.f32.mrb[30].mxu0  ;;  %v4535_v63 = vadd.f32 %v4534_v29, %v4533_v44  ;;  %3687 = vst.msk [vmem:[%s6835_s5 + $0x30] sm:$0xf] %vm3674_vm9, %v4455_v23  ;;  %v3832_v58 = vsel %vm2809_vm6, %v3789_v12, 0.0  ;;  %v4456_v4 = vpack.c.bf16 %v3471_v55, %v3471_v55  ;;  %v3732_v22 = vsel %vm2809_vm6, %v3471_v55, 0.0 }
 0x224   : > { %v4537_v49 = vpop.f32.mrb[31].mxu0  ;;  %v3790_v18 = vmul.f32 %v3471_v55, %v3471_v55  ;;  %v3833_v20 = vadd.f32 %v3832_v58, %v3831_v48  ;;  %v3733_v62 = vadd.f32 %v3732_v22, %v3731_v25 }
 0x225   : > { %v3476_v3 = vadd.f32 %v4623_v31, %v4535_v63  ;;  %v4538_v1 = vadd.f32 %v4537_v49, %v4536_v52  ;;  %v6909_v19 = vpop.f32.mrb[32].mxu1  ;;  %3688 = vst.msk [vmem:[%s6835_s5 + $0x34] sm:$0xf] %vm3674_vm9, %v4456_v4 }
 0x226   : > { %v3483_v10 = vpop.f32.mrb[33].mxu1  ;;  %v3834_v61 = vsel %vm2809_vm6, %v3790_v18, 0.0 }
 0x227   : > { %v4457_v0 = vpack.c.bf16 %v3476_v3, %v3476_v3  ;;  %v3479_v26 = vadd.f32 %v4624_v30, %v4538_v1  ;;  %v3791_v16 = vmul.f32 %v3476_v3, %v3476_v3  ;;  %v3734_v13 = vsel %vm2809_vm6, %v3476_v3, 0.0  ;;  %v6918_v7 = vpop.f32.mrb[34].mxu1 }
 0x228   : > { %v3735_v8 = vadd.f32 %v3734_v13, %v3733_v62  ;;  %v3835_v52 = vadd.f32 %v3834_v61, %v3833_v20  ;;  %v3486_v6 = vpop.f32.mrb[35].mxu1 }
 0x229   : > { %3689 = vst.msk [vmem:[%s6835_s5 + $0x38] sm:$0xf] %vm3674_vm9, %v4457_v0  ;;  %v4458_v44 = vpack.c.bf16 %v3479_v26, %v3479_v26  ;;  %v3792_v39 = vmul.f32 %v3479_v26, %v3479_v26  ;;  %v3836_v29 = vsel %vm2809_vm6, %v3791_v16, 0.0  ;;  %v3736_v56 = vsel %vm2809_vm6, %v3479_v26, 0.0 }
 0x22a   : > { %v3837_v63 = vadd.f32 %v3836_v29, %v3835_v52  ;;  %v3737_v49 = vadd.f32 %v3736_v56, %v3735_v8 }
 0x22b   : > { %3690 = vst.msk [vmem:[%s6835_s5 + $0x3c] sm:$0xf] %vm3674_vm9, %v4458_v44  ;;  %v3838_v33 = vsel %vm2809_vm6, %v3792_v39, 0.0 }
 0x22c   : > { %v3839_v59 = vadd.f32 %v3838_v33, %v3837_v63 }
 0x22d   : > { %v4539_v32 = vpop.f32.mrb[32].mxu0  ;;  %v6921_v15 = vpop.f32.mrb[36].mxu1 }
 0x22e   : > { %v4540_v36 = vpop.f32.mrb[33].mxu0  ;;  %v6923_v42 = vpop.f32.mrb[37].mxu1 }
 0x22f   : > { %v4541_v37 = vadd.f32 %v4540_v36, %v4539_v32  ;;  %v4542_v40 = vpop.f32.mrb[34].mxu0  ;;  %v6925_v34 = vpop.f32.mrb[38].mxu1 }
 0x230   : > { %v4543_v31 = vpop.f32.mrb[35].mxu0  ;;  %v6927_v3 = vpop.f32.mrb[39].mxu1 }
 0x231   : > { %v4544_v27 = vadd.f32 %v4543_v31, %v4542_v40  ;;  %v3484_v43 = vadd.f32 %v4541_v37, %v3483_v10 }
 0x233   : > { %v4459_v1 = vpack.c.bf16 %v3484_v43, %v3484_v43  ;;  %v3738_v2 = vsel %vm2809_vm6, %v3484_v43, 0.0  ;;  %v3793_v51 = vmul.f32 %v3484_v43, %v3484_v43  ;;  %v3487_v41 = vadd.f32 %v4544_v27, %v3486_v6 }
 0x234   : > { %v3739_v50 = vadd.f32 %v3738_v2, %v3737_v49 }
 0x235   : > { %3691 = vst.msk [vmem:[%s6835_s5 + $0x40] sm:$0xf] %vm3674_vm9, %v4459_v1  ;;  %v3840_v30 = vsel %vm2809_vm6, %v3793_v51, 0.0  ;;  %v4460_v28 = vpack.c.bf16 %v3487_v41, %v3487_v41  ;;  %v3740_v57 = vsel %vm2809_vm6, %v3487_v41, 0.0  ;;  %v3794_v35 = vmul.f32 %v3487_v41, %v3487_v41  ;;  %v4635_v5 = vpop.f32.mrb[40].mxu1 }
 0x236   : > { %v3841_v0 = vadd.f32 %v3840_v30, %v3839_v59  ;;  %v3741_v45 = vadd.f32 %v3740_v57, %v3739_v50  ;;  %v6938_v11 = vadd.f32 %v4635_v5, %v6807_v21  ;;  %v3515_v12 = vpop.f32.mrb[41].mxu1 }
 0x237   : > { %3692 = vst.msk [vmem:[%s6835_s5 + $0x44] sm:$0xf] %vm3674_vm9, %v4460_v28  ;;  %v3842_v23 = vsel %vm2809_vm6, %v3794_v35, 0.0  ;;  %v6941_v60 = vadd.f32 %v6799_v14, %v3515_v12  ;;  %v4636_v55 = vpop.f32.mrb[42].mxu1 }
 0x238   : > { %v3843_v17 = vadd.f32 %v3842_v23, %v3841_v0  ;;  %v4469_v26 = vpack.c.bf16 %v6938_v11, %v6938_v11  ;;  %v6946_v54 = vadd.f32 %v4636_v55, %v6809_v38  ;;  %v3518_v58 = vpop.f32.mrb[43].mxu1 }
 0x239   : > { %v4467_v16 = vpack.c.bf16 %v6941_v60, %v6941_v60  ;;  %v6951_v25 = vadd.f32 %v6801_v53, %v3518_v58 }
 0x23a   : > { %3701 = vst.msk [vmem:[%s6835_s5 + $0x68] sm:$0xf] %vm3674_vm9, %v4469_v26  ;;  %v4470_v14 = vpack.c.bf16 %v6946_v54, %v6946_v54 }
 0x23b   : > { %3699 = vst.msk [vmem:[%s6835_s5 + $0x60] sm:$0xf] %vm3674_vm9, %v4467_v16  ;;  %v4468_v21 = vpack.c.bf16 %v6951_v25, %v6951_v25 }
 0x23c   : > { %3702 = vst.msk [vmem:[%s6835_s5 + $0x6c] sm:$0xf] %vm3674_vm9, %v4470_v14 }
 0x23d   : > { %3700 = vst.msk [vmem:[%s6835_s5 + $0x64] sm:$0xf] %vm3674_vm9, %v4468_v21  ;;  %v4639_v38 = vpop.f32.mrb[44].mxu1  ;;  %v4545_v48 = vpop.f32.mrb[36].mxu0 }
 0x23e   : > { %v6966_v53 = vadd.f32 %v4639_v38, %v6823_v9  ;;  %v3531_v4 = vpop.f32.mrb[45].mxu1  ;;  %v4546_v22 = vpop.f32.mrb[37].mxu0 }
 0x23f   : > { %v6969_v13 = vadd.f32 %v6815_v46, %v3531_v4  ;;  %v4640_v18 = vpop.f32.mrb[46].mxu1  ;;  %v4547_v44 = vadd.f32 %v4546_v22, %v4545_v48  ;;  %v4548_v39 = vpop.f32.mrb[38].mxu0 }
 0x240   : > { %v4473_v20 = vpack.c.bf16 %v6966_v53, %v6966_v53  ;;  %v3534_v62 = vpop.f32.mrb[47].mxu1  ;;  %v4549_v10 = vpop.f32.mrb[39].mxu0  ;;  %v6976_v29 = vadd.f32 %v4640_v18, %v6825_v47 }
 0x241   : > { %v4471_v9 = vpack.c.bf16 %v6969_v13, %v6969_v13  ;;  %v3492_v61 = vadd.f32 %v6909_v19, %v4547_v44  ;;  %v4550_v46 = vadd.f32 %v4549_v10, %v4548_v39  ;;  %v6982_v56 = vadd.f32 %v6817_v24, %v3534_v62 }
 0x242   : > { %3705 = vst.msk [vmem:[%s6835_s5 + $0x78] sm:$0xf] %vm3674_vm9, %v4473_v20  ;;  %v4474_v8 = vpack.c.bf16 %v6976_v29, %v6976_v29  ;;  %v3801_v44 = vmul.f32 %v6941_v60, %v6941_v60 }
 0x243   : > { %3703 = vst.msk [vmem:[%s6835_s5 + $0x70] sm:$0xf] %vm3674_vm9, %v4471_v9  ;;  %v4461_v52 = vpack.c.bf16 %v3492_v61, %v3492_v61  ;;  %v3742_v6 = vsel %vm2809_vm6, %v3492_v61, 0.0  ;;  %v3795_v47 = vmul.f32 %v3492_v61, %v3492_v61  ;;  %v3495_v33 = vadd.f32 %v6918_v7, %v4550_v46 }
 0x244   : > { %v3743_v19 = vadd.f32 %v3742_v6, %v3741_v45  ;;  %3706 = vst.msk [vmem:[%s6835_s5 + $0x7c] sm:$0xf] %vm3674_vm9, %v4474_v8  ;;  %v4472_v24 = vpack.c.bf16 %v6982_v56, %v6982_v56  ;;  %v3754_v46 = vsel %vm2809_vm6, %v6941_v60, 0.0  ;;  %v3758_v60 = vsel %vm2809_vm6, %v6938_v11, 0.0 }
 0x245   : > { %3693 = vst.msk [vmem:[%s6835_s5 + $0x48] sm:$0xf] %vm3674_vm9, %v4461_v52  ;;  %v3844_v63 = vsel %vm2809_vm6, %v3795_v47, 0.0  ;;  %v4462_v49 = vpack.c.bf16 %v3495_v33, %v3495_v33  ;;  %v3744_v32 = vsel %vm2809_vm6, %v3495_v33, 0.0  ;;  %v3796_v59 = vmul.f32 %v3495_v33, %v3495_v33 }
 0x246   : > { %v3845_v36 = vadd.f32 %v3844_v63, %v3843_v17  ;;  %v3745_v37 = vadd.f32 %v3744_v32, %v3743_v19  ;;  %3704 = vst.msk [vmem:[%s6835_s5 + $0x74] sm:$0xf] %vm3674_vm9, %v4472_v24  ;;  %v3803_v47 = vmul.f32 %v6938_v11, %v6938_v11  ;;  %v3856_v33 = vsel %vm2809_vm6, %v3801_v44, 0.0 }
 0x247   : > { %3694 = vst.msk [vmem:[%s6835_s5 + $0x4c] sm:$0xf] %vm3674_vm9, %v4462_v49  ;;  %v3846_v7 = vsel %vm2809_vm6, %v3796_v59, 0.0  ;;  %v3756_v19 = vsel %vm2809_vm6, %v6951_v25, 0.0  ;;  %v3804_v49 = vmul.f32 %v6946_v54, %v6946_v54  ;;  %v3762_v11 = vsel %vm2809_vm6, %v6969_v13, 0.0 }
 0x248   : > { %v3847_v40 = vadd.f32 %v3846_v7, %v3845_v36  ;;  %v3760_v7 = vsel %vm2809_vm6, %v6946_v54, 0.0 }
 0x251   : > { %v4551_v31 = vpop.f32.mrb[40].mxu0 }
 0x252   : > { %v4552_v27 = vpop.f32.mrb[41].mxu0 }
 0x253   : > { %v4553_v43 = vadd.f32 %v4552_v27, %v4551_v31  ;;  %v4554_v1 = vpop.f32.mrb[42].mxu0  ;;  %v3862_v27 = vsel %vm2809_vm6, %v3804_v49, 0.0 }
 0x254   : > { %v4555_v2 = vpop.f32.mrb[43].mxu0 }
 0x255   : > { %v3500_v51 = vadd.f32 %v4553_v43, %v6923_v42  ;;  %v4556_v41 = vadd.f32 %v4555_v2, %v4554_v1  ;;  %v3806_v43 = vmul.f32 %v6982_v56, %v6982_v56 }
 0x257   : > { %v4463_v50 = vpack.c.bf16 %v3500_v51, %v3500_v51  ;;  %v3746_v30 = vsel %vm2809_vm6, %v3500_v51, 0.0  ;;  %v3797_v28 = vmul.f32 %v3500_v51, %v3500_v51  ;;  %v3503_v57 = vadd.f32 %v4556_v41, %v6927_v3 }
 0x258   : > { %v3747_v35 = vadd.f32 %v3746_v30, %v3745_v37  ;;  %v3860_v37 = vsel %vm2809_vm6, %v3803_v47, 0.0  ;;  %v3807_v51 = vmul.f32 %v6966_v53, %v6966_v53  ;;  %v3764_v41 = vsel %vm2809_vm6, %v6982_v56, 0.0 }
 0x259   : > { %3695 = vst.msk [vmem:[%s6835_s5 + $0x50] sm:$0xf] %vm3674_vm9, %v4463_v50  ;;  %v3848_v0 = vsel %vm2809_vm6, %v3797_v28, 0.0  ;;  %v4464_v45 = vpack.c.bf16 %v3503_v57, %v3503_v57  ;;  %v3748_v5 = vsel %vm2809_vm6, %v3503_v57, 0.0  ;;  %v3798_v23 = vmul.f32 %v3503_v57, %v3503_v57 }
 0x25a   : > { %v3849_v12 = vadd.f32 %v3848_v0, %v3847_v40  ;;  %v3749_v17 = vadd.f32 %v3748_v5, %v3747_v35  ;;  %v3766_v28 = vsel %vm2809_vm6, %v6966_v53, 0.0  ;;  %v3866_v57 = vsel %vm2809_vm6, %v3806_v43, 0.0 }
 0x25b   : > { %3696 = vst.msk [vmem:[%s6835_s5 + $0x54] sm:$0xf] %vm3674_vm9, %v4464_v45  ;;  %v3850_v42 = vsel %vm2809_vm6, %v3798_v23, 0.0  ;;  %v3868_v45 = vsel %vm2809_vm6, %v3807_v51, 0.0  ;;  %v3768_v5 = vsel %vm2809_vm6, %v6976_v29, 0.0 }
 0x25c   : > { %v3851_v55 = vadd.f32 %v3850_v42, %v3849_v12 }
 0x263   : > { %v4557_v26 = vpop.f32.mrb[44].mxu0 }
 0x264   : > { %v4558_v58 = vpop.f32.mrb[45].mxu0 }
 0x265   : > { %v4559_v3 = vadd.f32 %v4558_v58, %v4557_v26  ;;  %v4560_v16 = vpop.f32.mrb[46].mxu0 }
 0x266   : > { %v4561_v14 = vpop.f32.mrb[47].mxu0 }
 0x267   : > { %v3508_v21 = vadd.f32 %v6921_v15, %v4559_v3  ;;  %v4562_v38 = vadd.f32 %v4561_v14, %v4560_v16 }
 0x269   : > { %v4465_v48 = vpack.c.bf16 %v3508_v21, %v3508_v21  ;;  %v3750_v4 = vsel %vm2809_vm6, %v3508_v21, 0.0  ;;  %v3799_v22 = vmul.f32 %v3508_v21, %v3508_v21  ;;  %v3511_v18 = vadd.f32 %v6925_v34, %v4562_v38 }
 0x26a   : > { %v3751_v39 = vadd.f32 %v3750_v4, %v3749_v17  ;;  %v3802_v34 = vmul.f32 %v6951_v25, %v6951_v25  ;;  %v3805_v25 = vmul.f32 %v6969_v13, %v6969_v13  ;;  %v3808_v13 = vmul.f32 %v6976_v29, %v6976_v29 }
 0x26b   : > { %3697 = vst.msk [vmem:[%s6835_s5 + $0x58] sm:$0xf] %vm3674_vm9, %v4465_v48  ;;  %v3852_v20 = vsel %vm2809_vm6, %v3799_v22, 0.0  ;;  %v4466_v62 = vpack.c.bf16 %v3511_v18, %v3511_v18  ;;  %v3752_v10 = vsel %vm2809_vm6, %v3511_v18, 0.0  ;;  %v3800_v15 = vmul.f32 %v3511_v18, %v3511_v18 }
 0x26c   : > { %v3853_v9 = vadd.f32 %v3852_v20, %v3851_v55  ;;  %v3753_v61 = vadd.f32 %v3752_v10, %v3751_v39  ;;  %v3858_v32 = vsel %vm2809_vm6, %v3802_v34, 0.0  ;;  %v3864_v54 = vsel %vm2809_vm6, %v3805_v25, 0.0 }
 0x26d   : > { %3698 = vst.msk [vmem:[%s6835_s5 + $0x5c] sm:$0xf] %vm3674_vm9, %v4466_v62  ;;  %v3854_v8 = vsel %vm2809_vm6, %v3800_v15, 0.0  ;;  %v3870_v12 = vsel %vm2809_vm6, %v3808_v13, 0.0 }
 0x26e   : > { %v3755_v52 = vadd.f32 %v3754_v46, %v3753_v61  ;;  %v3855_v6 = vadd.f32 %v3854_v8, %v3853_v9 }
 0x270   : > { %v3757_v24 = vadd.f32 %v3756_v19, %v3755_v52  ;;  %v3857_v63 = vadd.f32 %v3856_v33, %v3855_v6 }
 0x272   : > { %v3759_v59 = vadd.f32 %v3758_v60, %v3757_v24  ;;  %v3859_v36 = vadd.f32 %v3858_v32, %v3857_v63 }
 0x274   : > { %v3761_v40 = vadd.f32 %v3760_v7, %v3759_v59  ;;  %v3861_v31 = vadd.f32 %v3860_v37, %v3859_v36 }
 0x276   : > { %v3763_v1 = vadd.f32 %v3762_v11, %v3761_v40  ;;  %v3863_v2 = vadd.f32 %v3862_v27, %v3861_v31 }
 0x278   : > { %v3765_v50 = vadd.f32 %v3764_v41, %v3763_v1  ;;  %v3865_v30 = vadd.f32 %v3864_v54, %v3863_v2 }
 0x27a   : > { %v3767_v35 = vadd.f32 %v3766_v28, %v3765_v50  ;;  %v3867_v0 = vadd.f32 %v3866_v57, %v3865_v30 }
 0x27c   : > { %v3769_v23 = vadd.f32 %v3768_v5, %v3767_v35  ;;  %v3869_v56 = vadd.f32 %v3868_v45, %v3867_v0 }
 0x27e   : > { %v3770_v17 = vrot.slane %v3769_v23, 4  ;;  %v3871_v53 = vadd.f32 %v3870_v12, %v3869_v56 }
 0x280   : > { %v3771_v42 = vadd.f32 %v3770_v17, %v3769_v23  ;;  %v3872_v55 = vrot.slane %v3871_v53, 4 }
 0x282   : > { %v3772_v26 = vrot.slane %v3771_v42, 2  ;;  %v3873_v58 = vadd.f32 %v3872_v55, %v3871_v53 }
 0x284   : > { %v3773_v3 = vadd.f32 %v3772_v26, %v3771_v42  ;;  %v3874_v16 = vrot.slane %v3873_v58, 2 }
 0x286   : > { %v3774_v14 = vrot.slane %v3773_v3, 1  ;;  %v3875_v21 = vadd.f32 %v3874_v16, %v3873_v58 }
 0x288   : > { %v3775_v29 = vadd.f32 %v3774_v14, %v3773_v3  ;;  %v3876_v38 = vrot.slane %v3875_v21, 1 }
 0x28a   : > { %v3877_v48 = vadd.f32 %v3876_v38, %v3875_v21  ;;  %3880 = vst.msk [vmem:[%s261_s27] sm:$0x1] %vm3879_vm10, %v3775_v29 }
 0x28c   : > { %3881 = vst.msk [vmem:[%s267_s30] sm:$0x1] %vm3879_vm10, %v3877_v48 }
 0x28d PF: > { %s15_s17 = sadd.s32 1, %s4815_s17   ;;  %s7281_s15 = smov %s4811_s16 }
 0x28e   : > { %p12_p5 = scmp.ge.s32.totalorder %s15_s17, 4   ;;  %s7282_s16 = smov %s7284_s18 }
 0x290   :  { %14 = sbr.rel (!%p12_p5) target bundleno = 2 (0x2), region = 87 }

</bundles_post_ra>
